<compile_context>
chip_gen: v7x
topology: tpu7x:2x2x1
jax: 0.10.0
libtpu: 0.0.40
codegen_flags: <defaults>
</compile_context>

<pallas_src>
import functools

import jax
import jax.numpy as jnp
from jax import lax
from jax.experimental import pallas as pl
from jax.experimental.pallas import tpu as pltpu


def _shift_cols_reflect(t, dx, W):
    """Reflection-padded column window for horizontal tap dx in {0,1,2}.

    t: (Hp, W, Cp).  Returns (Hp, W, Cp) where column c holds original column
    (c + dx - 1) under ReflectionPad2d(1) semantics.
    """
    # TODO(synk): on v5e this could be pltpu.roll(t, +-1, axis=1) plus a
    #   jnp.where fix-up of the single boundary column (XLU slot, fewer copies).
    if dx == 0:                      # x-1, left edge reflects to column 1
        return jnp.concatenate([t[:, 1:2], t[:, :W - 1]], axis=1)
    if dx == 1:                      # x
        return t
    return jnp.concatenate([t[:, 1:], t[:, W - 2:W - 1]], axis=1)  # x+1


def _resblock_kernel(x_ref, w1_ref, w2_ref, o_ref, h_scr, *, H, W, C, Cp):
    HW = H * W
    inv_hw = 1.0 / float(HW)
    eps = 1e-5

    x_pad = x_ref[0]                              # (H+2, W, Cp) f32, rows pre-padded

    def conv3x3(rows_bf16, w_ref):
        # rows_bf16: (H+2, W, Cp) bf16 with reflection-padded rows.
        # 9 accumulated per-tap matmuls (no materialized (HW, 9*Cp) im2col slab).
        acc = jnp.zeros((HW, Cp), jnp.float32)
        for dx in range(3):                       # dx outer: 2 sublane shifts total
            slab = _shift_cols_reflect(rows_bf16, dx, W)      # (H+2, W, Cp)
            for dy in range(3):                   # dy: untiled-axis slice (cheap)
                k = dx * 3 + dy
                tap = slab[dy:dy + H].reshape(HW, Cp)
                acc = acc + jnp.dot(tap, w_ref[k * Cp:(k + 1) * Cp, :],
                                    preferred_element_type=jnp.float32)
        return acc

    def inorm_stats(t):
        # Single traversal: per-channel sum / sum-of-squares, f32 accumulators.
        s = jnp.sum(t, axis=0, keepdims=True)
        s2 = jnp.sum(t * t, axis=0, keepdims=True)
        m = s * inv_hw
        v = jnp.maximum(s2 * inv_hw - m * m, 0.0)
        return m, lax.rsqrt(v + eps)

    # ---- conv1 + InstanceNorm + ReLU (conv bias dropped: the affine-less
    #      InstanceNorm mean subtraction cancels a per-channel constant) ----
    h = conv3x3(x_pad.astype(jnp.bfloat16), w1_ref)           # (HW, Cp) f32
    m1, r1 = inorm_stats(h)
    h_bf = jnp.maximum((h - m1) * r1, 0.0).astype(jnp.bfloat16).reshape(H, W, Cp)

    # ---- write intermediate straight into the row-padded bf16 scratch
    #      (no cast + leading-axis concat copy) ----
    h_scr[1:H + 1] = h_bf
    h_scr[0:1] = h_bf[1:2]                      # reflect: padded row -1 <- row 1
    h_scr[H + 1:H + 2] = h_bf[H - 2:H - 1]      # reflect: padded row H  <- row H-2

    # ---- conv2 + InstanceNorm + residual add + store (only valid channels) ----
    g = conv3x3(h_scr[...], w2_ref)                            # (HW, Cp) f32
    m2, r2 = inorm_stats(g)
    x_in = x_pad[1:H + 1].reshape(HW, Cp)                      # interior rows, f32
    o = (x_in + (g - m2) * r2).reshape(H, W, Cp)
    o_ref[0] = o[:, :, :C].astype(o_ref.dtype)


def residual_block(x_nchw, w1, b1, w2, b2):
    """x_nchw: (N, C, H, W); w*: (3, 3, C, C) HWIO (ky, kx, cin, cout); b*: (C,).

    b1/b2 are accepted for Conv2d API parity but unused: a bias added before
    an affine-less InstanceNorm is cancelled exactly by the mean subtraction.
    """
    del b1, b2
    N, C, H, W = x_nchw.shape
    Cp = ((C + 127) // 128) * 128                 # lane-dense internal channels

    # NCHW -> NHWC (channels on the lane axis); pad channels for the MXU lanes.
    x = jnp.transpose(x_nchw, (0, 2, 3, 1))
    if Cp != C:
        x = jnp.pad(x, ((0, 0), (0, 0), (0, 0), (0, Cp - C)))
    # Reflection-pre-pad rows so in-kernel dy taps are aligned major-axis slices.
    x = jnp.pad(x, ((0, 0), (1, 1), (0, 0), (0, 0)), mode="reflect")  # (N,H+2,W,Cp)

    def prep_w(w):
        wp = w
        if Cp != C:
            wp = jnp.pad(w, ((0, 0), (0, 0), (0, Cp - C), (0, Cp - C)))
        # (ky,kx,ci,co) -> (kx,ky,ci,co) -> (9*Cp, Cp): row block k = kx*3+ky,
        # matching the kernel's tap order (dx outer, dy inner).
        return jnp.transpose(wp, (1, 0, 2, 3)).reshape(9 * Cp, Cp).astype(jnp.bfloat16)

    w1f, w2f = prep_w(w1), prep_w(w2)

    kernel = functools.partial(_resblock_kernel, H=H, W=W, C=C, Cp=Cp)

    # Scoped-VMEM budget: double-buffered in/out blocks + weights + the bf16
    # intermediate scratch + activation temporaries, 2x headroom, clamped to
    # ~85% of this generation's physical VMEM (v5e/v6e 128 MiB, v7x 64 MiB).
    vmem_est = (2 * (H + 2) * W * Cp * 4          # input block, double-buffered
                + 2 * H * W * C * 4               # output block, double-buffered
                + 2 * 2 * 9 * Cp * Cp * 2         # both weight matrices, dbuf, bf16
                + (H + 2) * W * Cp * 2            # row-padded bf16 intermediate scratch
                + 4 * (H + 2) * W * Cp * 2        # bf16 input cast + dx-shifted slabs
                + 4 * H * W * Cp * 4)             # f32 accumulator / activation temps
    try:
        vmem_cap = pltpu.get_tpu_info().vmem_capacity_bytes
    except Exception:                             # conservative fallback
        vmem_cap = 64 * 1024 * 1024
    vmem_limit = int(min(max(2 * vmem_est, 32 * 1024 * 1024),
                         int(0.85 * vmem_cap)))

    out = pl.pallas_call(
        kernel,
        out_shape=jax.ShapeDtypeStruct((N, H, W, C), x_nchw.dtype),
        grid_spec=pltpu.PrefetchScalarGridSpec(
            num_scalar_prefetch=0,
            grid=(N,),
            in_specs=[
                pl.BlockSpec((1, H + 2, W, Cp), lambda n: (n, 0, 0, 0)),
                # Weight index maps are constant, so Pallas skips re-copying
                # them across grid steps.  (pl.Buffered(1) would also drop the
                # second buffer; left out to stay conservative.)
                pl.BlockSpec((9 * Cp, Cp), lambda n: (0, 0)),
                pl.BlockSpec((9 * Cp, Cp), lambda n: (0, 0)),
            ],
            out_specs=pl.BlockSpec((1, H, W, C), lambda n: (n, 0, 0, 0)),
            scratch_shapes=[pltpu.VMEM((H + 2, W, Cp), jnp.bfloat16)],
        ),
        compiler_params=pltpu.CompilerParams(
            dimension_semantics=("parallel",),
            vmem_limit_bytes=vmem_limit),
    )(x, w1f, w2f)

    return jnp.transpose(out, (0, 3, 1, 2))       # back to NCHW


def _reference(x_nchw, w1, b1, w2, b2):
    # Pure-JAX f32 reference using lax.conv (NCHW), matching PyTorch semantics.
    def rpad(x):
        return jnp.pad(x, ((0, 0), (0, 0), (1, 1), (1, 1)), mode="reflect")

    def conv(x, w_hwio, b):
        w_oihw = jnp.transpose(w_hwio, (3, 2, 0, 1))
        y = lax.conv_general_dilated(
            rpad(x), w_oihw, (1, 1), "VALID",
            dimension_numbers=("NCHW", "OIHW", "NCHW"))
        return y + b[None, :, None, None]

    def inorm(x, eps=1e-5):
        m = x.mean(axis=(2, 3), keepdims=True)
        v = ((x - m) ** 2).mean(axis=(2, 3), keepdims=True)
        return (x - m) * lax.rsqrt(v + eps)

    h = jax.nn.relu(inorm(conv(x_nchw, w1, b1)))
    h = inorm(conv(h, w2, b2))
    return x_nchw + h


if __name__ == "__main__":
    N, C, H, W = 2, 4, 16, 16
    key = jax.random.PRNGKey(0)
    k_x, k_w1, k_b1, k_w2, k_b2 = jax.random.split(key, 5)

    x = jax.random.normal(k_x, (N, C, H, W), jnp.float32)
    # Conv2d(in_features, in_features, 3) weights, stored HWIO for the kernel.
    fan_in = C * 3 * 3
    bound = 1.0 / (fan_in ** 0.5)
    w1 = jax.random.uniform(k_w1, (3, 3, C, C), jnp.float32, -bound, bound)
    b1 = jax.random.uniform(k_b1, (C,), jnp.float32, -bound, bound)
    w2 = jax.random.uniform(k_w2, (3, 3, C, C), jnp.float32, -bound, bound)
    b2 = jax.random.uniform(k_b2, (C,), jnp.float32, -bound, bound)

    out = jax.block_until_ready(residual_block(x, w1, b1, w2, b2))
    ref = jax.block_until_ready(_reference(x, w1, b1, w2, b2))

    assert out.shape == (N, C, H, W)
    # Tolerance accounts for bf16 MXU inputs (f32 accumulation) vs the f32 ref.
    assert jnp.max(jnp.abs(out - ref)) < 5e-2, "mismatch vs reference"
    print("KERNEL_OK")
</pallas_src>

<mosaic_0001>
module attributes {stable_mosaic.version = 11 : i64} {
  func.func @_resblock_kernel(%arg0: i32, %arg1: memref<1x18x16x128xf32, #tpu.memory_space<vmem>>, %arg2: memref<1152x128xbf16, #tpu.memory_space<vmem>>, %arg3: memref<1152x128xbf16, #tpu.memory_space<vmem>>, %arg4: memref<1x16x16x4xf32, #tpu.memory_space<vmem>>, %arg5: memref<18x16x128xbf16, #tpu.memory_space<vmem>>) attributes {dimension_semantics = [#tpu.dimension_semantics<parallel>], iteration_bounds = array<i64: 2>, scalar_prefetch = 0 : i64, scratch_operands = 1 : i64, tpu.core_type = #tpu.core_type<tc>, window_params = [{transform_indices = @transform_0, window_bounds = array<i64: 1, 18, 16, 128>}, {pipeline_mode = #tpu.pipeline_mode<synchronous>, transform_indices = @transform_1, window_bounds = array<i64: 1152, 128>}, {pipeline_mode = #tpu.pipeline_mode<synchronous>, transform_indices = @transform_2, window_bounds = array<i64: 1152, 128>}, {transform_indices = @transform_3, window_bounds = array<i64: 1, 16, 16, 4>}]} {
    %c0 = arith.constant 0 : index
    %c0_0 = arith.constant 0 : index
    %c0_1 = arith.constant 0 : index
    %c0_2 = arith.constant 0 : index
    %0 = vector.load %arg1[%c0, %c0_0, %c0_1, %c0_2] : memref<1x18x16x128xf32, #tpu.memory_space<vmem>>, vector<1x18x16x128xf32>
    %1 = vector.shape_cast %0 : vector<1x18x16x128xf32> to vector<18x16x128xf32>
    %2 = arith.truncf %1 : vector<18x16x128xf32> to vector<18x16x128xbf16>
    %cst = arith.constant 0.000000e+00 : f32
    %3 = vector.broadcast %cst : f32 to vector<256x128xf32>
    %4 = vector.extract_strided_slice %2 {offsets = [0, 1, 0], sizes = [18, 1, 128], strides = [1, 1, 1]} : vector<18x16x128xbf16> to vector<18x1x128xbf16>
    %5 = vector.extract_strided_slice %2 {offsets = [0, 0, 0], sizes = [18, 15, 128], strides = [1, 1, 1]} : vector<18x16x128xbf16> to vector<18x15x128xbf16>
    %6 = tpu.concatenate %4, %5 in 1 : vector<18x1x128xbf16>, vector<18x15x128xbf16> -> vector<18x16x128xbf16>
    %7 = vector.extract_strided_slice %6 {offsets = [0, 0, 0], sizes = [16, 16, 128], strides = [1, 1, 1]} : vector<18x16x128xbf16> to vector<16x16x128xbf16>
    %8 = vector.shape_cast %7 : vector<16x16x128xbf16> to vector<256x128xbf16>
    %c0_3 = arith.constant 0 : index
    %c0_4 = arith.constant 0 : index
    %9 = vector.load %arg2[%c0_3, %c0_4] : memref<1152x128xbf16, #tpu.memory_space<vmem>>, vector<128x128xbf16>
    %cst_5 = arith.constant dense<0.000000e+00> : vector<256x128xf32>
    %10 = tpu.matmul %8, %9, %cst_5 {dimension_numbers = #tpu.dot_dimension_numbers<[1], [0], [0], [1], [0, 0, 1, 1], [], []>} : vector<256x128xbf16>, vector<128x128xbf16>, vector<256x128xf32> -> vector<256x128xf32>
    %11 = arith.addf %3, %10 : vector<256x128xf32>
    %12 = vector.extract_strided_slice %6 {offsets = [1, 0, 0], sizes = [16, 16, 128], strides = [1, 1, 1]} : vector<18x16x128xbf16> to vector<16x16x128xbf16>
    %13 = vector.shape_cast %12 : vector<16x16x128xbf16> to vector<256x128xbf16>
    %c128 = arith.constant 128 : index
    %c0_6 = arith.constant 0 : index
    %14 = vector.load %arg2[%c128, %c0_6] : memref<1152x128xbf16, #tpu.memory_space<vmem>>, vector<128x128xbf16>
    %cst_7 = arith.constant dense<0.000000e+00> : vector<256x128xf32>
    %15 = tpu.matmul %13, %14, %cst_7 {dimension_numbers = #tpu.dot_dimension_numbers<[1], [0], [0], [1], [0, 0, 1, 1], [], []>} : vector<256x128xbf16>, vector<128x128xbf16>, vector<256x128xf32> -> vector<256x128xf32>
    %16 = arith.addf %11, %15 : vector<256x128xf32>
    %17 = vector.extract_strided_slice %6 {offsets = [2, 0, 0], sizes = [16, 16, 128], strides = [1, 1, 1]} : vector<18x16x128xbf16> to vector<16x16x128xbf16>
    %18 = vector.shape_cast %17 : vector<16x16x128xbf16> to vector<256x128xbf16>
    %c256 = arith.constant 256 : index
    %c0_8 = arith.constant 0 : index
    %19 = vector.load %arg2[%c256, %c0_8] : memref<1152x128xbf16, #tpu.memory_space<vmem>>, vector<128x128xbf16>
    %cst_9 = arith.constant dense<0.000000e+00> : vector<256x128xf32>
    %20 = tpu.matmul %18, %19, %cst_9 {dimension_numbers = #tpu.dot_dimension_numbers<[1], [0], [0], [1], [0, 0, 1, 1], [], []>} : vector<256x128xbf16>, vector<128x128xbf16>, vector<256x128xf32> -> vector<256x128xf32>
    %21 = arith.addf %16, %20 : vector<256x128xf32>
    %22 = vector.extract_strided_slice %2 {offsets = [0, 0, 0], sizes = [16, 16, 128], strides = [1, 1, 1]} : vector<18x16x128xbf16> to vector<16x16x128xbf16>
    %23 = vector.shape_cast %22 : vector<16x16x128xbf16> to vector<256x128xbf16>
    %c384 = arith.constant 384 : index
    %c0_10 = arith.constant 0 : index
    %24 = vector.load %arg2[%c384, %c0_10] : memref<1152x128xbf16, #tpu.memory_space<vmem>>, vector<128x128xbf16>
    %cst_11 = arith.constant dense<0.000000e+00> : vector<256x128xf32>
    %25 = tpu.matmul %23, %24, %cst_11 {dimension_numbers = #tpu.dot_dimension_numbers<[1], [0], [0], [1], [0, 0, 1, 1], [], []>} : vector<256x128xbf16>, vector<128x128xbf16>, vector<256x128xf32> -> vector<256x128xf32>
    %26 = arith.addf %21, %25 : vector<256x128xf32>
    %27 = vector.extract_strided_slice %2 {offsets = [1, 0, 0], sizes = [16, 16, 128], strides = [1, 1, 1]} : vector<18x16x128xbf16> to vector<16x16x128xbf16>
    %28 = vector.shape_cast %27 : vector<16x16x128xbf16> to vector<256x128xbf16>
    %c512 = arith.constant 512 : index
    %c0_12 = arith.constant 0 : index
    %29 = vector.load %arg2[%c512, %c0_12] : memref<1152x128xbf16, #tpu.memory_space<vmem>>, vector<128x128xbf16>
    %cst_13 = arith.constant dense<0.000000e+00> : vector<256x128xf32>
    %30 = tpu.matmul %28, %29, %cst_13 {dimension_numbers = #tpu.dot_dimension_numbers<[1], [0], [0], [1], [0, 0, 1, 1], [], []>} : vector<256x128xbf16>, vector<128x128xbf16>, vector<256x128xf32> -> vector<256x128xf32>
    %31 = arith.addf %26, %30 : vector<256x128xf32>
    %32 = vector.extract_strided_slice %2 {offsets = [2, 0, 0], sizes = [16, 16, 128], strides = [1, 1, 1]} : vector<18x16x128xbf16> to vector<16x16x128xbf16>
    %33 = vector.shape_cast %32 : vector<16x16x128xbf16> to vector<256x128xbf16>
    %c640 = arith.constant 640 : index
    %c0_14 = arith.constant 0 : index
    %34 = vector.load %arg2[%c640, %c0_14] : memref<1152x128xbf16, #tpu.memory_space<vmem>>, vector<128x128xbf16>
    %cst_15 = arith.constant dense<0.000000e+00> : vector<256x128xf32>
    %35 = tpu.matmul %33, %34, %cst_15 {dimension_numbers = #tpu.dot_dimension_numbers<[1], [0], [0], [1], [0, 0, 1, 1], [], []>} : vector<256x128xbf16>, vector<128x128xbf16>, vector<256x128xf32> -> vector<256x128xf32>
    %36 = arith.addf %31, %35 : vector<256x128xf32>
    %37 = vector.extract_strided_slice %2 {offsets = [0, 1, 0], sizes = [18, 15, 128], strides = [1, 1, 1]} : vector<18x16x128xbf16> to vector<18x15x128xbf16>
    %38 = vector.extract_strided_slice %2 {offsets = [0, 14, 0], sizes = [18, 1, 128], strides = [1, 1, 1]} : vector<18x16x128xbf16> to vector<18x1x128xbf16>
    %39 = tpu.concatenate %37, %38 in 1 : vector<18x15x128xbf16>, vector<18x1x128xbf16> -> vector<18x16x128xbf16>
    %40 = vector.extract_strided_slice %39 {offsets = [0, 0, 0], sizes = [16, 16, 128], strides = [1, 1, 1]} : vector<18x16x128xbf16> to vector<16x16x128xbf16>
    %41 = vector.shape_cast %40 : vector<16x16x128xbf16> to vector<256x128xbf16>
    %c768 = arith.constant 768 : index
    %c0_16 = arith.constant 0 : index
    %42 = vector.load %arg2[%c768, %c0_16] : memref<1152x128xbf16, #tpu.memory_space<vmem>>, vector<128x128xbf16>
    %cst_17 = arith.constant dense<0.000000e+00> : vector<256x128xf32>
    %43 = tpu.matmul %41, %42, %cst_17 {dimension_numbers = #tpu.dot_dimension_numbers<[1], [0], [0], [1], [0, 0, 1, 1], [], []>} : vector<256x128xbf16>, vector<128x128xbf16>, vector<256x128xf32> -> vector<256x128xf32>
    %44 = arith.addf %36, %43 : vector<256x128xf32>
    %45 = vector.extract_strided_slice %39 {offsets = [1, 0, 0], sizes = [16, 16, 128], strides = [1, 1, 1]} : vector<18x16x128xbf16> to vector<16x16x128xbf16>
    %46 = vector.shape_cast %45 : vector<16x16x128xbf16> to vector<256x128xbf16>
    %c896 = arith.constant 896 : index
    %c0_18 = arith.constant 0 : index
    %47 = vector.load %arg2[%c896, %c0_18] : memref<1152x128xbf16, #tpu.memory_space<vmem>>, vector<128x128xbf16>
    %cst_19 = arith.constant dense<0.000000e+00> : vector<256x128xf32>
    %48 = tpu.matmul %46, %47, %cst_19 {dimension_numbers = #tpu.dot_dimension_numbers<[1], [0], [0], [1], [0, 0, 1, 1], [], []>} : vector<256x128xbf16>, vector<128x128xbf16>, vector<256x128xf32> -> vector<256x128xf32>
    %49 = arith.addf %44, %48 : vector<256x128xf32>
    %50 = vector.extract_strided_slice %39 {offsets = [2, 0, 0], sizes = [16, 16, 128], strides = [1, 1, 1]} : vector<18x16x128xbf16> to vector<16x16x128xbf16>
    %51 = vector.shape_cast %50 : vector<16x16x128xbf16> to vector<256x128xbf16>
    %c1024 = arith.constant 1024 : index
    %c0_20 = arith.constant 0 : index
    %52 = vector.load %arg2[%c1024, %c0_20] : memref<1152x128xbf16, #tpu.memory_space<vmem>>, vector<128x128xbf16>
    %cst_21 = arith.constant dense<0.000000e+00> : vector<256x128xf32>
    %53 = tpu.matmul %51, %52, %cst_21 {dimension_numbers = #tpu.dot_dimension_numbers<[1], [0], [0], [1], [0, 0, 1, 1], [], []>} : vector<256x128xbf16>, vector<128x128xbf16>, vector<256x128xf32> -> vector<256x128xf32>
    %54 = arith.addf %49, %53 : vector<256x128xf32>
    %cst_22 = arith.constant dense<0.000000e+00> : vector<128xf32>
    %55 = vector.multi_reduction <add>, %54, %cst_22 [0] : vector<256x128xf32> to vector<128xf32>
    %56 = vector.shape_cast %55 : vector<128xf32> to vector<1x128xf32>
    %57 = arith.mulf %54, %54 : vector<256x128xf32>
    %cst_23 = arith.constant dense<0.000000e+00> : vector<128xf32>
    %58 = vector.multi_reduction <add>, %57, %cst_23 [0] : vector<256x128xf32> to vector<128xf32>
    %59 = vector.shape_cast %58 : vector<128xf32> to vector<1x128xf32>
    %cst_24 = arith.constant 3.906250e-03 : f32
    %60 = vector.broadcast %cst_24 : f32 to vector<1x128xf32>
    %61 = arith.mulf %56, %60 : vector<1x128xf32>
    %cst_25 = arith.constant 3.906250e-03 : f32
    %62 = vector.broadcast %cst_25 : f32 to vector<1x128xf32>
    %63 = arith.mulf %59, %62 : vector<1x128xf32>
    %64 = arith.mulf %61, %61 : vector<1x128xf32>
    %65 = arith.subf %63, %64 : vector<1x128xf32>
    %cst_26 = arith.constant 0.000000e+00 : f32
    %66 = vector.broadcast %cst_26 : f32 to vector<1x128xf32>
    %67 = arith.maximumf %65, %66 : vector<1x128xf32>
    %cst_27 = arith.constant 9.99999974E-6 : f32
    %68 = vector.broadcast %cst_27 : f32 to vector<1x128xf32>
    %69 = arith.addf %67, %68 : vector<1x128xf32>
    %70 = math.rsqrt %69 : vector<1x128xf32>
    %71 = vector.broadcast %61 : vector<1x128xf32> to vector<256x128xf32>
    %72 = arith.subf %54, %71 : vector<256x128xf32>
    %73 = vector.broadcast %70 : vector<1x128xf32> to vector<256x128xf32>
    %74 = arith.mulf %72, %73 : vector<256x128xf32>
    %cst_28 = arith.constant 0.000000e+00 : f32
    %75 = vector.broadcast %cst_28 : f32 to vector<256x128xf32>
    %76 = arith.maximumf %74, %75 : vector<256x128xf32>
    %77 = arith.truncf %76 : vector<256x128xf32> to vector<256x128xbf16>
    %78 = vector.shape_cast %77 : vector<256x128xbf16> to vector<16x16x128xbf16>
    %c1 = arith.constant 1 : index
    %c0_29 = arith.constant 0 : index
    %c0_30 = arith.constant 0 : index
    %79 = vector.load %arg5[%c1, %c0_29, %c0_30] : memref<18x16x128xbf16, #tpu.memory_space<vmem>>, vector<16x16x128xbf16>
    tpu.vector_store %arg5[%c1, %c0_29, %c0_30], %78 {strides = array<i32>} : memref<18x16x128xbf16, #tpu.memory_space<vmem>>, vector<16x16x128xbf16>,
    %80 = vector.extract_strided_slice %78 {offsets = [1, 0, 0], sizes = [1, 16, 128], strides = [1, 1, 1]} : vector<16x16x128xbf16> to vector<1x16x128xbf16>
    %c0_31 = arith.constant 0 : index
    %c0_32 = arith.constant 0 : index
    %c0_33 = arith.constant 0 : index
    %81 = vector.load %arg5[%c0_31, %c0_32, %c0_33] : memref<18x16x128xbf16, #tpu.memory_space<vmem>>, vector<1x16x128xbf16>
    tpu.vector_store %arg5[%c0_31, %c0_32, %c0_33], %80 {strides = array<i32>} : memref<18x16x128xbf16, #tpu.memory_space<vmem>>, vector<1x16x128xbf16>,
    %82 = vector.extract_strided_slice %78 {offsets = [14, 0, 0], sizes = [1, 16, 128], strides = [1, 1, 1]} : vector<16x16x128xbf16> to vector<1x16x128xbf16>
    %c17 = arith.constant 17 : index
    %c0_34 = arith.constant 0 : index
    %c0_35 = arith.constant 0 : index
    %83 = vector.load %arg5[%c17, %c0_34, %c0_35] : memref<18x16x128xbf16, #tpu.memory_space<vmem>>, vector<1x16x128xbf16>
    tpu.vector_store %arg5[%c17, %c0_34, %c0_35], %82 {strides = array<i32>} : memref<18x16x128xbf16, #tpu.memory_space<vmem>>, vector<1x16x128xbf16>,
    %c0_36 = arith.constant 0 : index
    %c0_37 = arith.constant 0 : index
    %c0_38 = arith.constant 0 : index
    %84 = vector.load %arg5[%c0_36, %c0_37, %c0_38] : memref<18x16x128xbf16, #tpu.memory_space<vmem>>, vector<18x16x128xbf16>
    %cst_39 = arith.constant 0.000000e+00 : f32
    %85 = vector.broadcast %cst_39 : f32 to vector<256x128xf32>
    %86 = vector.extract_strided_slice %84 {offsets = [0, 1, 0], sizes = [18, 1, 128], strides = [1, 1, 1]} : vector<18x16x128xbf16> to vector<18x1x128xbf16>
    %87 = vector.extract_strided_slice %84 {offsets = [0, 0, 0], sizes = [18, 15, 128], strides = [1, 1, 1]} : vector<18x16x128xbf16> to vector<18x15x128xbf16>
    %88 = tpu.concatenate %86, %87 in 1 : vector<18x1x128xbf16>, vector<18x15x128xbf16> -> vector<18x16x128xbf16>
    %89 = vector.extract_strided_slice %88 {offsets = [0, 0, 0], sizes = [16, 16, 128], strides = [1, 1, 1]} : vector<18x16x128xbf16> to vector<16x16x128xbf16>
    %90 = vector.shape_cast %89 : vector<16x16x128xbf16> to vector<256x128xbf16>
    %c0_40 = arith.constant 0 : index
    %c0_41 = arith.constant 0 : index
    %91 = vector.load %arg3[%c0_40, %c0_41] : memref<1152x128xbf16, #tpu.memory_space<vmem>>, vector<128x128xbf16>
    %cst_42 = arith.constant dense<0.000000e+00> : vector<256x128xf32>
    %92 = tpu.matmul %90, %91, %cst_42 {dimension_numbers = #tpu.dot_dimension_numbers<[1], [0], [0], [1], [0, 0, 1, 1], [], []>} : vector<256x128xbf16>, vector<128x128xbf16>, vector<256x128xf32> -> vector<256x128xf32>
    %93 = arith.addf %85, %92 : vector<256x128xf32>
    %94 = vector.extract_strided_slice %88 {offsets = [1, 0, 0], sizes = [16, 16, 128], strides = [1, 1, 1]} : vector<18x16x128xbf16> to vector<16x16x128xbf16>
    %95 = vector.shape_cast %94 : vector<16x16x128xbf16> to vector<256x128xbf16>
    %c128_43 = arith.constant 128 : index
    %c0_44 = arith.constant 0 : index
    %96 = vector.load %arg3[%c128_43, %c0_44] : memref<1152x128xbf16, #tpu.memory_space<vmem>>, vector<128x128xbf16>
    %cst_45 = arith.constant dense<0.000000e+00> : vector<256x128xf32>
    %97 = tpu.matmul %95, %96, %cst_45 {dimension_numbers = #tpu.dot_dimension_numbers<[1], [0], [0], [1], [0, 0, 1, 1], [], []>} : vector<256x128xbf16>, vector<128x128xbf16>, vector<256x128xf32> -> vector<256x128xf32>
    %98 = arith.addf %93, %97 : vector<256x128xf32>
    %99 = vector.extract_strided_slice %88 {offsets = [2, 0, 0], sizes = [16, 16, 128], strides = [1, 1, 1]} : vector<18x16x128xbf16> to vector<16x16x128xbf16>
    %100 = vector.shape_cast %99 : vector<16x16x128xbf16> to vector<256x128xbf16>
    %c256_46 = arith.constant 256 : index
    %c0_47 = arith.constant 0 : index
    %101 = vector.load %arg3[%c256_46, %c0_47] : memref<1152x128xbf16, #tpu.memory_space<vmem>>, vector<128x128xbf16>
    %cst_48 = arith.constant dense<0.000000e+00> : vector<256x128xf32>
    %102 = tpu.matmul %100, %101, %cst_48 {dimension_numbers = #tpu.dot_dimension_numbers<[1], [0], [0], [1], [0, 0, 1, 1], [], []>} : vector<256x128xbf16>, vector<128x128xbf16>, vector<256x128xf32> -> vector<256x128xf32>
    %103 = arith.addf %98, %102 : vector<256x128xf32>
    %104 = vector.extract_strided_slice %84 {offsets = [0, 0, 0], sizes = [16, 16, 128], strides = [1, 1, 1]} : vector<18x16x128xbf16> to vector<16x16x128xbf16>
    %105 = vector.shape_cast %104 : vector<16x16x128xbf16> to vector<256x128xbf16>
    %c384_49 = arith.constant 384 : index
    %c0_50 = arith.constant 0 : index
    %106 = vector.load %arg3[%c384_49, %c0_50] : memref<1152x128xbf16, #tpu.memory_space<vmem>>, vector<128x128xbf16>
    %cst_51 = arith.constant dense<0.000000e+00> : vector<256x128xf32>
    %107 = tpu.matmul %105, %106, %cst_51 {dimension_numbers = #tpu.dot_dimension_numbers<[1], [0], [0], [1], [0, 0, 1, 1], [], []>} : vector<256x128xbf16>, vector<128x128xbf16>, vector<256x128xf32> -> vector<256x128xf32>
    %108 = arith.addf %103, %107 : vector<256x128xf32>
    %109 = vector.extract_strided_slice %84 {offsets = [1, 0, 0], sizes = [16, 16, 128], strides = [1, 1, 1]} : vector<18x16x128xbf16> to vector<16x16x128xbf16>
    %110 = vector.shape_cast %109 : vector<16x16x128xbf16> to vector<256x128xbf16>
    %c512_52 = arith.constant 512 : index
    %c0_53 = arith.constant 0 : index
    %111 = vector.load %arg3[%c512_52, %c0_53] : memref<1152x128xbf16, #tpu.memory_space<vmem>>, vector<128x128xbf16>
    %cst_54 = arith.constant dense<0.000000e+00> : vector<256x128xf32>
    %112 = tpu.matmul %110, %111, %cst_54 {dimension_numbers = #tpu.dot_dimension_numbers<[1], [0], [0], [1], [0, 0, 1, 1], [], []>} : vector<256x128xbf16>, vector<128x128xbf16>, vector<256x128xf32> -> vector<256x128xf32>
    %113 = arith.addf %108, %112 : vector<256x128xf32>
    %114 = vector.extract_strided_slice %84 {offsets = [2, 0, 0], sizes = [16, 16, 128], strides = [1, 1, 1]} : vector<18x16x128xbf16> to vector<16x16x128xbf16>
    %115 = vector.shape_cast %114 : vector<16x16x128xbf16> to vector<256x128xbf16>
    %c640_55 = arith.constant 640 : index
    %c0_56 = arith.constant 0 : index
    %116 = vector.load %arg3[%c640_55, %c0_56] : memref<1152x128xbf16, #tpu.memory_space<vmem>>, vector<128x128xbf16>
    %cst_57 = arith.constant dense<0.000000e+00> : vector<256x128xf32>
    %117 = tpu.matmul %115, %116, %cst_57 {dimension_numbers = #tpu.dot_dimension_numbers<[1], [0], [0], [1], [0, 0, 1, 1], [], []>} : vector<256x128xbf16>, vector<128x128xbf16>, vector<256x128xf32> -> vector<256x128xf32>
    %118 = arith.addf %113, %117 : vector<256x128xf32>
    %119 = vector.extract_strided_slice %84 {offsets = [0, 1, 0], sizes = [18, 15, 128], strides = [1, 1, 1]} : vector<18x16x128xbf16> to vector<18x15x128xbf16>
    %120 = vector.extract_strided_slice %84 {offsets = [0, 14, 0], sizes = [18, 1, 128], strides = [1, 1, 1]} : vector<18x16x128xbf16> to vector<18x1x128xbf16>
    %121 = tpu.concatenate %119, %120 in 1 : vector<18x15x128xbf16>, vector<18x1x128xbf16> -> vector<18x16x128xbf16>
    %122 = vector.extract_strided_slice %121 {offsets = [0, 0, 0], sizes = [16, 16, 128], strides = [1, 1, 1]} : vector<18x16x128xbf16> to vector<16x16x128xbf16>
    %123 = vector.shape_cast %122 : vector<16x16x128xbf16> to vector<256x128xbf16>
    %c768_58 = arith.constant 768 : index
    %c0_59 = arith.constant 0 : index
    %124 = vector.load %arg3[%c768_58, %c0_59] : memref<1152x128xbf16, #tpu.memory_space<vmem>>, vector<128x128xbf16>
    %cst_60 = arith.constant dense<0.000000e+00> : vector<256x128xf32>
    %125 = tpu.matmul %123, %124, %cst_60 {dimension_numbers = #tpu.dot_dimension_numbers<[1], [0], [0], [1], [0, 0, 1, 1], [], []>} : vector<256x128xbf16>, vector<128x128xbf16>, vector<256x128xf32> -> vector<256x128xf32>
    %126 = arith.addf %118, %125 : vector<256x128xf32>
    %127 = vector.extract_strided_slice %121 {offsets = [1, 0, 0], sizes = [16, 16, 128], strides = [1, 1, 1]} : vector<18x16x128xbf16> to vector<16x16x128xbf16>
    %128 = vector.shape_cast %127 : vector<16x16x128xbf16> to vector<256x128xbf16>
    %c896_61 = arith.constant 896 : index
    %c0_62 = arith.constant 0 : index
    %129 = vector.load %arg3[%c896_61, %c0_62] : memref<1152x128xbf16, #tpu.memory_space<vmem>>, vector<128x128xbf16>
    %cst_63 = arith.constant dense<0.000000e+00> : vector<256x128xf32>
    %130 = tpu.matmul %128, %129, %cst_63 {dimension_numbers = #tpu.dot_dimension_numbers<[1], [0], [0], [1], [0, 0, 1, 1], [], []>} : vector<256x128xbf16>, vector<128x128xbf16>, vector<256x128xf32> -> vector<256x128xf32>
    %131 = arith.addf %126, %130 : vector<256x128xf32>
    %132 = vector.extract_strided_slice %121 {offsets = [2, 0, 0], sizes = [16, 16, 128], strides = [1, 1, 1]} : vector<18x16x128xbf16> to vector<16x16x128xbf16>
    %133 = vector.shape_cast %132 : vector<16x16x128xbf16> to vector<256x128xbf16>
    %c1024_64 = arith.constant 1024 : index
    %c0_65 = arith.constant 0 : index
    %134 = vector.load %arg3[%c1024_64, %c0_65] : memref<1152x128xbf16, #tpu.memory_space<vmem>>, vector<128x128xbf16>
    %cst_66 = arith.constant dense<0.000000e+00> : vector<256x128xf32>
    %135 = tpu.matmul %133, %134, %cst_66 {dimension_numbers = #tpu.dot_dimension_numbers<[1], [0], [0], [1], [0, 0, 1, 1], [], []>} : vector<256x128xbf16>, vector<128x128xbf16>, vector<256x128xf32> -> vector<256x128xf32>
    %136 = arith.addf %131, %135 : vector<256x128xf32>
    %cst_67 = arith.constant dense<0.000000e+00> : vector<128xf32>
    %137 = vector.multi_reduction <add>, %136, %cst_67 [0] : vector<256x128xf32> to vector<128xf32>
    %138 = vector.shape_cast %137 : vector<128xf32> to vector<1x128xf32>
    %139 = arith.mulf %136, %136 : vector<256x128xf32>
    %cst_68 = arith.constant dense<0.000000e+00> : vector<128xf32>
    %140 = vector.multi_reduction <add>, %139, %cst_68 [0] : vector<256x128xf32> to vector<128xf32>
    %141 = vector.shape_cast %140 : vector<128xf32> to vector<1x128xf32>
    %cst_69 = arith.constant 3.906250e-03 : f32
    %142 = vector.broadcast %cst_69 : f32 to vector<1x128xf32>
    %143 = arith.mulf %138, %142 : vector<1x128xf32>
    %cst_70 = arith.constant 3.906250e-03 : f32
    %144 = vector.broadcast %cst_70 : f32 to vector<1x128xf32>
    %145 = arith.mulf %141, %144 : vector<1x128xf32>
    %146 = arith.mulf %143, %143 : vector<1x128xf32>
    %147 = arith.subf %145, %146 : vector<1x128xf32>
    %cst_71 = arith.constant 0.000000e+00 : f32
    %148 = vector.broadcast %cst_71 : f32 to vector<1x128xf32>
    %149 = arith.maximumf %147, %148 : vector<1x128xf32>
    %cst_72 = arith.constant 9.99999974E-6 : f32
    %150 = vector.broadcast %cst_72 : f32 to vector<1x128xf32>
    %151 = arith.addf %149, %150 : vector<1x128xf32>
    %152 = math.rsqrt %151 : vector<1x128xf32>
    %153 = vector.extract_strided_slice %1 {offsets = [1, 0, 0], sizes = [16, 16, 128], strides = [1, 1, 1]} : vector<18x16x128xf32> to vector<16x16x128xf32>
    %154 = vector.shape_cast %153 : vector<16x16x128xf32> to vector<256x128xf32>
    %155 = vector.broadcast %143 : vector<1x128xf32> to vector<256x128xf32>
    %156 = arith.subf %136, %155 : vector<256x128xf32>
    %157 = vector.broadcast %152 : vector<1x128xf32> to vector<256x128xf32>
    %158 = arith.mulf %156, %157 : vector<256x128xf32>
    %159 = arith.addf %154, %158 : vector<256x128xf32>
    %160 = vector.shape_cast %159 : vector<256x128xf32> to vector<16x16x128xf32>
    %161 = vector.extract_strided_slice %160 {offsets = [0, 0, 0], sizes = [16, 16, 4], strides = [1, 1, 1]} : vector<16x16x128xf32> to vector<16x16x4xf32>
    %c0_73 = arith.constant 0 : index
    %c0_74 = arith.constant 0 : index
    %c0_75 = arith.constant 0 : index
    %c0_76 = arith.constant 0 : index
    %162 = vector.load %arg4[%c0_73, %c0_74, %c0_75, %c0_76] : memref<1x16x16x4xf32, #tpu.memory_space<vmem>>, vector<1x16x16x4xf32>
    %163 = vector.shape_cast %162 : vector<1x16x16x4xf32> to vector<16x16x4xf32>
    %164 = vector.shape_cast %161 : vector<16x16x4xf32> to vector<1x16x16x4xf32>
    tpu.vector_store %arg4[%c0_73, %c0_74, %c0_75, %c0_76], %164 {strides = array<i32>} : memref<1x16x16x4xf32, #tpu.memory_space<vmem>>, vector<1x16x16x4xf32>,
    return
  }
  func.func @transform_0(%arg0: i32) -> (i32, i32, i32, i32) {
    %c0_i32 = arith.constant 0 : i32
    %c0_i32_0 = arith.constant 0 : i32
    %c0_i32_1 = arith.constant 0 : i32
    %c0_i32_2 = arith.constant 0 : i32
    return %arg0, %c0_i32, %c0_i32_0, %c0_i32_1 : i32, i32, i32, i32
  }
  func.func @transform_1(%arg0: i32) -> (i32, i32) {
    %c0_i32 = arith.constant 0 : i32
    %c0_i32_0 = arith.constant 0 : i32
    %c0_i32_1 = arith.constant 0 : i32
    return %c0_i32, %c0_i32_0 : i32, i32
  }
  func.func @transform_2(%arg0: i32) -> (i32, i32) {
    %c0_i32 = arith.constant 0 : i32
    %c0_i32_0 = arith.constant 0 : i32
    %c0_i32_1 = arith.constant 0 : i32
    return %c0_i32, %c0_i32_0 : i32, i32
  }
  func.func @transform_3(%arg0: i32) -> (i32, i32, i32, i32) {
    %c0_i32 = arith.constant 0 : i32
    %c0_i32_0 = arith.constant 0 : i32
    %c0_i32_1 = arith.constant 0 : i32
    %c0_i32_2 = arith.constant 0 : i32
    return %arg0, %c0_i32, %c0_i32_0, %c0_i32_1 : i32, i32, i32, i32
  }
}

</mosaic_0001>

<bundles_post_ra>
// kernel: tpu_custom_call.1
= control target key start
LH: loop header
LB: loop body
LE: loop exit
PB: predicated region body
PF: predicated region fallthrough
CT: control target
= control target key end

     0   :  { %8 = vsyncpa [#allocation4], 0  ;;  %s10099_s0 = inlined_call_operand.hbm [shape: f32[2,18,16,128], index: 0, kind: input, shape index: {}]   ;;  %s10100_s1 = inlined_call_operand.hbm [shape: bf16[1152,128], index: 1, kind: input, shape index: {}]   ;;  %s10101_s2 = inlined_call_operand.hbm [shape: bf16[1152,128], index: 2, kind: input, shape index: {}]   ;;  %s10102_s3 = inlined_call_operand.vmem [shape: f32[2,16,16,4], index: 3, kind: output, shape index: {}]  }
   0x1   :  { %10 = vsyncpa [#allocation4 + $0x1], 0 }
   0x2   :  { %11 = vsyncpa [#allocation6], 0  ;;  %s8276_s12 = smov 0   ;;  %s8278_s13 = smov 0  }
   0x3   :  { %s8280_s14 = smov 0   ;;  %s8282_s15 = smov 0  }
   0x4 LB: > { %s8295_s16 = sadd.s32 4294967295, %s8247_s15   ;;  %p37_p0 = scmp.ne.s32.totalorder %s8239_s13, %s8235_s12  ;;  %s8247_s15 = sphi %s8282_s15, %s10176_s15   ;;  %s8243_s14 = sphi %s8280_s14, %s10175_s14   ;;  %s8239_s13 = sphi %s8278_s13, %s10174_s13   ;;  %s8235_s12 = sphi %s8276_s12, %s10173_s12  }
   0x5   : > { %p10103_p1 = scmp.eq.s32.totalorder %s8295_s16, 0  ;;  %p5911_p2 = scmp.ge.s32.totalorder %s8247_s15, 1 }
   0x6   : > { %p116_p3 = scmp.lt.s32.totalorder %s8247_s15, 3  ;;  %s8249_s19 = smov [#allocation5]  }
   0x7   : > { %p8303_p4 = por %p10103_p1, %p37_p0  ;;  %s128_s20 = sshll.u32 %s8249_s19, 4  ;;  %s129_s20 = int_to_ptr.vmem [resolvable:$true] %s128_s20 }
   0x8   : > { %p8307_p5 = pnand %p5911_p2, %p116_p3  ;;  %s8250_s22 = smov [#allocation7]  }
   0x9   : > { %s10129_s17 = scalar_select %p8303_p4, 1, 0 }
   0xa   : > { %s10130_s18 = scalar_select %p8307_p5, 1, 0 }
   0xb   : > { %p7889_p6 = pneg %p8307_p5  ;;  %s141_s23 = sshll.u32 %s8250_s22, 4  ;;  %s8319_s23 = int_to_ptr.vmem [resolvable:$true] %s141_s23 }
   0xc   : > { %s8123_s26 = scalar_lea.hbm %s10100_s1, 9216 }
   0xd   : > { %p8315_p7 = pnand %p7889_p6, %p10103_p1  ;;  %p8124_p8 = scmp.ne.s32.totalorder %s10100_s1, %s8123_s26 }
   0xe   : > { %p8130_p12 = scmp.lt.u32.totalorder %s8123_s26, %s10100_s1 }
   0xf   : > { %p8125_p9 = pneg %p8315_p7 }
  0x11   : > { %p8126_p10 = pnand %p8125_p9, %p8124_p8 }
  0x13   : > { %p8127_p11 = pneg %p8126_p10 }
  0x15   : > { %p8132_p13 = pnand %p8130_p12, %p8127_p11 }
  0x17   : > { %8135 = shalt.err (!%p8132_p13)
}
  0x18   : > { %s8136_s4 = scalar_lea.vmem %s129_s20, 9216  ;;  %p8144_p6 = scmp.lt.s32.totalorder %s129_s20, %s129_s20 }
  0x19   : > { %p8137_p0 = scmp.ne.s32.totalorder %s129_s20, %s8136_s4  ;;  %p8145_p1 = scmp.lt.s32.totalorder %s8136_s4, %s8136_s4 }
  0x1b   : > { %p8139_p2 = pnand %p8137_p0, %p8125_p9  ;;  %p8146_p4 = por %p8145_p1, %p8144_p6 }
  0x1d   : > { %p8140_p3 = pneg %p8139_p2 }
  0x1f   : > { %p8147_p5 = pnand %p8146_p4, %p8140_p3 }
  0x21   : > { %8150 = shalt.err (!%p8147_p5)
}
  0x22   : > { %s8251_s5 = smov 64   ;;  %s8252_s6 = smov 4  }
  0x23   : > { %7892 = dma.hbm_to_vmem [thread:$0]  (!%p8315_p7), %s10100_s1, 9216, %s129_s20, [#allocation6], %s8251_s5, %s8251_s5, %s8252_s6  }
  0x24   : > { %s8151_s11 = scalar_lea.hbm %s10101_s2, 9216 }
  0x25   : > { %p8152_p8 = scmp.ne.s32.totalorder %s10101_s2, %s8151_s11  ;;  %p8158_p5 = scmp.lt.u32.totalorder %s8151_s11, %s10101_s2 }
  0x27   : > { %p8154_p1 = pnand %p8152_p8, %p8125_p9 }
  0x29   : > { %p8155_p4 = pneg %p8154_p1 }
  0x2b   : > { %p8160_p10 = pnand %p8158_p5, %p8155_p4 }
  0x2d   : > { %8163 = shalt.err (!%p8160_p10)
}
  0x2e   : > { %s8164_s20 = scalar_lea.vmem %s8319_s23, 9216  ;;  %p8172_p0 = scmp.lt.s32.totalorder %s8319_s23, %s8319_s23 }
  0x2f   : > { %p8165_p11 = scmp.ne.s32.totalorder %s8319_s23, %s8164_s20  ;;  %p8173_p2 = scmp.lt.s32.totalorder %s8164_s20, %s8164_s20 }
  0x31   : > { %p8167_p12 = pnand %p8165_p11, %p8125_p9  ;;  %p8174_p3 = por %p8173_p2, %p8172_p0 }
  0x33   : > { %p8168_p13 = pneg %p8167_p12 }
  0x35   : > { %p8175_p6 = pnand %p8174_p3, %p8168_p13 }
  0x37   : > { %8178 = shalt.err (!%p8175_p6)
}
  0x38   : > { %7895 = dma.hbm_to_vmem [thread:$0]  (!%p8315_p7), %s10101_s2, 9216, %s8319_s23, [#allocation6], %s8251_s5, %s8251_s5, %s8252_s6  }
  0x39   : > { %s8369_s27 = sadd.s32 1, %s8247_s15   ;;  %s24_s28 = sadd.s32 1, %s8243_s14 }
  0x3a   : > { %s21_s21 = ssub.s32 %s8247_s15, %s8369_s27  ;;  %p31_p9 = scmp.ne.s32.totalorder %s8243_s14, %s8239_s13 }
  0x3b   : > { %p22_p8 = scmp.eq.s32.totalorder %s21_s21, 0  ;;  %p32_p1 = scmp.eq.s32.totalorder %s8247_s15, 0 }
  0x3c   : > { %p7902_p4 = scmp.lt.s32.totalorder %s8247_s15, 2  ;;  %s155_s29 = sand.u32 1, %s8243_s14  }
  0x3d   : > { %s8380_s30 = scalar_select %p22_p8, %s8243_s14, %s24_s28  }
  0x3e   : > { %p33_p5 = por %p32_p1, %p31_p9  ;;  %s7876_s4 = smul.u32 288, %s155_s29 }
  0x3f   : > { %s7877_s7 = smul.u32 4608, %s8247_s15  ;;  %s8394_s15 = scalar_lea.sflag [#allocation4], %s155_s29 }
  0x40   : > { %p8383_p10 = pnand %p7902_p4, %p33_p5  ;;  %s159_s9 = scalar_lea.vmem [#allocation3], %s7876_s4 }
  0x41   : > { %s8390_s6 = scalar_lea.hbm %s10099_s0, %s7877_s7  ;;  %s166_s10 = sshll.u32 %s159_s9, 4  ;;  %s8392_s10 = int_to_ptr.vmem [resolvable:$true] %s166_s10 }
  0x42   : > { %s8179_s11 = scalar_lea.hbm %s8390_s6, 4608  ;;  %p8181_p11 = pneg %p8383_p10 }
  0x43   : > { %p8180_p7 = scmp.ne.s32.totalorder %s8390_s6, %s8179_s11  ;;  %s8184_s22 = scalar_lea.hbm %s10099_s0, 9216 }
  0x44   : > { %p8185_p0 = scmp.lt.u32.totalorder %s8390_s6, %s10099_s0  ;;  %p8186_p2 = scmp.lt.u32.totalorder %s8184_s22, %s8179_s11 }
  0x45   : > { %p8182_p12 = pnand %p8181_p11, %p8180_p7  ;;  %p8188_p6 = scmp.lt.u32.totalorder %s8179_s11, %s8390_s6 }
  0x46   : > { %p8187_p3 = por %p8186_p2, %p8185_p0 }
  0x47   : > { %p8183_p13 = pneg %p8182_p12 }
  0x48   : > { %p8189_p9 = por %p8188_p6, %p8187_p3 }
  0x4a   : > { %p8190_p8 = pnand %p8189_p9, %p8183_p13 }
  0x4c   : > { %8193 = shalt.err (!%p8190_p8)
}
  0x4d   : > { %s8194_s25 = scalar_lea.vmem %s8392_s10, 4608  ;;  %s8253_s26 = smov [#allocation3]  }
  0x4e   : > { %p8195_p1 = scmp.ne.s32.totalorder %s8392_s10, %s8194_s25  ;;  %s8199_s28 = sshll.u32 %s8253_s26, 4  ;;  %s8200_s28 = int_to_ptr.vmem [resolvable:$false] %s8199_s28 }
  0x4f   : > { %s8201_s21 = scalar_lea.vmem %s8200_s28, 9216  ;;  %p8202_p7 = scmp.lt.s32.totalorder %s8392_s10, %s8200_s28 }
  0x50   : > { %p8197_p4 = pnand %p8195_p1, %p8181_p11  ;;  %p8203_p12 = scmp.lt.s32.totalorder %s8201_s21, %s8194_s25 }
  0x52   : > { %p8198_p5 = pneg %p8197_p4  ;;  %p8204_p0 = por %p8203_p12, %p8202_p7 }
  0x54   : > { %p8205_p2 = pnand %p8204_p0, %p8198_p5 }
  0x56   : > { %8208 = shalt.err (!%p8205_p2)
}
  0x57   : > { %s8254_s29 = smov 128   ;;  %s8255_s4 = smov 8  }
  0x58   : > { %7899 = dma.hbm_to_vmem [thread:$0]  (!%p8383_p10), %s8390_s6, 4608, %s8392_s10, %s8394_s15, %s8254_s29, %s8254_s29, %s8255_s4  }
  0x59   : > { %p10133_p11 = scmp.ne.s32.totalorder %s10130_s18, 0 }
  0x5b   : > { %178 = sbr.rel (%p10133_p11) target bundleno = 1838 (0x72e), region = 32 }
  0x62   : > { %s180_s7 = sand.u32 1, %s8239_s13   ;;  %p10134_p13 = scmp.ne.s32.totalorder %s10129_s17, 0 }
  0x63   : > { %s7878_s23 = smul.u32 288, %s180_s7  ;;  %s181_s5 = scalar_lea.sflag [#allocation4], %s180_s7 }
  0x65   : > { %s8425_s9 = scalar_lea.vmem [#allocation3], %s7878_s23 }
  0x66   : > { %8226 = dma.done.wait (%p10134_p13), %s181_s5, 4608  }
  0x67   : > { %8228 = vsyncadd (%p10134_p13), %s181_s5, 4294962688  ;;  %p10135_p3 = scmp.eq.s32.totalorder %s8295_s16, 0 }
  0x69   : > { %8230 = dma.done.wait (%p10135_p3), [#allocation6], 18432   ;;  %p10136_p10 = pmov %p10135_p3 }
  0x6a   : > { %v7943_v0 = vld [vmem:[#allocation5 + $0x40] sm:$0xff]   ;;  %v7944_v1 = vld [vmem:[#allocation5 + $0x48] sm:$0xff]   ;;  %v7945_v2 = vld [vmem:[#allocation5 + $0x50] sm:$0xff]   ;;  %vm437_vm0 = vcmask 1040384   ;;  %vm438_vm1 = vsmask.f32 256 }
  0x6b   : > { %8232 = vsyncadd (%p10136_p10), [#allocation6], 4294948864  ;;  %6500 = vmatprep.subr.bf16.mxu0 %v7943_v0  ;;  %v7946_v3 = vld [vmem:[#allocation5 + $0x58] sm:$0xff]   ;;  %v223_v4 = vld [vmem:[%s8425_s9 + $0x10] sm:$0xff]  ;;  %vm2008_vm3 = vcmask 1047552   ;;  %p215_p6 = scmp.lt.s32.totalorder %s8295_s16, 1 }
  0x6c   : > { %6501 = vmatpush3.bf16.msra.mxu0 %v7943_v0  ;;  %v224_v5 = vld [vmem:[%s8425_s9 + $0x18] sm:$0xff]  ;;  %v7947_v7 = vld [vmem:[#allocation5 + $0x60] sm:$0xff]   ;;  %v226_v11 = vld [vmem:[%s8425_s9 + $0x28] sm:$0xff]  ;;  %vm2009_vm4 = vsmask.f32 7424  ;;  %vm5791_vm6 = vcmask 31744  }
  0x6d   : > { %6502 = vmatprep.subr.bf16.mxu0 %v7944_v1  ;;  %v8437_v6 = vpack.c.bf16 %v224_v5, %v223_v4  ;;  %v225_v10 = vld [vmem:[%s8425_s9 + $0x20] sm:$0xff]  ;;  %v227_v12 = vld [vmem:[%s8425_s9 + $0x30] sm:$0xff]  ;;  %v228_v13 = vld [vmem:[%s8425_s9 + $0x38] sm:$0xff]  ;;  %s10178_s16 = smov (!%p215_p6, %s8295_s16), 1 }
  0x6e   : > { %vm8450_vm2 = vmand %vm437_vm0, %vm438_vm1  ;;  %v8455_v17 = vpack.c.bf16 %v226_v11, %v225_v10  ;;  %v8457_v18 = vpack.c.bf16 %v228_v13, %v227_v12  ;;  %v7948_v19 = vld [vmem:[#allocation5 + $0x68] sm:$0xff]   ;;  %v229_v20 = vld [vmem:[%s8425_s9 + $0x40] sm:$0xff]  ;;  %s6067_s17 = sshll.u32 %s10178_s16, 8 }
  0x6f   : > { %v8440_v8 = vshrl.u32 %v8437_v6, 16  ;;  %v8443_v9 = vshll.u32 %v8437_v6, 16  ;;  %v230_v21 = vld [vmem:[%s8425_s9 + $0x48] sm:$0xff]  ;;  %v231_v23 = vld [vmem:[%s8425_s9 + $0x50] sm:$0xff]  ;;  %v232_v24 = vld [vmem:[%s8425_s9 + $0x58] sm:$0xff]  ;;  %s9968_s8 = scalar_lea.vmem %s10102_s3, %s6067_s17 }
  0x70   : > { %6503 = vmatpush3.bf16.msra.mxu0 %v7944_v1  ;;  %v233_v25 = vld [vmem:[%s8425_s9 + $0x60] sm:$0xff]  ;;  %v234_v26 = vld [vmem:[%s8425_s9 + $0x68] sm:$0xff]  ;;  %v8472_v27 = vshrl.u32 %v8455_v17, 16  ;;  %v8475_v28 = vshrl.u32 %v8457_v18, 16  ;;  %v8477_v29 = vpack.c.bf16 %v230_v21, %v229_v20  ;;  %v7949_v30 = vld [vmem:[#allocation5 + $0x70] sm:$0xff]   ;;  %v8479_v31 = vpack.c.bf16 %v232_v24, %v231_v23 }
  0x71   : > { %6504 = vmatprep.subr.bf16.mxu0 %v7945_v2  ;;  %v351_v14 = vrot.slane %v8440_v8, 7  ;;  %v8481_v32 = vpack.c.bf16 %v234_v26, %v233_v25  ;;  %v235_v33 = vld [vmem:[%s8425_s9 + $0x70] sm:$0xff]  ;;  %v236_v34 = vld [vmem:[%s8425_s9 + $0x78] sm:$0xff]  ;;  %v237_v35 = vld [vmem:[%s8425_s9 + $0x80] sm:$0xff]  ;;  %v8487_v37 = vshll.u32 %v8455_v17, 16  ;;  %v8493_v41 = vshll.u32 %v8457_v18, 16 }
  0x72   : > { %v7950_v36 = vld [vmem:[#allocation5 + $0x78] sm:$0xff]   ;;  %v238_v38 = vld [vmem:[%s8425_s9 + $0x88] sm:$0xff]  ;;  %v355_v39 = vrot.slane %v8472_v27, 7  ;;  %v359_v40 = vrot.slane %v8475_v28, 7  ;;  %v8496_v42 = vshrl.u32 %v8477_v29, 16  ;;  %v239_v43 = vld [vmem:[%s8425_s9 + $0x90] sm:$0xff]  ;;  %v8500_v45 = vpack.c.bf16 %v236_v34, %v235_v33 }
  0x73   : > { %v354_v16 = vor.u32 %v8443_v9, %v351_v14  ;;  %v240_v44 = vld [vmem:[%s8425_s9 + $0x98] sm:$0xff]  ;;  %v241_v46 = vld [vmem:[%s8425_s9 + $0xa0] sm:$0xff]  ;;  %v242_v47 = vld [vmem:[%s8425_s9 + $0xa8] sm:$0xff]  ;;  %v8505_v48 = vshrl.u32 %v8479_v31, 16  ;;  %v8508_v49 = vshrl.u32 %v8481_v32, 16  ;;  %v8510_v50 = vpack.c.bf16 %v238_v38, %v237_v35 }
  0x74   : > { %6505 = vmatpush3.bf16.msra.mxu0 %v7945_v2  ;;  %10139 = vst [vmem:[#allocation10_spill] sm:$0xff] %v8496_v42  ;;  %v243_v51 = vld [vmem:[%s8425_s9 + $0xb0] sm:$0xff]  ;;  %v244_v52 = vld [vmem:[%s8425_s9 + $0xb8] sm:$0xff]  ;;  %v8515_v53 = vshll.u32 %v8477_v29, 16  ;;  %v8517_v54 = vpack.c.bf16 %v240_v44, %v239_v43  ;;  %v245_v55 = vld [vmem:[%s8425_s9 + $0xc0] sm:$0xff]  ;;  %v358_v57 = vor.u32 %v8487_v37, %v355_v39  ;;  %v362_v58 = vor.u32 %v8493_v41, %v359_v40 }
  0x75   : > { %6506 = vmatprep.subr.bf16.mxu0 %v7946_v3  ;;  %v8464_v22 = vsel %vm8450_vm2, %v8440_v8, %v354_v16  ;;  %10140 = vst [vmem:[#allocation11_spill] sm:$0xff] %v8505_v48  ;;  %10141 = vst [vmem:[#allocation12_spill] sm:$0xff] %v8508_v49  ;;  %v246_v56 = vld [vmem:[%s8425_s9 + $0xc8] sm:$0xff]  ;;  %v363_v59 = vrot.slane %v8496_v42, 7  ;;  %v8524_v60 = vpack.c.bf16 %v242_v47, %v241_v46  ;;  %v7951_v61 = vld [vmem:[#allocation5] sm:$0xff]   ;;  %v8527_v62 = vshll.u32 %v8479_v31, 16 }
  0x76   : > { %6516 = vmatprep.mubr.bf16.mxu0 %v8464_v22  ;;  %v8530_v63 = vshll.u32 %v8481_v32, 16  ;;  %v8533_v0 = vshrl.u32 %v8500_v45, 16  ;;  %v8535_v1 = vpack.c.bf16 %v244_v52, %v243_v51  ;;  %v367_v2 = vrot.slane %v8505_v48, 7  ;;  %v7952_v10 = vld [vmem:[#allocation5 + $0x8] sm:$0xff]   ;;  %v248_v12 = vld [vmem:[%s8425_s9 + $0xd8] sm:$0xff]  ;;  %v249_v20 = vld [vmem:[%s8425_s9 + $0xe0] sm:$0xff] }
  0x77   : > { %10142 = vst [vmem:[#allocation13_spill] sm:$0xff] %v8527_v62  ;;  %v8540_v4 = vshrl.u32 %v8510_v50, 16  ;;  %v8542_v5 = vpack.c.bf16 %v246_v56, %v245_v55  ;;  %v8546_v11 = vshrl.u32 %v8517_v54, 16  ;;  %v8552_v13 = vsel %vm8450_vm2, %v8472_v27, %v358_v57  ;;  %v250_v21 = vld [vmem:[%s8425_s9 + $0xe8] sm:$0xff]  ;;  %v7953_v35 = vld [vmem:[#allocation5 + $0x10] sm:$0xff]   ;;  %v7954_v56 = vld [vmem:[#allocation5 + $0x18] sm:$0xff]  }
  0x78   : > { %6507 = vmatpush3.bf16.msra.mxu0 %v7946_v3  ;;  %10143 = vst [vmem:[#allocation14_spill] sm:$0xff] %v8533_v0  ;;  %v371_v3 = vrot.slane %v8508_v49, 7  ;;  %v8557_v14 = vsel %vm8450_vm2, %v8475_v28, %v362_v58  ;;  %v8560_v16 = vshll.u32 %v8500_v45, 16  ;;  %v375_v23 = vrot.slane %v8533_v0, 7  ;;  %vm8836_vm5 = vmand %vm2008_vm3, %vm2009_vm4  ;;  %v8035_v15 = vld [vmem:[#allocation7 + $0xa0] sm:$0xff]  }
  0x79   : > { %6508 = vmatprep.subr.bf16.mxu0 %v7947_v7  ;;  %10144 = vst [vmem:[#allocation15_spill] sm:$0xff] %v8546_v11  ;;  %v8569_v24 = vshll.u32 %v8510_v50, 16  ;;  %v8572_v25 = vshll.u32 %v8517_v54, 16  ;;  %v8575_v26 = vshrl.u32 %v8535_v1, 16  ;;  %v8579_v33 = vshrl.u32 %v8542_v5, 16 }
  0x7a   : > { %10145 = vst [vmem:[#allocation16_spill] sm:$0xff] %v8560_v16  ;;  %v8586_v38 = vshll.u32 %v8524_v60, 16  ;;  %v8588_v39 = vpack.c.bf16 %v250_v21, %v249_v20  ;;  %v366_v40 = vor.u32 %v8515_v53, %v363_v59  ;;  %v8594_v44 = vshll.u32 %v8535_v1, 16 }
  0x7b   : > { %10146 = vst [vmem:[#allocation17_spill] sm:$0xff] %v8575_v26  ;;  %v370_v46 = vor.u32 %v8527_v62, %v367_v2  ;;  %v391_v47 = vrot.slane %v8575_v26, 7  ;;  %v8599_v51 = vshll.u32 %v8542_v5, 16  ;;  %v395_v52 = vrot.slane %v8579_v33, 7  ;;  %v251_v2 = vld [vmem:[%s8425_s9 + $0xf0] sm:$0xff] }
  0x7c   : > { %6509 = vmatpush3.bf16.msra.mxu0 %v7947_v7  ;;  %v247_v7 = vld [vmem:[%s8425_s9 + $0xd0] sm:$0xff]  ;;  %10147 = vst [vmem:[#allocation18_spill] sm:$0xff] %v8594_v44  ;;  %v8609_v58 = vshrl.u32 %v8588_v39, 16  ;;  %v8614_v59 = vsel %vm8450_vm2, %v8496_v42, %v366_v40  ;;  %v8626_v21 = vshll.u32 %v8588_v39, 16  ;;  %v378_v40 = vor.u32 %v8560_v16, %v375_v23 }
  0x7d   : > { %6510 = vmatprep.subr.bf16.mxu0 %v7948_v19  ;;  %v8581_v34 = vpack.c.bf16 %v248_v12, %v247_v7  ;;  %v252_v7 = vld [vmem:[%s8425_s9 + $0xf8] sm:$0xff]  ;;  %v7955_v12 = vld [vmem:[#allocation5 + $0x20] sm:$0xff]   ;;  %v7957_v23 = vld [vmem:[#allocation5 + $0x30] sm:$0xff]  }
  0x7e   : > { %v8641_v42 = vsel %vm8450_vm2, %v8533_v0, %v378_v40  ;;  %v7958_v0 = vld [vmem:[#allocation5 + $0x38] sm:$0xff]  }
  0x7f   : > { %v8603_v55 = vshrl.u32 %v8581_v34, 16  ;;  %v8606_v57 = vshll.u32 %v8581_v34, 16 }
  0x80   : > { %6511 = vmatpush3.bf16.msra.mxu0 %v7948_v19  ;;  %v8563_v19 = vshrl.u32 %v8524_v60, 16 }
  0x81   : > { %6512 = vmatprep.subr.bf16.mxu0 %v7949_v30  ;;  %10148 = vst [vmem:[#allocation19_spill] sm:$0xff] %v8603_v55  ;;  %v399_v20 = vrot.slane %v8603_v55, 7 }
  0x82   : > { %v387_v43 = vrot.slane %v8563_v19, 7 }
  0x84   : > { %6513 = vmatpush3.bf16.msra.mxu0 %v7949_v30  ;;  %v379_v30 = vrot.slane %v8540_v4, 7 }
  0x85   : > { %6514 = vmatprep.subr.bf16.mxu0 %v7950_v36 }
  0x88   : > { %6515 = vmatpush3.bf16.msra.mxu0 %v7950_v36  ;;  %v383_v36 = vrot.slane %v8546_v11, 7 }
  0x89   : > { %6548 = vmatprep.subr.bf16.mxu0 %v7951_v61 }
  0x8b   : > { %6517 = vmatmul.mubr.bf16.vlgmr.msra.gmra.mrb[0].mxu0 %v8552_v13 }
  0x8c   : > { %6549 = vmatpush3.bf16.msra.mxu0 %v7951_v61  ;;  %6520 = vmatprep.mubr.bf16.mxu0 %v8557_v14  ;;  %v8619_v61 = vsel %vm8450_vm2, %v8505_v48, %v370_v46  ;;  %v7956_v46 = vld [vmem:[#allocation5 + $0x28] sm:$0xff]   ;;  %v8631_v48 = vpack.c.bf16 %v252_v7, %v251_v2 }
  0x8d   : > { %6550 = vmatprep.subr.bf16.mxu0 %v7952_v10 }
  0x8e   : > { %v8647_v2 = vshrl.u32 %v8631_v48, 16  ;;  %v8650_v7 = vshll.u32 %v8631_v48, 16 }
  0x90   : > { %6551 = vmatpush3.bf16.msra.mxu0 %v7952_v10  ;;  %v374_v10 = vor.u32 %v8530_v63, %v371_v3  ;;  %v253_v3 = vld [vmem:[%s8425_s9 + $0x100] sm:$0xff]  ;;  %10149 = vst [vmem:[#allocation20_spill] sm:$0xff] %v8647_v2  ;;  %10150 = vst [vmem:[#allocation21_spill] sm:$0xff] %v8650_v7 }
  0x91   : > { %6552 = vmatprep.subr.bf16.mxu0 %v7953_v35 }
  0x92   : > { %v8636_v62 = vsel %vm8450_vm2, %v8508_v49, %v374_v10  ;;  %v386_v10 = vor.u32 %v8572_v25, %v383_v36 }
  0x93   : > { %6521 = vmatmul.mubr.bf16.gmra.mrb[4].mxu0 %v8614_v59 }
  0x94   : > { %6524 = vmatprep.mubr.bf16.mxu0 %v8619_v61  ;;  %6553 = vmatpush3.bf16.msra.mxu0 %v7953_v35  ;;  %v254_v35 = vld [vmem:[%s8425_s9 + $0x108] sm:$0xff]  ;;  %v8665_v49 = vsel %vm8450_vm2, %v8546_v11, %v386_v10  ;;  %v221_v10 = vld [vmem:[%s8425_s9] sm:$0xff] }
  0x95   : > { %6554 = vmatprep.subr.bf16.mxu0 %v7954_v56  ;;  %v8655_v40 = vpack.c.bf16 %v254_v35, %v253_v3  ;;  %v394_v3 = vor.u32 %v8594_v44, %v391_v47  ;;  %v222_v11 = vld [vmem:[%s8425_s9 + $0x8] sm:$0xff] }
  0x97   : > { %v8670_v36 = vshrl.u32 %v8655_v40, 16  ;;  %v8690_v47 = vshll.u32 %v8655_v40, 16 }
  0x98   : > { %6555 = vmatpush3.bf16.msra.mxu0 %v7954_v56  ;;  %v382_v56 = vor.u32 %v8569_v24, %v379_v30  ;;  %v403_v30 = vrot.slane %v8609_v58, 7 }
  0x99   : > { %6556 = vmatprep.subr.bf16.mxu0 %v7955_v12  ;;  %v411_v44 = vrot.slane %v8670_v36, 7 }
  0x9a   : > { %v8660_v16 = vsel %vm8450_vm2, %v8540_v4, %v382_v56  ;;  %v8683_v56 = vsel %vm8450_vm2, %v8575_v26, %v394_v3 }
  0x9b   : > { %6525 = vmatmul.mubr.bf16.gmra.mrb[8].mxu0 %v8636_v62 }
  0x9c   : > { %6528 = vmatprep.mubr.bf16.mxu0 %v8641_v42  ;;  %6557 = vmatpush3.bf16.msra.mxu0 %v7955_v12  ;;  %v7959_v12 = vld [vmem:[#allocation5 + $0x80] sm:$0xff]  }
  0x9d   : > { %6558 = vmatprep.subr.bf16.mxu0 %v7956_v46 }
  0xa0   : > { %6559 = vmatpush3.bf16.msra.mxu0 %v7956_v46  ;;  %v390_v46 = vor.u32 %v8586_v38, %v387_v43  ;;  %v407_v43 = vrot.slane %v8647_v2, 7 }
  0xa1   : > { %6560 = vmatprep.subr.bf16.mxu0 %v7957_v23 }
  0xa2   : > { %v8678_v35 = vsel %vm8450_vm2, %v8563_v19, %v390_v46  ;;  %v8695_v46 = vpack.c.bf16 %v222_v11, %v221_v10  ;;  %v406_v11 = vor.u32 %v8626_v21, %v403_v30  ;;  %v414_v30 = vor.u32 %v8690_v47, %v411_v44  ;;  %v7962_v44 = vld [vmem:[#allocation5 + $0x98] sm:$0xff]  }
  0xa3   : > { %6529 = vmatmul.mubr.bf16.gmra.mrb[12].mxu0 %v8660_v16 }
  0xa4   : > { %6532 = vmatprep.mubr.bf16.mxu0 %v8665_v49  ;;  %6561 = vmatpush3.bf16.msra.mxu0 %v7957_v23  ;;  %v398_v23 = vor.u32 %v8599_v51, %v395_v52  ;;  %v8710_v52 = vshrl.u32 %v8695_v46, 16  ;;  %v8718_v10 = vsel %vm8450_vm2, %v8609_v58, %v406_v11  ;;  %v8736_v11 = vsel %vm8450_vm2, %v8670_v36, %v414_v30  ;;  %v7964_v30 = vld [vmem:[#allocation5 + $0xa8] sm:$0xff]  }
  0xa5   : > { %6562 = vmatprep.subr.bf16.mxu0 %v7958_v0 }
  0xa6   : > { %v8700_v3 = vsel %vm8450_vm2, %v8579_v33, %v398_v23 }
  0xa8   : > { %6563 = vmatpush3.bf16.msra.mxu0 %v7958_v0  ;;  %v402_v0 = vor.u32 %v8606_v57, %v399_v20  ;;  %v410_v20 = vor.u32 %v8650_v7, %v407_v43  ;;  %v7961_v7 = vld [vmem:[#allocation5 + $0x90] sm:$0xff]  }
  0xa9   : > { %6596 = vmatprep.subr.bf16.mxu0 %v7959_v12 }
  0xaa   : > { %v8705_v26 = vsel %vm8450_vm2, %v8603_v55, %v402_v0  ;;  %v8723_v23 = vsel %vm8450_vm2, %v8647_v2, %v410_v20  ;;  %v347_v0 = vrot.slane %v8710_v52, 7  ;;  %v8727_v55 = vshll.u32 %v8695_v46, 16  ;;  %v7960_v2 = vld [vmem:[#allocation5 + $0x88] sm:$0xff]  }
  0xab   : > { %6533 = vmatmul.mubr.bf16.gmra.mrb[16].mxu0 %v8678_v35 }
  0xac   : > { %6536 = vmatprep.mubr.bf16.mxu0 %v8683_v56  ;;  %v350_v43 = vor.u32 %v8727_v55, %v347_v0  ;;  %v7963_v0 = vld [vmem:[#allocation5 + $0xa0] sm:$0xff]  }
  0xae   : > { %v440_v20 = vsel %vm8450_vm2, %v8710_v52, %v350_v43  ;;  %v7969_v43 = vld [vmem:[#allocation5 + $0xd0] sm:$0xff]  }
  0xb3   : > { %6537 = vmatmul.mubr.bf16.gmra.mrb[20].mxu0 %v8700_v3 }
  0xb4   : > { %6540 = vmatprep.mubr.bf16.mxu0 %v8705_v26 }
  0xbb   : > { %6541 = vmatmul.mubr.bf16.gmra.mrb[24].mxu0 %v8718_v10 }
  0xbc   : > { %6544 = vmatprep.mubr.bf16.mxu0 %v8723_v23 }
  0xc3   : > { %6545 = vmatmul.mubr.bf16.gmra.mrb[28].mxu0 %v8736_v11 }
  0xc4   : > { %6564 = vmatprep.mubr.bf16.mxu0 %v440_v20  ;;  %v7970_v20 = vld [vmem:[#allocation5 + $0xd8] sm:$0xff]  }
  0xcb   : > { %6565 = vmatmul.mubr.bf16.vlgmr.msra.gmra.mrb[0].mxu0 %v8464_v22  ;;  %v7965_v22 = vld [vmem:[#allocation5 + $0xb0] sm:$0xff]  }
  0xcc   : > { %6597 = vmatpush3.bf16.msra.mxu0 %v7959_v12  ;;  %6568 = vmatprep.mubr.bf16.mxu0 %v8552_v13  ;;  %v7966_v12 = vld [vmem:[#allocation5 + $0xb8] sm:$0xff]  }
  0xcd   : > { %6598 = vmatprep.subr.bf16.mxu0 %v7960_v2 }
  0xd0   : > { %6599 = vmatpush3.bf16.msra.mxu0 %v7960_v2  ;;  %v7967_v2 = vld [vmem:[#allocation5 + $0xc0] sm:$0xff]  }
  0xd1   : > { %6600 = vmatprep.subr.bf16.mxu0 %v7961_v7 }
  0xd3   : > { %6569 = vmatmul.mubr.bf16.gmra.mrb[4].mxu0 %v8557_v14 }
  0xd4   : > { %6572 = vmatprep.mubr.bf16.mxu0 %v8614_v59  ;;  %6601 = vmatpush3.bf16.msra.mxu0 %v7961_v7  ;;  %v7968_v7 = vld [vmem:[#allocation5 + $0xc8] sm:$0xff]  }
  0xd5   : > { %6602 = vmatprep.subr.bf16.mxu0 %v7962_v44 }
  0xd8   : > { %6603 = vmatpush3.bf16.msra.mxu0 %v7962_v44  ;;  %v7971_v44 = vld [vmem:[#allocation5 + $0xe0] sm:$0xff]  }
  0xd9   : > { %6604 = vmatprep.subr.bf16.mxu0 %v7963_v0 }
  0xdb   : > { %6573 = vmatmul.mubr.bf16.gmra.mrb[8].mxu0 %v8619_v61 }
  0xdc   : > { %6576 = vmatprep.mubr.bf16.mxu0 %v8636_v62  ;;  %6605 = vmatpush3.bf16.msra.mxu0 %v7963_v0 }
  0xdd   : > { %6606 = vmatprep.subr.bf16.mxu0 %v7964_v30 }
  0xe0   : > { %6607 = vmatpush3.bf16.msra.mxu0 %v7964_v30  ;;  %v7981_v30 = vld [vmem:[#allocation5 + $0x130] sm:$0xff]  }
  0xe1   : > { %6608 = vmatprep.subr.bf16.mxu0 %v7965_v22 }
  0xe3   : > { %6577 = vmatmul.mubr.bf16.gmra.mrb[12].mxu0 %v8641_v42 }
  0xe4   : > { %6580 = vmatprep.mubr.bf16.mxu0 %v8660_v16  ;;  %6609 = vmatpush3.bf16.msra.mxu0 %v7965_v22  ;;  %v7982_v22 = vld [vmem:[#allocation5 + $0x138] sm:$0xff]  }
  0xe5   : > { %6610 = vmatprep.subr.bf16.mxu0 %v7966_v12 }
  0xe8   : > { %6611 = vmatpush3.bf16.msra.mxu0 %v7966_v12  ;;  %v7983_v12 = vld [vmem:[#allocation5 + $0x140] sm:$0xff]  }
  0xe9   : > { %6644 = vmatprep.subr.bf16.mxu0 %v7967_v2 }
  0xeb   : > { %6581 = vmatmul.mubr.bf16.gmra.mrb[16].mxu0 %v8665_v49 }
  0xec   : > { %6584 = vmatprep.mubr.bf16.mxu0 %v8678_v35 }
  0xf3   : > { %6585 = vmatmul.mubr.bf16.gmra.mrb[20].mxu0 %v8683_v56 }
  0xf4   : > { %6588 = vmatprep.mubr.bf16.mxu0 %v8700_v3 }
  0xfb   : > { %6589 = vmatmul.mubr.bf16.gmra.mrb[24].mxu0 %v8705_v26 }
  0xfc   : > { %6592 = vmatprep.mubr.bf16.mxu0 %v8718_v10 }
 0x103   : > { %6593 = vmatmul.mubr.bf16.gmra.mrb[28].mxu0 %v8723_v23 }
 0x104   : > { %6612 = vmatprep.mubr.bf16.mxu0 %v8552_v13  ;;  %v7972_v13 = vld [vmem:[#allocation5 + $0xe8] sm:$0xff]  }
 0x10b   : > { %6613 = vmatmul.mubr.bf16.vlgmr.msra.gmra.mrb[0].mxu0 %v8557_v14  ;;  %v7973_v14 = vld [vmem:[#allocation5 + $0xf0] sm:$0xff]  }
 0x10c   : > { %6645 = vmatpush3.bf16.msra.mxu0 %v7967_v2  ;;  %6616 = vmatprep.mubr.bf16.mxu0 %v8614_v59  ;;  %v7974_v59 = vld [vmem:[#allocation5 + $0xf8] sm:$0xff]   ;;  %v7984_v2 = vld [vmem:[#allocation5 + $0x148] sm:$0xff]  }
 0x10d   : > { %6646 = vmatprep.subr.bf16.mxu0 %v7968_v7 }
 0x110   : > { %6647 = vmatpush3.bf16.msra.mxu0 %v7968_v7  ;;  %v7985_v7 = vld [vmem:[#allocation5 + $0x150] sm:$0xff]  }
 0x111   : > { %6648 = vmatprep.subr.bf16.mxu0 %v7969_v43 }
 0x113   : > { %6617 = vmatmul.mubr.bf16.gmra.mrb[4].mxu0 %v8619_v61 }
 0x114   : > { %6620 = vmatprep.mubr.bf16.mxu0 %v8636_v62  ;;  %6649 = vmatpush3.bf16.msra.mxu0 %v7969_v43  ;;  %v7975_v62 = vld [vmem:[#allocation5 + $0x100] sm:$0xff]   ;;  %v7986_v43 = vld [vmem:[#allocation5 + $0x158] sm:$0xff]  }
 0x115   : > { %6650 = vmatprep.subr.bf16.mxu0 %v7970_v20 }
 0x118   : > { %6651 = vmatpush3.bf16.msra.mxu0 %v7970_v20  ;;  %v7987_v20 = vld [vmem:[#allocation5 + $0x160] sm:$0xff]  }
 0x119   : > { %6652 = vmatprep.subr.bf16.mxu0 %v7971_v44 }
 0x11b   : > { %6621 = vmatmul.mubr.bf16.gmra.mrb[8].mxu0 %v8641_v42  ;;  %v255_v42 = vld [vmem:[%s8425_s9 + $0x110] sm:$0xff] }
 0x11c   : > { %6624 = vmatprep.mubr.bf16.mxu0 %v8660_v16  ;;  %6653 = vmatpush3.bf16.msra.mxu0 %v7971_v44  ;;  %v256_v16 = vld [vmem:[%s8425_s9 + $0x118] sm:$0xff]  ;;  %v7989_v44 = vld [vmem:[#allocation5 + $0x170] sm:$0xff]  }
 0x11d   : > { %6654 = vmatprep.subr.bf16.mxu0 %v7972_v13  ;;  %v8770_v61 = vpack.c.bf16 %v256_v16, %v255_v42  ;;  %v7994_v42 = vld [vmem:[#allocation5 + $0x198] sm:$0xff]   ;;  %v7995_v16 = vld [vmem:[#allocation5 + $0x1a0] sm:$0xff]  }
 0x11f   : > { %v8779_v0 = vshll.u32 %v8770_v61, 16 }
 0x120   : > { %6655 = vmatpush3.bf16.msra.mxu0 %v7972_v13  ;;  %v7990_v13 = vld [vmem:[#allocation5 + $0x178] sm:$0xff]  }
 0x121   : > { %6656 = vmatprep.subr.bf16.mxu0 %v7973_v14 }
 0x123   : > { %6625 = vmatmul.mubr.bf16.gmra.mrb[12].mxu0 %v8665_v49  ;;  %v8775_v49 = vshrl.u32 %v8770_v61, 16 }
 0x124   : > { %6628 = vmatprep.mubr.bf16.mxu0 %v8678_v35  ;;  %6657 = vmatpush3.bf16.msra.mxu0 %v7973_v14  ;;  %v7991_v14 = vld [vmem:[#allocation5 + $0x180] sm:$0xff]  }
 0x125   : > { %6658 = vmatprep.subr.bf16.mxu0 %v7974_v59  ;;  %v415_v35 = vrot.slane %v8775_v49, 7 }
 0x128   : > { %6659 = vmatpush3.bf16.msra.mxu0 %v7974_v59  ;;  %v7992_v59 = vld [vmem:[#allocation5 + $0x188] sm:$0xff]  }
 0x129   : > { %6692 = vmatprep.subr.bf16.mxu0 %v7975_v62 }
 0x12b   : > { %6629 = vmatmul.mubr.bf16.gmra.mrb[16].mxu0 %v8683_v56  ;;  %v418_v56 = vor.u32 %v8779_v0, %v415_v35 }
 0x12c   : > { %6632 = vmatprep.mubr.bf16.mxu0 %v8700_v3  ;;  %v7976_v3 = vld [vmem:[#allocation5 + $0x108] sm:$0xff]  }
 0x133   : > { %6633 = vmatmul.mubr.bf16.gmra.mrb[20].mxu0 %v8705_v26  ;;  %v457_v26 = vsel %vm8450_vm2, %v8775_v49, %v418_v56 }
 0x134   : > { %6636 = vmatprep.mubr.bf16.mxu0 %v8718_v10  ;;  %v7977_v10 = vld [vmem:[#allocation5 + $0x110] sm:$0xff]  }
 0x13b   : > { %6637 = vmatmul.mubr.bf16.gmra.mrb[24].mxu0 %v8723_v23  ;;  %v7978_v23 = vld [vmem:[#allocation5 + $0x118] sm:$0xff]  }
 0x13c   : > { %6640 = vmatprep.mubr.bf16.mxu0 %v8736_v11  ;;  %v7979_v11 = vld [vmem:[#allocation5 + $0x120] sm:$0xff]  }
 0x143   : > { %6641 = vmatmul.mubr.bf16.gmra.mrb[28].mxu0 %v457_v26 }
 0x144   : > { %6660 = vmatprep.mubr.bf16.mxu0 %v8695_v46  ;;  %v7980_v46 = vld [vmem:[#allocation5 + $0x128] sm:$0xff]  }
 0x14b   : > { %6661 = vmatmul.mubr.bf16.vlgmr.msra.gmra.mrb[0].mxu0 %v8437_v6 }
 0x14c   : > { %6693 = vmatpush3.bf16.msra.mxu0 %v7975_v62  ;;  %6664 = vmatprep.mubr.bf16.mxu0 %v8455_v17  ;;  %v7993_v62 = vld [vmem:[#allocation5 + $0x190] sm:$0xff]  }
 0x14d   : > { %6694 = vmatprep.subr.bf16.mxu0 %v7976_v3 }
 0x150   : > { %6695 = vmatpush3.bf16.msra.mxu0 %v7976_v3  ;;  %v8002_v3 = vld [vmem:[#allocation5 + $0x1d8] sm:$0xff]  }
 0x151   : > { %6696 = vmatprep.subr.bf16.mxu0 %v7977_v10 }
 0x153   : > { %6665 = vmatmul.mubr.bf16.gmra.mrb[4].mxu0 %v8457_v18 }
 0x154   : > { %6668 = vmatprep.mubr.bf16.mxu0 %v8477_v29  ;;  %6697 = vmatpush3.bf16.msra.mxu0 %v7977_v10  ;;  %v10155_v10 = vld [vmem:[#allocation11_spill] sm:$0xff] }
 0x155   : > { %6698 = vmatprep.subr.bf16.mxu0 %v7978_v23 }
 0x158   : > { %6699 = vmatpush3.bf16.msra.mxu0 %v7978_v23 }
 0x159   : > { %6700 = vmatprep.subr.bf16.mxu0 %v7979_v11 }
 0x15b   : > { %6669 = vmatmul.mubr.bf16.gmra.mrb[8].mxu0 %v8479_v31 }
 0x15c   : > { %6672 = vmatprep.mubr.bf16.mxu0 %v8481_v32  ;;  %6701 = vmatpush3.bf16.msra.mxu0 %v7979_v11 }
 0x15d   : > { %6702 = vmatprep.subr.bf16.mxu0 %v7980_v46 }
 0x160   : > { %6703 = vmatpush3.bf16.msra.mxu0 %v7980_v46  ;;  %v8003_v46 = vld [vmem:[#allocation5 + $0x1e0] sm:$0xff]  }
 0x161   : > { %6704 = vmatprep.subr.bf16.mxu0 %v7981_v30 }
 0x163   : > { %6673 = vmatmul.mubr.bf16.gmra.mrb[12].mxu0 %v8500_v45 }
 0x164   : > { %6676 = vmatprep.mubr.bf16.mxu0 %v8510_v50  ;;  %6705 = vmatpush3.bf16.msra.mxu0 %v7981_v30  ;;  %v10157_v30 = vld [vmem:[#allocation16_spill] sm:$0xff] }
 0x165   : > { %6706 = vmatprep.subr.bf16.mxu0 %v7982_v22 }
 0x168   : > { %6707 = vmatpush3.bf16.msra.mxu0 %v7982_v22  ;;  %v1950_v22 = vrot.slane %v10157_v30, 1 }
 0x169   : > { %6740 = vmatprep.subr.bf16.mxu0 %v7983_v12 }
 0x16b   : > { %6677 = vmatmul.mubr.bf16.gmra.mrb[16].mxu0 %v8517_v54 }
 0x16c   : > { %6680 = vmatprep.mubr.bf16.mxu0 %v8524_v60 }
 0x173   : > { %6681 = vmatmul.mubr.bf16.gmra.mrb[20].mxu0 %v8535_v1 }
 0x174   : > { %6684 = vmatprep.mubr.bf16.mxu0 %v8542_v5 }
 0x17b   : > { %6685 = vmatmul.mubr.bf16.gmra.mrb[24].mxu0 %v8581_v34 }
 0x17c   : > { %6688 = vmatprep.mubr.bf16.mxu0 %v8588_v39 }
 0x183   : > { %6689 = vmatmul.mubr.bf16.gmra.mrb[28].mxu0 %v8631_v48 }
 0x184   : > { %6708 = vmatprep.mubr.bf16.mxu0 %v8437_v6  ;;  %v7988_v6 = vld [vmem:[#allocation5 + $0x168] sm:$0xff]  }
 0x18b   : > { %6709 = vmatmul.mubr.bf16.vlgmr.msra.gmra.mrb[0].mxu0 %v8455_v17 }
 0x18c   : > { %6741 = vmatpush3.bf16.msra.mxu0 %v7983_v12  ;;  %6712 = vmatprep.mubr.bf16.mxu0 %v8457_v18 }
 0x18d   : > { %6742 = vmatprep.subr.bf16.mxu0 %v7984_v2 }
 0x190   : > { %6743 = vmatpush3.bf16.msra.mxu0 %v7984_v2  ;;  %v1952_v2 = vrot.slane %v8569_v24, 1 }
 0x191   : > { %6744 = vmatprep.subr.bf16.mxu0 %v7985_v7 }
 0x193   : > { %6713 = vmatmul.mubr.bf16.gmra.mrb[4].mxu0 %v8477_v29 }
 0x194   : > { %6716 = vmatprep.mubr.bf16.mxu0 %v8479_v31  ;;  %6745 = vmatpush3.bf16.msra.mxu0 %v7985_v7  ;;  %v8004_v7 = vld [vmem:[#allocation5 + $0x1e8] sm:$0xff]  }
 0x195   : > { %6746 = vmatprep.subr.bf16.mxu0 %v7986_v43 }
 0x198   : > { %6747 = vmatpush3.bf16.msra.mxu0 %v7986_v43  ;;  %v10158_v43 = vld [vmem:[#allocation14_spill] sm:$0xff] }
 0x199   : > { %6748 = vmatprep.subr.bf16.mxu0 %v7987_v20 }
 0x19b   : > { %6717 = vmatmul.mubr.bf16.gmra.mrb[8].mxu0 %v8481_v32 }
 0x19c   : > { %6720 = vmatprep.mubr.bf16.mxu0 %v8500_v45  ;;  %6749 = vmatpush3.bf16.msra.mxu0 %v7987_v20  ;;  %v1951_v20 = vor.u32 %v1950_v22, %v10158_v43 }
 0x19d   : > { %6750 = vmatprep.subr.bf16.mxu0 %v7988_v6 }
 0x1a0   : > { %6751 = vmatpush3.bf16.msra.mxu0 %v7988_v6  ;;  %v1953_v6 = vor.u32 %v1952_v2, %v8540_v4  ;;  %v10159_v4 = vld [vmem:[#allocation15_spill] sm:$0xff] }
 0x1a1   : > { %6752 = vmatprep.subr.bf16.mxu0 %v7989_v44 }
 0x1a3   : > { %6721 = vmatmul.mubr.bf16.gmra.mrb[12].mxu0 %v8510_v50 }
 0x1a4   : > { %6724 = vmatprep.mubr.bf16.mxu0 %v8517_v54  ;;  %6753 = vmatpush3.bf16.msra.mxu0 %v7989_v44  ;;  %v8005_v44 = vld [vmem:[#allocation5 + $0x1f0] sm:$0xff]  }
 0x1a5   : > { %6754 = vmatprep.subr.bf16.mxu0 %v7990_v13 }
 0x1a8   : > { %6755 = vmatpush3.bf16.msra.mxu0 %v7990_v13  ;;  %v1954_v13 = vrot.slane %v8572_v25, 1 }
 0x1a9   : > { %6788 = vmatprep.subr.bf16.mxu0 %v7991_v14 }
 0x1ab   : > { %6725 = vmatmul.mubr.bf16.gmra.mrb[16].mxu0 %v8524_v60 }
 0x1ac   : > { %6728 = vmatprep.mubr.bf16.mxu0 %v8535_v1 }
 0x1b3   : > { %6729 = vmatmul.mubr.bf16.gmra.mrb[20].mxu0 %v8542_v5 }
 0x1b4   : > { %6732 = vmatprep.mubr.bf16.mxu0 %v8581_v34 }
 0x1bb   : > { %6733 = vmatmul.mubr.bf16.gmra.mrb[24].mxu0 %v8588_v39 }
 0x1bc   : > { %6736 = vmatprep.mubr.bf16.mxu0 %v8631_v48 }
 0x1c3   : > { %6737 = vmatmul.mubr.bf16.gmra.mrb[28].mxu0 %v8655_v40 }
 0x1c4   : > { %6756 = vmatprep.mubr.bf16.mxu0 %v8455_v17  ;;  %v7996_v17 = vld [vmem:[#allocation5 + $0x1a8] sm:$0xff]  }
 0x1cb   : > { %6757 = vmatmul.mubr.bf16.vlgmr.msra.gmra.mrb[0].mxu0 %v8457_v18  ;;  %v7997_v18 = vld [vmem:[#allocation5 + $0x1b0] sm:$0xff]  }
 0x1cc   : > { %6789 = vmatpush3.bf16.msra.mxu0 %v7991_v14  ;;  %6760 = vmatprep.mubr.bf16.mxu0 %v8477_v29  ;;  %v7998_v29 = vld [vmem:[#allocation5 + $0x1b8] sm:$0xff]   ;;  %v8905_v14 = vsel %vm8836_vm5, %v1953_v6, %v8569_v24 }
 0x1cd   : > { %6790 = vmatprep.subr.bf16.mxu0 %v7992_v59 }
 0x1d0   : > { %6791 = vmatpush3.bf16.msra.mxu0 %v7992_v59  ;;  %v1956_v59 = vrot.slane %v8586_v38, 1 }
 0x1d1   : > { %6792 = vmatprep.subr.bf16.mxu0 %v7993_v62 }
 0x1d3   : > { %6761 = vmatmul.mubr.bf16.gmra.mrb[4].mxu0 %v8479_v31  ;;  %v7999_v31 = vld [vmem:[#allocation5 + $0x1c0] sm:$0xff]  }
 0x1d4   : > { %6764 = vmatprep.mubr.bf16.mxu0 %v8481_v32  ;;  %6793 = vmatpush3.bf16.msra.mxu0 %v7993_v62  ;;  %v1936_v32 = vrot.slane %v8727_v55, 1  ;;  %v8006_v62 = vld [vmem:[#allocation5 + $0x1f8] sm:$0xff]  }
 0x1d5   : > { %6794 = vmatprep.subr.bf16.mxu0 %v7994_v42 }
 0x1d8   : > { %6795 = vmatpush3.bf16.msra.mxu0 %v7994_v42  ;;  %v1955_v42 = vor.u32 %v1954_v13, %v10159_v4 }
 0x1d9   : > { %6796 = vmatprep.subr.bf16.mxu0 %v7995_v16 }
 0x1da   : > { %v8915_v24 = vsel %vm8836_vm5, %v1955_v42, %v8572_v25 }
 0x1db   : > { %6765 = vmatmul.mubr.bf16.gmra.mrb[8].mxu0 %v8500_v45  ;;  %v1937_v45 = vor.u32 %v1936_v32, %v8710_v52  ;;  %v1944_v52 = vrot.slane %v8515_v53, 1  ;;  %v1960_v32 = vrot.slane %v8599_v51, 1 }
 0x1dc   : > { %6768 = vmatprep.mubr.bf16.mxu0 %v8510_v50  ;;  %6797 = vmatpush3.bf16.msra.mxu0 %v7995_v16  ;;  %v1957_v16 = vor.u32 %v1956_v59, %v8563_v19  ;;  %v10161_v19 = vld [vmem:[#allocation17_spill] sm:$0xff] }
 0x1dd   : > { %6798 = vmatprep.subr.bf16.mxu0 %v7996_v17  ;;  %v1961_v25 = vor.u32 %v1960_v32, %v8579_v33 }
 0x1e0   : > { %6799 = vmatpush3.bf16.msra.mxu0 %v7996_v17  ;;  %v8007_v17 = vld [vmem:[#allocation5 + $0x200] sm:$0xff]  }
 0x1e1   : > { %6800 = vmatprep.subr.bf16.mxu0 %v7997_v18 }
 0x1e3   : > { %6769 = vmatmul.mubr.bf16.gmra.mrb[12].mxu0 %v8517_v54  ;;  %v1938_v54 = vrot.slane %v8443_v9, 1 }
 0x1e4   : > { %6772 = vmatprep.mubr.bf16.mxu0 %v8524_v60  ;;  %6801 = vmatpush3.bf16.msra.mxu0 %v7997_v18  ;;  %v2011_v60 = vsel %vm8836_vm5, %v1937_v45, %v8727_v55  ;;  %v10160_v18 = vld [vmem:[#allocation18_spill] sm:$0xff] }
 0x1e5   : > { %6802 = vmatprep.subr.bf16.mxu0 %v7998_v29 }
 0x1e8   : > { %6803 = vmatpush3.bf16.msra.mxu0 %v7998_v29  ;;  %v1958_v29 = vrot.slane %v10160_v18, 1 }
 0x1e9   : > { %6836 = vmatprep.subr.bf16.mxu0 %v7999_v31 }
 0x1ea   : > { %v1959_v45 = vor.u32 %v1958_v29, %v10161_v19 }
 0x1eb   : > { %6773 = vmatmul.mubr.bf16.gmra.mrb[16].mxu0 %v8535_v1  ;;  %v1940_v1 = vrot.slane %v8487_v37, 1 }
 0x1ec   : > { %6776 = vmatprep.mubr.bf16.mxu0 %v8542_v5 }
 0x1ed   : > { %v1941_v5 = vor.u32 %v1940_v1, %v8472_v27  ;;  %v1964_v1 = vrot.slane %v8626_v21, 1 }
 0x1ef   : > { %v8857_v55 = vsel %vm8836_vm5, %v1941_v5, %v8487_v37  ;;  %v10154_v37 = vld [vmem:[#allocation13_spill] sm:$0xff]  ;;  %v1965_v5 = vor.u32 %v1964_v1, %v8609_v58  ;;  %v8008_v58 = vld [vmem:[#allocation5 + $0x208] sm:$0xff]  }
 0x1f0   : > { %v1946_v56 = vrot.slane %v10154_v37, 1 }
 0x1f2   : > { %v1947_v23 = vor.u32 %v1946_v56, %v10155_v10  ;;  %v8014_v56 = vld [vmem:[#allocation5 + $0x238] sm:$0xff]  }
 0x1f3   : > { %6777 = vmatmul.mubr.bf16.gmra.mrb[20].mxu0 %v8581_v34 }
 0x1f4   : > { %6780 = vmatprep.mubr.bf16.mxu0 %v8588_v39  ;;  %v1942_v39 = vrot.slane %v8493_v41, 1 }
 0x1fb   : > { %6781 = vmatmul.mubr.bf16.gmra.mrb[24].mxu0 %v8631_v48  ;;  %v1939_v48 = vor.u32 %v1938_v54, %v8440_v8  ;;  %v1943_v8 = vor.u32 %v1942_v39, %v8475_v28  ;;  %v1948_v28 = vrot.slane %v8530_v63, 1  ;;  %v8931_v54 = vsel %vm8836_vm5, %v1959_v45, %v10160_v18 }
 0x1fc   : > { %6784 = vmatprep.mubr.bf16.mxu0 %v8655_v40  ;;  %v8000_v40 = vld [vmem:[#allocation5 + $0x1c8] sm:$0xff]  }
 0x1fd   : > { %v8851_v34 = vsel %vm8836_vm5, %v1939_v48, %v8443_v9  ;;  %v10153_v9 = vld [vmem:[#allocation10_spill] sm:$0xff]  ;;  %v8867_v35 = vsel %vm8836_vm5, %v1943_v8, %v8493_v41  ;;  %v10156_v41 = vld [vmem:[#allocation12_spill] sm:$0xff]  ;;  %v10162_v48 = vld [vmem:[#allocation19_spill] sm:$0xff] }
 0x1fe   : > { %v1945_v27 = vor.u32 %v1944_v52, %v10153_v9  ;;  %v1949_v11 = vor.u32 %v1948_v28, %v10156_v41  ;;  %v10164_v8 = vld [vmem:[#allocation20_spill] sm:$0xff]  ;;  %v1968_v28 = vrot.slane %v8690_v47, 1  ;;  %v8018_v41 = vld [vmem:[#allocation7 + $0x58] sm:$0xff]  }
 0x200   : > { %v8873_v26 = vsel %vm8836_vm5, %v1945_v27, %v8515_v53  ;;  %v8883_v53 = vsel %vm8836_vm5, %v1947_v23, %v10154_v37  ;;  %v8889_v12 = vsel %vm8836_vm5, %v1949_v11, %v8530_v63  ;;  %v8899_v63 = vsel %vm8836_vm5, %v1951_v20, %v10157_v30  ;;  %v8013_v37 = vld [vmem:[#allocation5 + $0x230] sm:$0xff]   ;;  %v8019_v11 = vld [vmem:[#allocation7 + $0x60] sm:$0xff]  }
 0x201   : > { %v8017_v23 = vld [vmem:[#allocation7 + $0x50] sm:$0xff]  }
 0x203   : > { %6785 = vmatmul.mubr.bf16.gmra.mrb[28].mxu0 %v8770_v61  ;;  %v8001_v61 = vld [vmem:[#allocation5 + $0x1d0] sm:$0xff]  }
 0x204   : > { %6804 = vmatprep.mubr.bf16.mxu0 %v2011_v60  ;;  %v1962_v60 = vrot.slane %v8606_v57, 1 }
 0x206   : > { %v1963_v33 = vor.u32 %v1962_v60, %v10162_v48 }
 0x208   : > { %v2024_v39 = vsel %vm8836_vm5, %v1963_v33, %v8606_v57  ;;  %v8009_v57 = vld [vmem:[#allocation5 + $0x210] sm:$0xff]  }
 0x20b   : > { %6805 = vmatmul.mubr.bf16.vlgmr.msra.gmra.mrb[0].mxu0 %v8851_v34 }
 0x20c   : > { %6837 = vmatpush3.bf16.msra.mxu0 %v7999_v31  ;;  %6808 = vmatprep.mubr.bf16.mxu0 %v8857_v55  ;;  %v8921_v31 = vsel %vm8836_vm5, %v1957_v16, %v8586_v38  ;;  %v8937_v38 = vsel %vm8836_vm5, %v1961_v25, %v8599_v51  ;;  %v2025_v51 = vsel %vm8836_vm5, %v1965_v5, %v8626_v21  ;;  %v8010_v21 = vld [vmem:[#allocation5 + $0x218] sm:$0xff]  }
 0x20d   : > { %6838 = vmatprep.subr.bf16.mxu0 %v8000_v40 }
 0x210   : > { %6839 = vmatpush3.bf16.msra.mxu0 %v8000_v40  ;;  %v10163_v40 = vld [vmem:[#allocation21_spill] sm:$0xff] }
 0x211   : > { %6840 = vmatprep.subr.bf16.mxu0 %v8001_v61  ;;  %v1966_v52 = vrot.slane %v10163_v40, 1 }
 0x213   : > { %6809 = vmatmul.mubr.bf16.gmra.mrb[4].mxu0 %v8867_v35  ;;  %v1967_v9 = vor.u32 %v1966_v52, %v10164_v8 }
 0x214   : > { %6812 = vmatprep.mubr.bf16.mxu0 %v8873_v26  ;;  %6841 = vmatpush3.bf16.msra.mxu0 %v8001_v61  ;;  %v8011_v61 = vld [vmem:[#allocation5 + $0x220] sm:$0xff]  }
 0x215   : > { %6842 = vmatprep.subr.bf16.mxu0 %v8002_v3  ;;  %v2026_v27 = vsel %vm8836_vm5, %v1967_v9, %v10163_v40 }
 0x218   : > { %6843 = vmatpush3.bf16.msra.mxu0 %v8002_v3  ;;  %v1969_v3 = vor.u32 %v1968_v28, %v8670_v36  ;;  %v1970_v36 = vrot.slane %v8779_v0, 1 }
 0x219   : > { %6844 = vmatprep.subr.bf16.mxu0 %v8003_v46 }
 0x21a   : > { %v2027_v10 = vsel %vm8836_vm5, %v1969_v3, %v8690_v47  ;;  %v1971_v47 = vor.u32 %v1970_v36, %v8775_v49  ;;  %v8020_v49 = vld [vmem:[#allocation7 + $0x68] sm:$0xff]  }
 0x21b   : > { %6813 = vmatmul.mubr.bf16.gmra.mrb[8].mxu0 %v8883_v53 }
 0x21c   : > { %6816 = vmatprep.mubr.bf16.mxu0 %v8889_v12  ;;  %6845 = vmatpush3.bf16.msra.mxu0 %v8003_v46  ;;  %v8022_v46 = vld [vmem:[#allocation7 + $0x78] sm:$0xff]  }
 0x21d   : > { %6846 = vmatprep.subr.bf16.mxu0 %v8004_v7 }
 0x220   : > { %6847 = vmatpush3.bf16.msra.mxu0 %v8004_v7 }
 0x221   : > { %6848 = vmatprep.subr.bf16.mxu0 %v8005_v44 }
 0x223   : > { %6817 = vmatmul.mubr.bf16.gmra.mrb[12].mxu0 %v8899_v63 }
 0x224   : > { %6820 = vmatprep.mubr.bf16.mxu0 %v8905_v14  ;;  %6849 = vmatpush3.bf16.msra.mxu0 %v8005_v44 }
 0x225   : > { %6850 = vmatprep.subr.bf16.mxu0 %v8006_v62 }
 0x228   : > { %6851 = vmatpush3.bf16.msra.mxu0 %v8006_v62 }
 0x229   : > { %6884 = vmatprep.subr.bf16.mxu0 %v8007_v17 }
 0x22b   : > { %6821 = vmatmul.mubr.bf16.gmra.mrb[16].mxu0 %v8915_v24 }
 0x22c   : > { %6824 = vmatprep.mubr.bf16.mxu0 %v8921_v31 }
 0x233   : > { %6825 = vmatmul.mubr.bf16.gmra.mrb[20].mxu0 %v8931_v54 }
 0x234   : > { %6828 = vmatprep.mubr.bf16.mxu0 %v8937_v38 }
 0x23b   : > { %6829 = vmatmul.mubr.bf16.gmra.mrb[24].mxu0 %v2024_v39 }
 0x23c   : > { %6832 = vmatprep.mubr.bf16.mxu0 %v2025_v51 }
 0x243   : > { %6833 = vmatmul.mubr.bf16.gmra.mrb[28].mxu0 %v2026_v27 }
 0x244   : > { %6852 = vmatprep.mubr.bf16.mxu0 %v8851_v34  ;;  %v8012_v34 = vld [vmem:[#allocation5 + $0x228] sm:$0xff]  }
 0x24b   : > { %6853 = vmatmul.mubr.bf16.vlgmr.msra.gmra.mrb[0].mxu0 %v8857_v55 }
 0x24c   : > { %6885 = vmatpush3.bf16.msra.mxu0 %v8007_v17  ;;  %6856 = vmatprep.mubr.bf16.mxu0 %v8867_v35 }
 0x24d   : > { %6886 = vmatprep.subr.bf16.mxu0 %v8008_v58 }
 0x250   : > { %6887 = vmatpush3.bf16.msra.mxu0 %v8008_v58 }
 0x251   : > { %6888 = vmatprep.subr.bf16.mxu0 %v8009_v57 }
 0x253   : > { %6857 = vmatmul.mubr.bf16.gmra.mrb[4].mxu0 %v8873_v26 }
 0x254   : > { %6860 = vmatprep.mubr.bf16.mxu0 %v8883_v53  ;;  %6889 = vmatpush3.bf16.msra.mxu0 %v8009_v57 }
 0x255   : > { %6890 = vmatprep.subr.bf16.mxu0 %v8010_v21 }
 0x258   : > { %6891 = vmatpush3.bf16.msra.mxu0 %v8010_v21 }
 0x259   : > { %6892 = vmatprep.subr.bf16.mxu0 %v8011_v61 }
 0x25b   : > { %6861 = vmatmul.mubr.bf16.gmra.mrb[8].mxu0 %v8889_v12 }
 0x25c   : > { %6864 = vmatprep.mubr.bf16.mxu0 %v8899_v63  ;;  %6893 = vmatpush3.bf16.msra.mxu0 %v8011_v61 }
 0x25d   : > { %6894 = vmatprep.subr.bf16.mxu0 %v8012_v34 }
 0x260   : > { %6895 = vmatpush3.bf16.msra.mxu0 %v8012_v34 }
 0x261   : > { %6896 = vmatprep.subr.bf16.mxu0 %v8013_v37 }
 0x263   : > { %6865 = vmatmul.mubr.bf16.gmra.mrb[12].mxu0 %v8905_v14 }
 0x264   : > { %6868 = vmatprep.mubr.bf16.mxu0 %v8915_v24  ;;  %6897 = vmatpush3.bf16.msra.mxu0 %v8013_v37 }
 0x265   : > { %6898 = vmatprep.subr.bf16.mxu0 %v8014_v56 }
 0x268   : > { %6899 = vmatpush3.bf16.msra.mxu0 %v8014_v56 }
 0x26b   : > { %6869 = vmatmul.mubr.bf16.gmra.mrb[16].mxu0 %v8921_v31 }
 0x26c   : > { %6872 = vmatprep.mubr.bf16.mxu0 %v8931_v54 }
 0x273   : > { %6873 = vmatmul.mubr.bf16.gmra.mrb[20].mxu0 %v8937_v38 }
 0x274   : > { %6876 = vmatprep.mubr.bf16.mxu0 %v2024_v39 }
 0x27b   : > { %6877 = vmatmul.mubr.bf16.gmra.mrb[24].mxu0 %v2025_v51 }
 0x27c   : > { %6880 = vmatprep.mubr.bf16.mxu0 %v2026_v27 }
 0x283   : > { %6881 = vmatmul.mubr.bf16.gmra.mrb[28].mxu0 %v2027_v10 }
 0x284   : > { %6900 = vmatprep.mubr.bf16.mxu0 %v8857_v55  ;;  %v2028_v55 = vsel %vm8836_vm5, %v1971_v47, %v8779_v0  ;;  %v8021_v0 = vld [vmem:[#allocation7 + $0x70] sm:$0xff]  }
 0x28b   : > { %6901 = vmatmul.mubr.bf16.vlgmr.msra.gmra.mrb[0].mxu0 %v8867_v35  ;;  %v8015_v35 = vld [vmem:[#allocation7 + $0x40] sm:$0xff]  }
 0x28c   : > { %6904 = vmatprep.mubr.bf16.mxu0 %v8873_v26  ;;  %6932 = vmatprep.subr.bf16.mxu1 %v8015_v35  ;;  %v8016_v26 = vld [vmem:[#allocation7 + $0x48] sm:$0xff]  }
 0x28d   : > { %6933 = vmatpush3.bf16.msra.mxu1 %v8015_v35 }
 0x28e   : > { %6934 = vmatprep.subr.bf16.mxu1 %v8016_v26 }
 0x291   : > { %6935 = vmatpush3.bf16.msra.mxu1 %v8016_v26 }
 0x292   : > { %6936 = vmatprep.subr.bf16.mxu1 %v8017_v23 }
 0x293   : > { %6905 = vmatmul.mubr.bf16.gmra.mrb[4].mxu0 %v8883_v53  ;;  %v8988_v53 = vld [vmem:[#allocation7] sm:$0xff]  }
 0x294   : > { %6908 = vmatprep.mubr.bf16.mxu0 %v8889_v12 }
 0x295   : > { %6937 = vmatpush3.bf16.msra.mxu1 %v8017_v23 }
 0x296   : > { %6938 = vmatprep.subr.bf16.mxu1 %v8018_v41 }
 0x299   : > { %6939 = vmatpush3.bf16.msra.mxu1 %v8018_v41 }
 0x29a   : > { %6940 = vmatprep.subr.bf16.mxu1 %v8019_v11 }
 0x29b   : > { %6909 = vmatmul.mubr.bf16.gmra.mrb[8].mxu0 %v8899_v63 }
 0x29c   : > { %6912 = vmatprep.mubr.bf16.mxu0 %v8905_v14 }
 0x29d   : > { %6941 = vmatpush3.bf16.msra.mxu1 %v8019_v11 }
 0x29e   : > { %6942 = vmatprep.subr.bf16.mxu1 %v8020_v49 }
 0x2a1   : > { %6943 = vmatpush3.bf16.msra.mxu1 %v8020_v49 }
 0x2a2   : > { %6944 = vmatprep.subr.bf16.mxu1 %v8021_v0 }
 0x2a3   : > { %6913 = vmatmul.mubr.bf16.gmra.mrb[12].mxu0 %v8915_v24 }
 0x2a4   : > { %6916 = vmatprep.mubr.bf16.mxu0 %v8921_v31 }
 0x2a5   : > { %6945 = vmatpush3.bf16.msra.mxu1 %v8021_v0 }
 0x2a6   : > { %6946 = vmatprep.subr.bf16.mxu1 %v8022_v46 }
 0x2a9   : > { %6947 = vmatpush3.bf16.msra.mxu1 %v8022_v46 }
 0x2aa   : > { %6980 = vmatprep.subr.bf16.mxu1 %v8988_v53 }
 0x2ab   : > { %6917 = vmatmul.mubr.bf16.gmra.mrb[16].mxu0 %v8931_v54 }
 0x2ac   : > { %6920 = vmatprep.mubr.bf16.mxu0 %v8937_v38 }
 0x2b3   : > { %6921 = vmatmul.mubr.bf16.gmra.mrb[20].mxu0 %v2024_v39 }
 0x2b4   : > { %6924 = vmatprep.mubr.bf16.mxu0 %v2025_v51 }
 0x2bb   : > { %6925 = vmatmul.mubr.bf16.gmra.mrb[24].mxu0 %v2026_v27 }
 0x2bc   : > { %6928 = vmatprep.mubr.bf16.mxu0 %v2027_v10 }
 0x2c3   : > { %6929 = vmatmul.mubr.bf16.gmra.mrb[28].mxu0 %v2028_v55 }
 0x35e   : > { %v8990_v30 = vpop.f32.mrb[0].mxu0 }
 0x35f   : > { %v8992_v22 = vpop.f32.mrb[1].mxu0  ;;  %v2839_v6 = vmul.f32 %v8990_v30, %v8990_v30 }
 0x360   : > { %v8995_v12 = vpop.f32.mrb[2].mxu0  ;;  %v2837_v7 = vmul.f32 %v8992_v22, %v8992_v22 }
 0x361   : > { %v8997_v2 = vpop.f32.mrb[3].mxu0  ;;  %v2840_v13 = vmul.f32 %v8995_v12, %v8995_v12 }
 0x362   : > { %v2800_v43 = vadd.f32 %v8997_v2, %v8992_v22  ;;  %v2838_v20 = vmul.f32 %v8997_v2, %v8997_v2 }
 0x364   : > { %v2801_v44 = vadd.f32 %v8990_v30, %v2800_v43  ;;  %v2869_v63 = vadd.f32 %v2838_v20, %v2837_v7 }
 0x366   : > { %v2870_v14 = vadd.f32 %v2869_v63, %v2839_v6  ;;  %v9010_v59 = vpop.f32.mrb[4].mxu0  ;;  %v2802_v62 = vadd.f32 %v8995_v12, %v2801_v44 }
 0x367   : > { %v9013_v4 = vpop.f32.mrb[5].mxu0  ;;  %v2843_v19 = vmul.f32 %v9010_v59, %v9010_v59 }
 0x368   : > { %v2803_v42 = vadd.f32 %v2802_v62, %v9013_v4  ;;  %v2841_v16 = vmul.f32 %v9013_v4, %v9013_v4  ;;  %v2871_v17 = vadd.f32 %v2870_v14, %v2840_v13  ;;  %v9018_v24 = vpop.f32.mrb[6].mxu0 }
 0x369   : > { %v9020_v18 = vpop.f32.mrb[7].mxu0  ;;  %v2844_v54 = vmul.f32 %v9018_v24, %v9018_v24 }
 0x36a   : > { %v2872_v29 = vadd.f32 %v2871_v17, %v2841_v16  ;;  %v2804_v31 = vadd.f32 %v2803_v42, %v9020_v18  ;;  %v2842_v32 = vmul.f32 %v9020_v18, %v9020_v18 }
 0x36c   : > { %v2805_v45 = vadd.f32 %v9010_v59, %v2804_v31  ;;  %v2873_v25 = vadd.f32 %v2872_v29, %v2842_v32 }
 0x36e   : > { %v2874_v60 = vadd.f32 %v2873_v25, %v2843_v19  ;;  %v9030_v38 = vpop.f32.mrb[8].mxu0  ;;  %v2806_v1 = vadd.f32 %v9018_v24, %v2805_v45 }
 0x36f   : > { %v9033_v48 = vpop.f32.mrb[9].mxu0  ;;  %v2847_v27 = vmul.f32 %v9030_v38, %v9030_v38 }
 0x370   : > { %v2807_v33 = vadd.f32 %v2806_v1, %v9033_v48  ;;  %v2845_v5 = vmul.f32 %v9033_v48, %v9033_v48  ;;  %v2875_v39 = vadd.f32 %v2874_v60, %v2844_v54  ;;  %v9038_v40 = vpop.f32.mrb[10].mxu0 }
 0x371   : > { %v9040_v52 = vpop.f32.mrb[11].mxu0  ;;  %v2848_v21 = vmul.f32 %v9038_v40, %v9038_v40 }
 0x372   : > { %v2876_v51 = vadd.f32 %v2875_v39, %v2845_v5  ;;  %v2808_v8 = vadd.f32 %v2807_v33, %v9040_v52  ;;  %v2846_v9 = vmul.f32 %v9040_v52, %v9040_v52 }
 0x374   : > { %v2809_v58 = vadd.f32 %v9030_v38, %v2808_v8  ;;  %v2877_v57 = vadd.f32 %v2876_v51, %v2846_v9 }
 0x376   : > { %v2878_v61 = vadd.f32 %v2877_v57, %v2847_v27  ;;  %v9050_v34 = vpop.f32.mrb[12].mxu0  ;;  %v2810_v37 = vadd.f32 %v9038_v40, %v2809_v58 }
 0x377   : > { %v9053_v56 = vpop.f32.mrb[13].mxu0  ;;  %v2851_v23 = vmul.f32 %v9050_v34, %v9050_v34 }
 0x378   : > { %v2811_v28 = vadd.f32 %v2810_v37, %v9053_v56  ;;  %v2849_v3 = vmul.f32 %v9053_v56, %v9053_v56  ;;  %v2879_v10 = vadd.f32 %v2878_v61, %v2848_v21  ;;  %v9058_v36 = vpop.f32.mrb[14].mxu0 }
 0x379   : > { %v9060_v47 = vpop.f32.mrb[15].mxu0  ;;  %v2852_v49 = vmul.f32 %v9058_v36, %v9058_v36 }
 0x37a   : > { %v2880_v55 = vadd.f32 %v2879_v10, %v2849_v3  ;;  %v2812_v35 = vadd.f32 %v2811_v28, %v9060_v47  ;;  %v2850_v26 = vmul.f32 %v9060_v47, %v9060_v47 }
 0x37c   : > { %v2813_v41 = vadd.f32 %v9050_v34, %v2812_v35  ;;  %v2881_v11 = vadd.f32 %v2880_v55, %v2850_v26 }
 0x37e   : > { %v2882_v0 = vadd.f32 %v2881_v11, %v2851_v23  ;;  %v9070_v46 = vpop.f32.mrb[16].mxu0  ;;  %v2814_v7 = vadd.f32 %v9058_v36, %v2813_v41 }
 0x37f   : > { %v9073_v43 = vpop.f32.mrb[17].mxu0  ;;  %v2855_v16 = vmul.f32 %v9070_v46, %v9070_v46 }
 0x380   : > { %v2815_v20 = vadd.f32 %v2814_v7, %v9073_v43  ;;  %v2853_v6 = vmul.f32 %v9073_v43, %v9073_v43  ;;  %v2883_v44 = vadd.f32 %v2882_v0, %v2852_v49  ;;  %v9078_v63 = vpop.f32.mrb[18].mxu0 }
 0x381   : > { %v9080_v13 = vpop.f32.mrb[19].mxu0  ;;  %v2856_v31 = vmul.f32 %v9078_v63, %v9078_v63 }
 0x382   : > { %v2884_v14 = vadd.f32 %v2883_v44, %v2853_v6  ;;  %v2816_v62 = vadd.f32 %v2815_v20, %v9080_v13  ;;  %v2854_v42 = vmul.f32 %v9080_v13, %v9080_v13 }
 0x384   : > { %v2817_v17 = vadd.f32 %v9070_v46, %v2816_v62  ;;  %v2885_v29 = vadd.f32 %v2884_v14, %v2854_v42 }
 0x386   : > { %v2886_v32 = vadd.f32 %v2885_v29, %v2855_v16  ;;  %v9090_v19 = vpop.f32.mrb[20].mxu0  ;;  %v2818_v45 = vadd.f32 %v9078_v63, %v2817_v17 }
 0x387   : > { %v9093_v25 = vpop.f32.mrb[21].mxu0  ;;  %v2859_v9 = vmul.f32 %v9090_v19, %v9090_v19 }
 0x388   : > { %v2819_v54 = vadd.f32 %v2818_v45, %v9093_v25  ;;  %v2857_v60 = vmul.f32 %v9093_v25, %v9093_v25  ;;  %v2887_v1 = vadd.f32 %v2886_v32, %v2856_v31  ;;  %v9098_v33 = vpop.f32.mrb[22].mxu0 }
 0x389   : > { %v9100_v5 = vpop.f32.mrb[23].mxu0  ;;  %v2860_v57 = vmul.f32 %v9098_v33, %v9098_v33 }
 0x38a   : > { %v2888_v39 = vadd.f32 %v2887_v1, %v2857_v60  ;;  %v2820_v51 = vadd.f32 %v2819_v54, %v9100_v5  ;;  %v2858_v8 = vmul.f32 %v9100_v5, %v9100_v5 }
 0x38c   : > { %v2821_v27 = vadd.f32 %v9090_v19, %v2820_v51  ;;  %v2889_v58 = vadd.f32 %v2888_v39, %v2858_v8 }
 0x38e   : > { %v2890_v21 = vadd.f32 %v2889_v58, %v2859_v9  ;;  %v9110_v61 = vpop.f32.mrb[24].mxu0  ;;  %v2822_v37 = vadd.f32 %v9098_v33, %v2821_v27 }
 0x38f   : > { %v9113_v28 = vpop.f32.mrb[25].mxu0  ;;  %v2863_v49 = vmul.f32 %v9110_v61, %v9110_v61 }
 0x390   : > { %v2823_v3 = vadd.f32 %v2822_v37, %v9113_v28  ;;  %v2861_v10 = vmul.f32 %v9113_v28, %v9113_v28  ;;  %v2891_v55 = vadd.f32 %v2890_v21, %v2860_v57  ;;  %v9118_v35 = vpop.f32.mrb[26].mxu0 }
 0x391   : > { %v9120_v26 = vpop.f32.mrb[27].mxu0  ;;  %v2864_v20 = vmul.f32 %v9118_v35, %v9118_v35 }
 0x392   : > { %v2892_v23 = vadd.f32 %v2891_v55, %v2861_v10  ;;  %v2824_v41 = vadd.f32 %v2823_v3, %v9120_v26  ;;  %v2862_v11 = vmul.f32 %v9120_v26, %v9120_v26 }
 0x394   : > { %v2825_v0 = vadd.f32 %v9110_v61, %v2824_v41  ;;  %v2893_v7 = vadd.f32 %v2892_v23, %v2862_v11 }
 0x396   : > { %v2894_v6 = vadd.f32 %v2893_v7, %v2863_v49  ;;  %v9130_v44 = vpop.f32.mrb[28].mxu0  ;;  %v2826_v14 = vadd.f32 %v9118_v35, %v2825_v0 }
 0x397   : > { %v9133_v62 = vpop.f32.mrb[29].mxu0  ;;  %v2867_v60 = vmul.f32 %v9130_v44, %v9130_v44 }
 0x398   : > { %v2827_v42 = vadd.f32 %v2826_v14, %v9133_v62  ;;  %v2865_v16 = vmul.f32 %v9133_v62, %v9133_v62  ;;  %v2895_v17 = vadd.f32 %v2894_v6, %v2864_v20  ;;  %v9138_v29 = vpop.f32.mrb[30].mxu0 }
 0x399   : > { %v9140_v31 = vpop.f32.mrb[31].mxu0  ;;  %v2868_v51 = vmul.f32 %v9138_v29, %v9138_v29 }
 0x39a   : > { %v2896_v32 = vadd.f32 %v2895_v17, %v2865_v16  ;;  %v2828_v45 = vadd.f32 %v2827_v42, %v9140_v31  ;;  %v2866_v54 = vmul.f32 %v9140_v31, %v9140_v31 }
 0x39c   : > { %v2829_v1 = vadd.f32 %v9130_v44, %v2828_v45  ;;  %v2897_v39 = vadd.f32 %v2896_v32, %v2866_v54 }
 0x39e   : > { %v2830_v8 = vadd.f32 %v9138_v29, %v2829_v1  ;;  %v2898_v9 = vadd.f32 %v2897_v39, %v2867_v60 }
 0x3a0   : > { %v2831_v27 = vrot.slane %v2830_v8, 4  ;;  %v2899_v58 = vadd.f32 %v2898_v9, %v2868_v51 }
 0x3a2   : > { %v2832_v57 = vadd.f32 %v2831_v27, %v2830_v8  ;;  %v2900_v21 = vrot.slane %v2899_v58, 4 }
 0x3a4   : > { %v2833_v37 = vrot.slane %v2832_v57, 2  ;;  %v2901_v3 = vadd.f32 %v2900_v21, %v2899_v58 }
 0x3a6   : > { %v2834_v10 = vadd.f32 %v2833_v37, %v2832_v57  ;;  %v2902_v55 = vrot.slane %v2901_v3, 2 }
 0x3a8   : > { %v2835_v23 = vrot.slane %v2834_v10, 1  ;;  %v2903_v41 = vadd.f32 %v2902_v55, %v2901_v3 }
 0x3aa   : > { %v2836_v11 = vadd.f32 %v2835_v23, %v2834_v10  ;;  %v2904_v49 = vrot.slane %v2903_v41, 1 }
 0x3ac   : > { %v2905_v0 = vadd.f32 %v2904_v49, %v2903_v41  ;;  %v9151_v7 = vmul.f32 0.00390625, %v2836_v11 }
 0x3ae   : > { %v2907_v20 = vmul.f32 0.00390625, %v2905_v0  ;;  %v2908_v6 = vmul.f32 %v9151_v7, %v9151_v7  ;;  %v2941_v14 = vsub.f32 %v9133_v62, %v9151_v7  ;;  %v2942_v42 = vsub.f32 %v9140_v31, %v9151_v7 }
 0x3af   : > { %v2913_v16 = vsub.f32 %v8992_v22, %v9151_v7  ;;  %v2914_v17 = vsub.f32 %v8997_v2, %v9151_v7  ;;  %v2915_v32 = vsub.f32 %v8990_v30, %v9151_v7  ;;  %v2916_v45 = vsub.f32 %v8995_v12, %v9151_v7 }
 0x3b0   : > { %v2909_v54 = vsub.f32 %v2907_v20, %v2908_v6  ;;  %v2917_v60 = vsub.f32 %v9013_v4, %v9151_v7  ;;  %v2918_v62 = vsub.f32 %v9020_v18, %v9151_v7  ;;  %v2919_v31 = vsub.f32 %v9010_v59, %v9151_v7 }
 0x3b1   : > { %v2920_v22 = vsub.f32 %v9018_v24, %v9151_v7  ;;  %v2921_v2 = vsub.f32 %v9033_v48, %v9151_v7  ;;  %v2922_v30 = vsub.f32 %v9040_v52, %v9151_v7  ;;  %v2923_v12 = vsub.f32 %v9030_v38, %v9151_v7 }
 0x3b2   : > { %v2910_v1 = vmax.f32 %v2909_v54, 0.0  ;;  %v2924_v4 = vsub.f32 %v9038_v40, %v9151_v7  ;;  %v2925_v18 = vsub.f32 %v9053_v56, %v9151_v7  ;;  %v2926_v59 = vsub.f32 %v9060_v47, %v9151_v7 }
 0x3b3   : > { %v2927_v24 = vsub.f32 %v9050_v34, %v9151_v7  ;;  %v2928_v48 = vsub.f32 %v9058_v36, %v9151_v7  ;;  %v2929_v52 = vsub.f32 %v9073_v43, %v9151_v7  ;;  %v2930_v38 = vsub.f32 %v9080_v13, %v9151_v7 }
 0x3b4   : > { %v2911_v39 = vadd.f32 1e-05, %v2910_v1  ;;  %v2931_v40 = vsub.f32 %v9070_v46, %v9151_v7  ;;  %v2932_v56 = vsub.f32 %v9078_v63, %v9151_v7  ;;  %v2933_v47 = vsub.f32 %v9093_v25, %v9151_v7 }
 0x3b5   : > { %v2934_v34 = vsub.f32 %v9100_v5, %v9151_v7  ;;  %v2935_v36 = vsub.f32 %v9090_v19, %v9151_v7  ;;  %v2936_v43 = vsub.f32 %v9098_v33, %v9151_v7  ;;  %v2937_v13 = vsub.f32 %v9113_v28, %v9151_v7 }
 0x3b6   : > { %8087 = vrsqrt.f32 %v2911_v39  ;;  %v2938_v46 = vsub.f32 %v9120_v26, %v9151_v7  ;;  %v2939_v63 = vsub.f32 %v9110_v61, %v9151_v7  ;;  %v2940_v25 = vsub.f32 %v9118_v35, %v9151_v7 }
 0x3b7   : > { %v2943_v5 = vsub.f32 %v9130_v44, %v9151_v7  ;;  %v2944_v19 = vsub.f32 %v9138_v29, %v9151_v7 }
 0x3c0   : > { %v8088_v33 = vpop.eup %8087 }
 0x3c1   : > { %v2973_v51 = vmul.f32 %v8088_v33, %v2941_v14  ;;  %v2974_v8 = vmul.f32 %v8088_v33, %v2942_v42  ;;  %v9219_v28 = vmul.f32 %v8088_v33, %v2913_v16  ;;  %v9221_v9 = vmul.f32 %v8088_v33, %v2914_v17 }
 0x3c2   : > { %v9223_v26 = vmul.f32 %v8088_v33, %v2915_v32  ;;  %v2948_v27 = vmul.f32 %v8088_v33, %v2916_v45  ;;  %v2949_v61 = vmul.f32 %v8088_v33, %v2917_v60  ;;  %v2950_v58 = vmul.f32 %v8088_v33, %v2918_v62 }
 0x3c3   : > { %v3005_v57 = vmax.f32 %v2973_v51, 0.0  ;;  %v3006_v35 = vmax.f32 %v2974_v8, 0.0  ;;  %v2951_v21 = vmul.f32 %v8088_v33, %v2919_v31  ;;  %v2952_v37 = vmul.f32 %v8088_v33, %v2920_v22 }
 0x3c4   : > { %v2953_v44 = vmul.f32 %v8088_v33, %v2921_v2  ;;  %v2954_v3 = vmul.f32 %v8088_v33, %v2922_v30  ;;  %v2955_v10 = vmul.f32 %v8088_v33, %v2923_v12  ;;  %v2956_v29 = vmul.f32 %v8088_v33, %v2924_v4 }
 0x3c5   : > { %v9225_v55 = vpack.c.bf16 %v3006_v35, %v3005_v57  ;;  %v2957_v23 = vmul.f32 %v8088_v33, %v2925_v18  ;;  %v2958_v41 = vmul.f32 %v8088_v33, %v2926_v59  ;;  %v2959_v11 = vmul.f32 %v8088_v33, %v2927_v24 }
 0x3c6   : > { %v2960_v49 = vmul.f32 %v8088_v33, %v2928_v48  ;;  %v2961_v0 = vmul.f32 %v8088_v33, %v2929_v52  ;;  %v2962_v7 = vmul.f32 %v8088_v33, %v2930_v38  ;;  %v2963_v20 = vmul.f32 %v8088_v33, %v2931_v40 }
 0x3c7   : > { %10165 = vst [vmem:[#allocation10_spill] sm:$0xff] %v9225_v55  ;;  %v2964_v6 = vmul.f32 %v8088_v33, %v2932_v56  ;;  %v2965_v14 = vmul.f32 %v8088_v33, %v2933_v47  ;;  %v2966_v42 = vmul.f32 %v8088_v33, %v2934_v34  ;;  %v2967_v16 = vmul.f32 %v8088_v33, %v2935_v36 }
 0x3c8   : > { %v2968_v17 = vmul.f32 %v8088_v33, %v2936_v43  ;;  %v2969_v32 = vmul.f32 %v8088_v33, %v2937_v13  ;;  %v2970_v45 = vmul.f32 %v8088_v33, %v2938_v46  ;;  %v2971_v54 = vmul.f32 %v8088_v33, %v2939_v63 }
 0x3c9   : > { %v2972_v60 = vmul.f32 %v8088_v33, %v2940_v25  ;;  %v2975_v62 = vmul.f32 %v8088_v33, %v2943_v5  ;;  %v2976_v31 = vmul.f32 %v8088_v33, %v2944_v19  ;;  %v2977_v22 = vmax.f32 %v9219_v28, 0.0 }
 0x3ca   : > { %v2978_v2 = vmax.f32 %v9221_v9, 0.0  ;;  %v2979_v30 = vmax.f32 %v9223_v26, 0.0  ;;  %v2980_v12 = vmax.f32 %v2948_v27, 0.0  ;;  %v2981_v1 = vmax.f32 %v2949_v61, 0.0 }
 0x3cb   : > { %v2982_v4 = vmax.f32 %v2950_v58, 0.0  ;;  %v2983_v18 = vmax.f32 %v2951_v21, 0.0  ;;  %v2984_v59 = vmax.f32 %v2952_v37, 0.0  ;;  %v2985_v24 = vmax.f32 %v2953_v44, 0.0 }
 0x3cc   : > { %v2986_v48 = vmax.f32 %v2954_v3, 0.0  ;;  %v2987_v52 = vmax.f32 %v2955_v10, 0.0  ;;  %v2988_v38 = vmax.f32 %v2956_v29, 0.0  ;;  %v2989_v39 = vmax.f32 %v2957_v23, 0.0 }
 0x3cd   : > { %v2990_v40 = vmax.f32 %v2958_v41, 0.0  ;;  %v2991_v56 = vmax.f32 %v2959_v11, 0.0  ;;  %v2992_v47 = vmax.f32 %v2960_v49, 0.0  ;;  %v2993_v34 = vmax.f32 %v2961_v0, 0.0 }
 0x3ce   : > { %v2994_v36 = vmax.f32 %v2962_v7, 0.0  ;;  %v2995_v43 = vmax.f32 %v2963_v20, 0.0  ;;  %v2996_v13 = vmax.f32 %v2964_v6, 0.0  ;;  %v2997_v46 = vmax.f32 %v2965_v14, 0.0 }
 0x3cf   : > { %v2998_v63 = vmax.f32 %v2966_v42, 0.0  ;;  %v2999_v25 = vmax.f32 %v2967_v16, 0.0  ;;  %v3000_v5 = vmax.f32 %v2968_v17, 0.0  ;;  %v3001_v19 = vmax.f32 %v2969_v32, 0.0 }
 0x3d0   : > { %v3002_v33 = vmax.f32 %v2970_v45, 0.0  ;;  %v3003_v51 = vmax.f32 %v2971_v54, 0.0  ;;  %v3004_v8 = vmax.f32 %v2972_v60, 0.0  ;;  %v3007_v28 = vmax.f32 %v2975_v62, 0.0 }
 0x3d1   : > { %v3008_v9 = vmax.f32 %v2976_v31, 0.0  ;;  %v9230_v26 = vpack.c.bf16 %v2978_v2, %v2977_v22  ;;  %v9232_v27 = vpack.c.bf16 %v2980_v12, %v2979_v30  ;;  %v9234_v61 = vpack.c.bf16 %v2982_v4, %v2981_v1  ;;  %v8024_v1 = vld [vmem:[#allocation7 + $0x8] sm:$0xff]  }
 0x3d2   : > { %v9236_v58 = vpack.c.bf16 %v2984_v59, %v2983_v18  ;;  %v9238_v57 = vpack.c.bf16 %v2986_v48, %v2985_v24  ;;  %v9240_v35 = vpack.c.bf16 %v2988_v38, %v2987_v52  ;;  %v9242_v21 = vpack.c.bf16 %v2990_v40, %v2989_v39 }
 0x3d3   : > { %v9244_v37 = vpack.c.bf16 %v2992_v47, %v2991_v56  ;;  %v9246_v44 = vpack.c.bf16 %v2994_v36, %v2993_v34  ;;  %v9248_v3 = vpack.c.bf16 %v2996_v13, %v2995_v43  ;;  %v9250_v10 = vpack.c.bf16 %v2998_v63, %v2997_v46  ;;  %v8025_v56 = vld [vmem:[#allocation7 + $0x10] sm:$0xff]  }
 0x3d4   : > { %v9252_v29 = vpack.c.bf16 %v3000_v5, %v2999_v25  ;;  %v9254_v23 = vpack.c.bf16 %v3002_v33, %v3001_v19  ;;  %v9256_v41 = vpack.c.bf16 %v3004_v8, %v3003_v51  ;;  %v9258_v11 = vpack.c.bf16 %v3008_v9, %v3007_v28  ;;  %v8026_v25 = vld [vmem:[#allocation7 + $0x18] sm:$0xff]  }
 0x3d5   : > { %v3067_v49 = vshrl.u32 %v9230_v26, 16  ;;  %v9262_v0 = vshll.u32 %v9230_v26, 16  ;;  %v9265_v7 = vshrl.u32 %v9232_v27, 16  ;;  %v9268_v20 = vshrl.u32 %v9234_v61, 16 }
 0x3d6   : > { %10166 = vst [vmem:[#allocation13_spill] sm:$0xff] %v9254_v23  ;;  %10167 = vst [vmem:[#allocation11_spill] sm:$0xff] %v9256_v41  ;;  %v9273_v16 = vshll.u32 %v9232_v27, 16  ;;  %v9277_v32 = vshll.u32 %v9234_v61, 16  ;;  %v9280_v45 = vshrl.u32 %v9236_v58, 16  ;;  %v9283_v54 = vshrl.u32 %v9238_v57, 16 }
 0x3d7   : > { %v3139_v6 = vrot.slane %v3067_v49, 7  ;;  %v4723_v14 = vrot.slane %v9262_v0, 1  ;;  %v3135_v42 = vrot.slane %v9265_v7, 7  ;;  %v3147_v17 = vrot.slane %v9268_v20, 7 }
 0x3d8   : > { %v9288_v22 = vshrl.u32 %v9240_v35, 16  ;;  %v9301_v4 = vshrl.u32 %v9242_v21, 16  ;;  %v3151_v18 = vrot.slane %v9280_v45, 7  ;;  %v3155_v59 = vrot.slane %v9283_v54, 7 }
 0x3d9   : > { %v3142_v60 = vor.u32 %v9262_v0, %v3139_v6  ;;  %v4724_v62 = vor.u32 %v4723_v14, %v3067_v49  ;;  %v3138_v31 = vor.u32 %v9273_v16, %v3135_v42  ;;  %v3150_v2 = vor.u32 %v9277_v32, %v3147_v17 }
 0x3da   : > { %v3159_v48 = vrot.slane %v9288_v22, 7  ;;  %v9316_v52 = vshll.u32 %v9236_v58, 16  ;;  %v9319_v38 = vshll.u32 %v9238_v57, 16  ;;  %v3163_v39 = vrot.slane %v9301_v4, 7 }
 0x3db   : > { %v9293_v30 = vsel %vm8450_vm2, %v3067_v49, %v3142_v60  ;;  %v9298_v12 = vsel %vm8450_vm2, %v9265_v7, %v3138_v31  ;;  %v9310_v24 = vsel %vm8450_vm2, %v9268_v20, %v3150_v2  ;;  %v9323_v40 = vshll.u32 %v9240_v35, 16  ;;  %v8027_v2 = vld [vmem:[#allocation7 + $0x20] sm:$0xff]  }
 0x3dc   : > { %6948 = vmatprep.mubr.bf16.mxu1 %v9293_v30  ;;  %v9326_v47 = vshrl.u32 %v9244_v37, 16  ;;  %v9329_v34 = vshrl.u32 %v9246_v44, 16  ;;  %v3158_v36 = vor.u32 %v9319_v38, %v3155_v59  ;;  %v9334_v43 = vshll.u32 %v9242_v21, 16 }
 0x3dd   : > { %6949 = vmatmul.mubr.bf16.vlgmr.msra.gmra.mrb[0].mxu1 %v9298_v12  ;;  %v3162_v13 = vor.u32 %v9323_v40, %v3159_v48  ;;  %v9351_v51 = vshll.u32 %v9244_v37, 16  ;;  %v3172_v28 = vshll.u32 %v9246_v44, 16  ;;  %v9361_v9 = vshrl.u32 %v9248_v3, 16 }
 0x3de   : > { %6952 = vmatprep.mubr.bf16.mxu1 %v9310_v24  ;;  %6981 = vmatpush3.bf16.msra.mxu1 %v8988_v53  ;;  %v3154_v53 = vor.u32 %v9316_v52, %v3151_v18  ;;  %v3166_v46 = vor.u32 %v9334_v43, %v3163_v39  ;;  %v3167_v63 = vrot.slane %v9326_v47, 7  ;;  %v3171_v5 = vrot.slane %v9329_v34, 7 }
 0x3df   : > { %6982 = vmatprep.subr.bf16.mxu1 %v8024_v1  ;;  %v9348_v33 = vsel %vm8450_vm2, %v9283_v54, %v3158_v36  ;;  %v9357_v8 = vsel %vm8450_vm2, %v9288_v22, %v3162_v13  ;;  %v9364_v49 = vshll.u32 %v9248_v3, 16  ;;  %v9373_v14 = vshrl.u32 %v9250_v10, 16 }
 0x3e0   : > { %v9343_v19 = vsel %vm8450_vm2, %v9280_v45, %v3154_v53  ;;  %v9370_v6 = vsel %vm8450_vm2, %v9301_v4, %v3166_v46  ;;  %v9376_v42 = vshll.u32 %v9250_v10, 16  ;;  %v9379_v17 = vshrl.u32 %v9252_v29, 16 }
 0x3e1   : > { %v9382_v60 = vor.u32 %v9351_v51, %v3167_v63  ;;  %v9384_v31 = vor.u32 %v3172_v28, %v3171_v5  ;;  %v4721_v18 = vrot.slane %v9273_v16, 1  ;;  %v9391_v59 = vshrl.u32 %v9254_v23, 16 }
 0x3e2   : > { %6983 = vmatpush3.bf16.msra.mxu1 %v8024_v1  ;;  %v9387_v1 = vshll.u32 %v9252_v29, 16  ;;  %v9394_v48 = vshll.u32 %v9254_v23, 16  ;;  %v9399_v39 = vsel %vm8836_vm5, %v4724_v62, %v9262_v0  ;;  %v9403_v53 = vshrl.u32 %v9256_v41, 16 }
 0x3e3   : > { %6984 = vmatprep.subr.bf16.mxu1 %v8025_v56  ;;  %10168 = vst [vmem:[#allocation12_spill] sm:$0xff] %v9399_v39  ;;  %v9406_v36 = vshll.u32 %v9256_v41, 16  ;;  %v4722_v13 = vor.u32 %v4721_v18, %v9265_v7  ;;  %v4729_v46 = vrot.slane %v9316_v52, 1  ;;  %v9411_v63 = vshrl.u32 %v9225_v55, 16  ;;  %v8028_v39 = vld [vmem:[#allocation7 + $0x28] sm:$0xff]  }
 0x3e4   : > { %v4731_v0 = vrot.slane %v9319_v38, 1  ;;  %v4733_v62 = vrot.slane %v9323_v40, 1  ;;  %v9417_v23 = vshll.u32 %v9225_v55, 16  ;;  %v4735_v18 = vrot.slane %v9334_v43, 1 }
 0x3e5   : > { %6953 = vmatmul.mubr.bf16.gmra.mrb[4].mxu1 %v9343_v19  ;;  %v9422_v7 = vsel %vm8836_vm5, %v4722_v13, %v9273_v16  ;;  %v4737_v13 = vrot.slane %v9351_v51, 1 }
 0x3e6   : > { %6956 = vmatprep.mubr.bf16.mxu1 %v9348_v33  ;;  %6985 = vmatpush3.bf16.msra.mxu1 %v8025_v56  ;;  %v4727_v56 = vrot.slane %v9277_v32, 1  ;;  %v4732_v55 = vor.u32 %v4731_v0, %v9283_v54  ;;  %v4734_v41 = vor.u32 %v4733_v62, %v9288_v22  ;;  %v4741_v22 = vrot.slane %v9364_v49, 1 }
 0x3e7   : > { %6986 = vmatprep.subr.bf16.mxu1 %v8026_v25  ;;  %v4747_v0 = vrot.slane %v9394_v48, 1  ;;  %v4749_v62 = vrot.slane %v9406_v36, 1 }
 0x3e8   : > { %v4728_v5 = vor.u32 %v4727_v56, %v9268_v20  ;;  %v9427_v20 = vshll.u32 %v9258_v11, 16  ;;  %v9453_v54 = vsel %vm8836_vm5, %v4734_v41, %v9323_v40  ;;  %v4742_v41 = vor.u32 %v4741_v22, %v9361_v9 }
 0x3e9   : > { %v3112_v22 = vshrl.u32 %v9258_v11, 16 }
 0x3ea   : > { %6987 = vmatpush3.bf16.msra.mxu1 %v8026_v25  ;;  %v4730_v25 = vor.u32 %v4729_v46, %v9280_v45  ;;  %v9432_v56 = vsel %vm8836_vm5, %v4728_v5, %v9277_v32  ;;  %v4736_v45 = vor.u32 %v4735_v18, %v9301_v4  ;;  %v4739_v46 = vrot.slane %v3172_v28, 1 }
 0x3eb   : > { %6988 = vmatprep.subr.bf16.mxu1 %v8027_v2  ;;  %v9448_v32 = vsel %vm8836_vm5, %v4732_v55, %v9319_v38  ;;  %v4743_v4 = vrot.slane %v9376_v42, 1  ;;  %v4738_v5 = vor.u32 %v4737_v13, %v9326_v47  ;;  %v4745_v38 = vrot.slane %v9387_v1, 1 }
 0x3ec   : > { %v9440_v16 = vsel %vm8836_vm5, %v4730_v25, %v9316_v52  ;;  %v8029_v52 = vld [vmem:[#allocation7 + $0x30] sm:$0xff]   ;;  %v4740_v55 = vor.u32 %v4739_v46, %v9329_v34  ;;  %v9483_v13 = vsel %vm8836_vm5, %v4742_v41, %v9364_v49  ;;  %v3175_v41 = vrot.slane %v9361_v9, 7 }
 0x3ed   : > { %6957 = vmatmul.mubr.bf16.gmra.mrb[8].mxu1 %v9357_v8  ;;  %v4744_v40 = vor.u32 %v4743_v4, %v9373_v14  ;;  %v9472_v25 = vsel %vm8836_vm5, %v4738_v5, %v9351_v51  ;;  %v4746_v18 = vor.u32 %v4745_v38, %v9379_v17  ;;  %v4748_v51 = vor.u32 %v4747_v0, %v9391_v59  ;;  %v8030_v4 = vld [vmem:[#allocation7 + $0x38] sm:$0xff]  }
 0x3ee   : > { %6960 = vmatprep.mubr.bf16.mxu1 %v9370_v6  ;;  %6989 = vmatpush3.bf16.msra.mxu1 %v8027_v2  ;;  %v9460_v2 = vsel %vm8836_vm5, %v4736_v45, %v9334_v43  ;;  %v9476_v43 = vsel %vm8836_vm5, %v4740_v55, %v3172_v28  ;;  %v4751_v45 = vrot.slane %v9417_v23, 1  ;;  %v4750_v28 = vor.u32 %v4749_v62, %v9403_v53 }
 0x3ef   : > { %6990 = vmatprep.subr.bf16.mxu1 %v8028_v39  ;;  %v9488_v46 = vsel %vm8836_vm5, %v4744_v40, %v9376_v42  ;;  %v4753_v55 = vrot.slane %v9427_v20, 1  ;;  %v9504_v38 = vsel %vm8450_vm2, %v9326_v47, %v9382_v60  ;;  %v9510_v40 = vsel %vm8836_vm5, %v4748_v51, %v9394_v48 }
 0x3f0   : > { %v4752_v5 = vor.u32 %v4751_v45, %v9411_v63  ;;  %v9515_v0 = vsel %vm8836_vm5, %v4750_v28, %v9406_v36  ;;  %v9522_v47 = vsel %vm8450_vm2, %v9329_v34, %v9384_v31  ;;  %v3179_v60 = vrot.slane %v9373_v14, 7  ;;  %v8031_v45 = vld [vmem:[#allocation7 + $0x80] sm:$0xff]  }
 0x3f1   : > { %v3178_v34 = vor.u32 %v9364_v49, %v3175_v41  ;;  %v3187_v49 = vrot.slane %v9391_v59, 7  ;;  %v3199_v41 = vrot.slane %v3112_v22, 7 }
 0x3f2   : > { %6991 = vmatpush3.bf16.msra.mxu1 %v8028_v39  ;;  %v9496_v39 = vsel %vm8836_vm5, %v4746_v18, %v9387_v1  ;;  %v9528_v62 = vsel %vm8836_vm5, %v4752_v5, %v9417_v23  ;;  %v4754_v18 = vor.u32 %v4753_v55, %v3112_v22  ;;  %v3182_v31 = vor.u32 %v9376_v42, %v3179_v60 }
 0x3f3   : > { %6992 = vmatprep.subr.bf16.mxu1 %v8029_v52  ;;  %v9541_v28 = vsel %vm8450_vm2, %v9361_v9, %v3178_v34  ;;  %v3191_v5 = vrot.slane %v9403_v53, 7  ;;  %v3195_v55 = vrot.slane %v9411_v63, 7  ;;  %v3202_v60 = vor.u32 %v9427_v20, %v3199_v41  ;;  %v8041_v34 = vld [vmem:[#allocation7 + $0xd0] sm:$0xff]   ;;  %v8062_v41 = vld [vmem:[#allocation7 + $0x178] sm:$0xff]  }
 0x3f4   : > { %v9534_v51 = vsel %vm8836_vm5, %v4754_v18, %v9427_v20  ;;  %v9548_v50 = vsel %vm8450_vm2, %v9373_v14, %v3182_v31  ;;  %v8036_v20 = vld [vmem:[#allocation7 + $0xa8] sm:$0xff]   ;;  %v8039_v18 = vld [vmem:[#allocation7 + $0xc0] sm:$0xff]   ;;  %v8042_v31 = vld [vmem:[#allocation7 + $0xd8] sm:$0xff]  }
 0x3f5   : > { %6961 = vmatmul.mubr.bf16.gmra.mrb[12].mxu1 %v9504_v38 }
 0x3f6   : > { %6964 = vmatprep.mubr.bf16.mxu1 %v9522_v47  ;;  %6993 = vmatpush3.bf16.msra.mxu1 %v8029_v52  ;;  %v3183_v52 = vrot.slane %v9379_v17, 7 }
 0x3f7   : > { %6994 = vmatprep.subr.bf16.mxu1 %v8030_v4 }
 0x3f8   : > { %v3186_v42 = vor.u32 %v9387_v1, %v3183_v52  ;;  %v3194_v1 = vor.u32 %v9406_v36, %v3191_v5  ;;  %v8033_v36 = vld [vmem:[#allocation7 + $0x90] sm:$0xff]   ;;  %v8043_v52 = vld [vmem:[#allocation7 + $0xe0] sm:$0xff]  }
 0x3f9   : > { %v10171_v5 = vld [vmem:[#allocation10_spill] sm:$0xff] }
 0x3fa   : > { %6995 = vmatpush3.bf16.msra.mxu1 %v8030_v4  ;;  %v3190_v4 = vor.u32 %v9394_v48, %v3187_v49  ;;  %v9557_v9 = vsel %vm8450_vm2, %v9379_v17, %v3186_v42  ;;  %v3198_v48 = vor.u32 %v9417_v23, %v3195_v55  ;;  %v9573_v17 = vsel %vm8450_vm2, %v9403_v53, %v3194_v1  ;;  %v8032_v53 = vld [vmem:[#allocation7 + $0x88] sm:$0xff]   ;;  %v8054_v49 = vld [vmem:[#allocation7 + $0x138] sm:$0xff]   ;;  %v8055_v42 = vld [vmem:[#allocation7 + $0x140] sm:$0xff]  }
 0x3fb   : > { %7028 = vmatprep.subr.bf16.mxu1 %v8031_v45  ;;  %v9585_v23 = vsel %vm8450_vm2, %v3112_v22, %v3202_v60  ;;  %v8038_v22 = vld [vmem:[#allocation7 + $0xb8] sm:$0xff]   ;;  %v8057_v55 = vld [vmem:[#allocation7 + $0x150] sm:$0xff]   ;;  %v8064_v60 = vld [vmem:[#allocation7 + $0x188] sm:$0xff]  }
 0x3fc   : > { %v9564_v14 = vsel %vm8450_vm2, %v9391_v59, %v3190_v4  ;;  %v9579_v59 = vsel %vm8450_vm2, %v9411_v63, %v3198_v48  ;;  %v8034_v63 = vld [vmem:[#allocation7 + $0x98] sm:$0xff]   ;;  %v8059_v48 = vld [vmem:[#allocation7 + $0x160] sm:$0xff]  }
 0x3fd   : > { %6965 = vmatmul.mubr.bf16.gmra.mrb[16].mxu1 %v9541_v28  ;;  %v10169_v4 = vld [vmem:[#allocation13_spill] sm:$0xff] }
 0x3fe   : > { %6968 = vmatprep.mubr.bf16.mxu1 %v9548_v50  ;;  %v8058_v1 = vld [vmem:[#allocation7 + $0x158] sm:$0xff]  }
 0x405   : > { %6969 = vmatmul.mubr.bf16.gmra.mrb[20].mxu1 %v9557_v9 }
 0x406   : > { %6972 = vmatprep.mubr.bf16.mxu1 %v9564_v14 }
 0x40d   : > { %6973 = vmatmul.mubr.bf16.gmra.mrb[24].mxu1 %v9573_v17 }
 0x40e   : > { %6976 = vmatprep.mubr.bf16.mxu1 %v9579_v59 }
 0x415   : > { %6977 = vmatmul.mubr.bf16.gmra.mrb[28].mxu1 %v9585_v23 }
 0x416   : > { %6996 = vmatprep.mubr.bf16.mxu1 %v9298_v12 }
 0x41d   : > { %6997 = vmatmul.mubr.bf16.vlgmr.msra.gmra.mrb[0].mxu1 %v9293_v30  ;;  %v8037_v30 = vld [vmem:[#allocation7 + $0xb0] sm:$0xff]  }
 0x41e   : > { %7000 = vmatprep.mubr.bf16.mxu1 %v9298_v12  ;;  %7029 = vmatpush3.bf16.msra.mxu1 %v8031_v45  ;;  %v8040_v45 = vld [vmem:[#allocation7 + $0xc8] sm:$0xff]  }
 0x41f   : > { %7030 = vmatprep.subr.bf16.mxu1 %v8032_v53 }
 0x422   : > { %7031 = vmatpush3.bf16.msra.mxu1 %v8032_v53  ;;  %v8066_v53 = vld [vmem:[#allocation7 + $0x198] sm:$0xff]  }
 0x423   : > { %7032 = vmatprep.subr.bf16.mxu1 %v8033_v36 }
 0x425   : > { %7001 = vmatmul.mubr.bf16.gmra.mrb[4].mxu1 %v9310_v24 }
 0x426   : > { %7004 = vmatprep.mubr.bf16.mxu1 %v9343_v19  ;;  %7033 = vmatpush3.bf16.msra.mxu1 %v8033_v36  ;;  %v8067_v36 = vld [vmem:[#allocation7 + $0x1a0] sm:$0xff]  }
 0x427   : > { %7034 = vmatprep.subr.bf16.mxu1 %v8034_v63 }
 0x42a   : > { %7035 = vmatpush3.bf16.msra.mxu1 %v8034_v63  ;;  %v8079_v63 = vld [vmem:[#allocation7 + $0x200] sm:$0xff]  }
 0x42b   : > { %7036 = vmatprep.subr.bf16.mxu1 %v8035_v15 }
 0x42d   : > { %7005 = vmatmul.mubr.bf16.gmra.mrb[8].mxu1 %v9348_v33 }
 0x42e   : > { %7008 = vmatprep.mubr.bf16.mxu1 %v9357_v8  ;;  %7037 = vmatpush3.bf16.msra.mxu1 %v8035_v15  ;;  %v8080_v15 = vld [vmem:[#allocation7 + $0x208] sm:$0xff]  }
 0x42f   : > { %7038 = vmatprep.subr.bf16.mxu1 %v8036_v20 }
 0x432   : > { %7039 = vmatpush3.bf16.msra.mxu1 %v8036_v20  ;;  %v8081_v20 = vld [vmem:[#allocation7 + $0x210] sm:$0xff]  }
 0x433   : > { %7040 = vmatprep.subr.bf16.mxu1 %v8037_v30 }
 0x435   : > { %7009 = vmatmul.mubr.bf16.gmra.mrb[12].mxu1 %v9370_v6 }
 0x436   : > { %7012 = vmatprep.mubr.bf16.mxu1 %v9504_v38  ;;  %7041 = vmatpush3.bf16.msra.mxu1 %v8037_v30  ;;  %v8082_v30 = vld [vmem:[#allocation7 + $0x218] sm:$0xff]  }
 0x437   : > { %7042 = vmatprep.subr.bf16.mxu1 %v8038_v22 }
 0x43a   : > { %7043 = vmatpush3.bf16.msra.mxu1 %v8038_v22  ;;  %v8083_v22 = vld [vmem:[#allocation7 + $0x220] sm:$0xff]  }
 0x43b   : > { %7076 = vmatprep.subr.bf16.mxu1 %v8039_v18 }
 0x43d   : > { %7013 = vmatmul.mubr.bf16.gmra.mrb[16].mxu1 %v9522_v47 }
 0x43e   : > { %7016 = vmatprep.mubr.bf16.mxu1 %v9541_v28 }
 0x445   : > { %7017 = vmatmul.mubr.bf16.gmra.mrb[20].mxu1 %v9548_v50 }
 0x446   : > { %7020 = vmatprep.mubr.bf16.mxu1 %v9557_v9 }
 0x44d   : > { %7021 = vmatmul.mubr.bf16.gmra.mrb[24].mxu1 %v9564_v14 }
 0x44e   : > { %7024 = vmatprep.mubr.bf16.mxu1 %v9573_v17 }
 0x455   : > { %7025 = vmatmul.mubr.bf16.gmra.mrb[28].mxu1 %v9579_v59 }
 0x456   : > { %7044 = vmatprep.mubr.bf16.mxu1 %v9298_v12  ;;  %v8044_v12 = vld [vmem:[#allocation7 + $0xe8] sm:$0xff]  }
 0x45d   : > { %7045 = vmatmul.mubr.bf16.vlgmr.msra.gmra.mrb[0].mxu1 %v9310_v24  ;;  %v8045_v24 = vld [vmem:[#allocation7 + $0xf0] sm:$0xff]  }
 0x45e   : > { %7048 = vmatprep.mubr.bf16.mxu1 %v9343_v19  ;;  %7077 = vmatpush3.bf16.msra.mxu1 %v8039_v18  ;;  %v8046_v19 = vld [vmem:[#allocation7 + $0xf8] sm:$0xff]   ;;  %v8084_v18 = vld [vmem:[#allocation7 + $0x228] sm:$0xff]  }
 0x45f   : > { %7078 = vmatprep.subr.bf16.mxu1 %v8040_v45 }
 0x462   : > { %7079 = vmatpush3.bf16.msra.mxu1 %v8040_v45  ;;  %v8085_v45 = vld [vmem:[#allocation7 + $0x230] sm:$0xff]  }
 0x463   : > { %7080 = vmatprep.subr.bf16.mxu1 %v8041_v34 }
 0x465   : > { %7049 = vmatmul.mubr.bf16.gmra.mrb[4].mxu1 %v9348_v33  ;;  %v8047_v33 = vld [vmem:[#allocation7 + $0x100] sm:$0xff]  }
 0x466   : > { %7052 = vmatprep.mubr.bf16.mxu1 %v9357_v8  ;;  %7081 = vmatpush3.bf16.msra.mxu1 %v8041_v34  ;;  %v8048_v8 = vld [vmem:[#allocation7 + $0x108] sm:$0xff]   ;;  %v8086_v34 = vld [vmem:[#allocation7 + $0x238] sm:$0xff]  }
 0x467   : > { %7082 = vmatprep.subr.bf16.mxu1 %v8042_v31 }
 0x46a   : > { %7083 = vmatpush3.bf16.msra.mxu1 %v8042_v31 }
 0x46b   : > { %7084 = vmatprep.subr.bf16.mxu1 %v8043_v52 }
 0x46d   : > { %7053 = vmatmul.mubr.bf16.gmra.mrb[8].mxu1 %v9370_v6  ;;  %v8049_v6 = vld [vmem:[#allocation7 + $0x110] sm:$0xff]  }
 0x46e   : > { %7056 = vmatprep.mubr.bf16.mxu1 %v9504_v38  ;;  %7085 = vmatpush3.bf16.msra.mxu1 %v8043_v52  ;;  %v8050_v38 = vld [vmem:[#allocation7 + $0x118] sm:$0xff]  }
 0x46f   : > { %7086 = vmatprep.subr.bf16.mxu1 %v8044_v12 }
 0x472   : > { %7087 = vmatpush3.bf16.msra.mxu1 %v8044_v12 }
 0x473   : > { %7088 = vmatprep.subr.bf16.mxu1 %v8045_v24 }
 0x475   : > { %7057 = vmatmul.mubr.bf16.gmra.mrb[12].mxu1 %v9522_v47  ;;  %v8051_v47 = vld [vmem:[#allocation7 + $0x120] sm:$0xff]  }
 0x476   : > { %7060 = vmatprep.mubr.bf16.mxu1 %v9541_v28  ;;  %7089 = vmatpush3.bf16.msra.mxu1 %v8045_v24  ;;  %v8052_v28 = vld [vmem:[#allocation7 + $0x128] sm:$0xff]  }
 0x477   : > { %7090 = vmatprep.subr.bf16.mxu1 %v8046_v19 }
 0x47a   : > { %7091 = vmatpush3.bf16.msra.mxu1 %v8046_v19 }
 0x47b   : > { %7124 = vmatprep.subr.bf16.mxu1 %v8047_v33 }
 0x47d   : > { %7061 = vmatmul.mubr.bf16.gmra.mrb[16].mxu1 %v9548_v50  ;;  %v8053_v50 = vld [vmem:[#allocation7 + $0x130] sm:$0xff]  }
 0x47e   : > { %7064 = vmatprep.mubr.bf16.mxu1 %v9557_v9  ;;  %v10170_v9 = vld [vmem:[#allocation11_spill] sm:$0xff] }
 0x485   : > { %7065 = vmatmul.mubr.bf16.gmra.mrb[20].mxu1 %v9564_v14  ;;  %v8056_v14 = vld [vmem:[#allocation7 + $0x148] sm:$0xff]  }
 0x486   : > { %7068 = vmatprep.mubr.bf16.mxu1 %v9573_v17  ;;  %v8061_v17 = vld [vmem:[#allocation7 + $0x170] sm:$0xff]  }
 0x48d   : > { %7069 = vmatmul.mubr.bf16.gmra.mrb[24].mxu1 %v9579_v59 }
 0x48e   : > { %7072 = vmatprep.mubr.bf16.mxu1 %v9585_v23  ;;  %v8065_v23 = vld [vmem:[#allocation7 + $0x190] sm:$0xff]  }
 0x495   : > { %7073 = vmatmul.mubr.bf16.gmra.mrb[28].mxu1 %v9579_v59  ;;  %v8063_v59 = vld [vmem:[#allocation7 + $0x180] sm:$0xff]  }
 0x496   : > { %7092 = vmatprep.mubr.bf16.mxu1 %v9232_v27 }
 0x49d   : > { %7093 = vmatmul.mubr.bf16.vlgmr.msra.gmra.mrb[0].mxu1 %v9230_v26 }
 0x49e   : > { %7096 = vmatprep.mubr.bf16.mxu1 %v9232_v27  ;;  %7125 = vmatpush3.bf16.msra.mxu1 %v8047_v33 }
 0x49f   : > { %7126 = vmatprep.subr.bf16.mxu1 %v8048_v8 }
 0x4a2   : > { %7127 = vmatpush3.bf16.msra.mxu1 %v8048_v8 }
 0x4a3   : > { %7128 = vmatprep.subr.bf16.mxu1 %v8049_v6 }
 0x4a5   : > { %7097 = vmatmul.mubr.bf16.gmra.mrb[4].mxu1 %v9234_v61 }
 0x4a6   : > { %7100 = vmatprep.mubr.bf16.mxu1 %v9236_v58  ;;  %7129 = vmatpush3.bf16.msra.mxu1 %v8049_v6 }
 0x4a7   : > { %7130 = vmatprep.subr.bf16.mxu1 %v8050_v38 }
 0x4aa   : > { %7131 = vmatpush3.bf16.msra.mxu1 %v8050_v38 }
 0x4ab   : > { %7132 = vmatprep.subr.bf16.mxu1 %v8051_v47 }
 0x4ad   : > { %7101 = vmatmul.mubr.bf16.gmra.mrb[8].mxu1 %v9238_v57 }
 0x4ae   : > { %7104 = vmatprep.mubr.bf16.mxu1 %v9240_v35  ;;  %7133 = vmatpush3.bf16.msra.mxu1 %v8051_v47 }
 0x4af   : > { %7134 = vmatprep.subr.bf16.mxu1 %v8052_v28 }
 0x4b2   : > { %7135 = vmatpush3.bf16.msra.mxu1 %v8052_v28 }
 0x4b3   : > { %7136 = vmatprep.subr.bf16.mxu1 %v8053_v50 }
 0x4b5   : > { %7105 = vmatmul.mubr.bf16.gmra.mrb[12].mxu1 %v9242_v21 }
 0x4b6   : > { %7108 = vmatprep.mubr.bf16.mxu1 %v9244_v37  ;;  %7137 = vmatpush3.bf16.msra.mxu1 %v8053_v50 }
 0x4b7   : > { %7138 = vmatprep.subr.bf16.mxu1 %v8054_v49 }
 0x4ba   : > { %7139 = vmatpush3.bf16.msra.mxu1 %v8054_v49 }
 0x4bb   : > { %7172 = vmatprep.subr.bf16.mxu1 %v8055_v42 }
 0x4bd   : > { %7109 = vmatmul.mubr.bf16.gmra.mrb[16].mxu1 %v9246_v44 }
 0x4be   : > { %7112 = vmatprep.mubr.bf16.mxu1 %v9248_v3 }
 0x4c5   : > { %7113 = vmatmul.mubr.bf16.gmra.mrb[20].mxu1 %v9250_v10 }
 0x4c6   : > { %7116 = vmatprep.mubr.bf16.mxu1 %v9252_v29 }
 0x4cd   : > { %7117 = vmatmul.mubr.bf16.gmra.mrb[24].mxu1 %v10169_v4 }
 0x4ce   : > { %7120 = vmatprep.mubr.bf16.mxu1 %v10170_v9 }
 0x4d5   : > { %7121 = vmatmul.mubr.bf16.gmra.mrb[28].mxu1 %v10171_v5 }
 0x4d6   : > { %7140 = vmatprep.mubr.bf16.mxu1 %v9230_v26  ;;  %v8060_v26 = vld [vmem:[#allocation7 + $0x168] sm:$0xff]  }
 0x4dd   : > { %7141 = vmatmul.mubr.bf16.vlgmr.msra.gmra.mrb[0].mxu1 %v9232_v27 }
 0x4de   : > { %7144 = vmatprep.mubr.bf16.mxu1 %v9234_v61  ;;  %7173 = vmatpush3.bf16.msra.mxu1 %v8055_v42 }
 0x4df   : > { %7174 = vmatprep.subr.bf16.mxu1 %v8056_v14 }
 0x4e2   : > { %7175 = vmatpush3.bf16.msra.mxu1 %v8056_v14 }
 0x4e3   : > { %7176 = vmatprep.subr.bf16.mxu1 %v8057_v55 }
 0x4e5   : > { %7145 = vmatmul.mubr.bf16.gmra.mrb[4].mxu1 %v9236_v58 }
 0x4e6   : > { %7148 = vmatprep.mubr.bf16.mxu1 %v9238_v57  ;;  %7177 = vmatpush3.bf16.msra.mxu1 %v8057_v55 }
 0x4e7   : > { %7178 = vmatprep.subr.bf16.mxu1 %v8058_v1 }
 0x4ea   : > { %7179 = vmatpush3.bf16.msra.mxu1 %v8058_v1 }
 0x4eb   : > { %7180 = vmatprep.subr.bf16.mxu1 %v8059_v48 }
 0x4ed   : > { %7149 = vmatmul.mubr.bf16.gmra.mrb[8].mxu1 %v9240_v35 }
 0x4ee   : > { %7152 = vmatprep.mubr.bf16.mxu1 %v9242_v21  ;;  %7181 = vmatpush3.bf16.msra.mxu1 %v8059_v48 }
 0x4ef   : > { %7182 = vmatprep.subr.bf16.mxu1 %v8060_v26 }
 0x4f2   : > { %7183 = vmatpush3.bf16.msra.mxu1 %v8060_v26 }
 0x4f3   : > { %7184 = vmatprep.subr.bf16.mxu1 %v8061_v17 }
 0x4f5   : > { %7153 = vmatmul.mubr.bf16.gmra.mrb[12].mxu1 %v9244_v37 }
 0x4f6   : > { %7156 = vmatprep.mubr.bf16.mxu1 %v9246_v44  ;;  %7185 = vmatpush3.bf16.msra.mxu1 %v8061_v17 }
 0x4f7   : > { %7186 = vmatprep.subr.bf16.mxu1 %v8062_v41 }
 0x4fa   : > { %7187 = vmatpush3.bf16.msra.mxu1 %v8062_v41 }
 0x4fb   : > { %7220 = vmatprep.subr.bf16.mxu1 %v8063_v59 }
 0x4fd   : > { %7157 = vmatmul.mubr.bf16.gmra.mrb[16].mxu1 %v9248_v3 }
 0x4fe   : > { %7160 = vmatprep.mubr.bf16.mxu1 %v9250_v10 }
 0x505   : > { %7161 = vmatmul.mubr.bf16.gmra.mrb[20].mxu1 %v9252_v29 }
 0x506   : > { %7164 = vmatprep.mubr.bf16.mxu1 %v10169_v4 }
 0x50d   : > { %7165 = vmatmul.mubr.bf16.gmra.mrb[24].mxu1 %v10170_v9 }
 0x50e   : > { %7168 = vmatprep.mubr.bf16.mxu1 %v10171_v5 }
 0x515   : > { %7169 = vmatmul.mubr.bf16.gmra.mrb[28].mxu1 %v9258_v11 }
 0x516   : > { %7188 = vmatprep.mubr.bf16.mxu1 %v9232_v27  ;;  %v8068_v27 = vld [vmem:[#allocation7 + $0x1a8] sm:$0xff]  }
 0x51d   : > { %7189 = vmatmul.mubr.bf16.vlgmr.msra.gmra.mrb[0].mxu1 %v9234_v61  ;;  %v8069_v61 = vld [vmem:[#allocation7 + $0x1b0] sm:$0xff]  }
 0x51e   : > { %7192 = vmatprep.mubr.bf16.mxu1 %v9236_v58  ;;  %7221 = vmatpush3.bf16.msra.mxu1 %v8063_v59  ;;  %v8070_v58 = vld [vmem:[#allocation7 + $0x1b8] sm:$0xff]  }
 0x51f   : > { %7222 = vmatprep.subr.bf16.mxu1 %v8064_v60 }
 0x522   : > { %7223 = vmatpush3.bf16.msra.mxu1 %v8064_v60 }
 0x523   : > { %7224 = vmatprep.subr.bf16.mxu1 %v8065_v23 }
 0x525   : > { %7193 = vmatmul.mubr.bf16.gmra.mrb[4].mxu1 %v9238_v57  ;;  %v8071_v57 = vld [vmem:[#allocation7 + $0x1c0] sm:$0xff]  }
 0x526   : > { %7196 = vmatprep.mubr.bf16.mxu1 %v9240_v35  ;;  %7225 = vmatpush3.bf16.msra.mxu1 %v8065_v23  ;;  %v8072_v35 = vld [vmem:[#allocation7 + $0x1c8] sm:$0xff]  }
 0x527   : > { %7226 = vmatprep.subr.bf16.mxu1 %v8066_v53 }
 0x52a   : > { %7227 = vmatpush3.bf16.msra.mxu1 %v8066_v53 }
 0x52b   : > { %7228 = vmatprep.subr.bf16.mxu1 %v8067_v36 }
 0x52d   : > { %7197 = vmatmul.mubr.bf16.gmra.mrb[8].mxu1 %v9242_v21  ;;  %v10172_v21 = vld [vmem:[#allocation12_spill] sm:$0xff] }
 0x52e   : > { %7200 = vmatprep.mubr.bf16.mxu1 %v9244_v37  ;;  %7229 = vmatpush3.bf16.msra.mxu1 %v8067_v36  ;;  %v8073_v37 = vld [vmem:[#allocation7 + $0x1d0] sm:$0xff]  }
 0x52f   : > { %7230 = vmatprep.subr.bf16.mxu1 %v8068_v27 }
 0x532   : > { %7231 = vmatpush3.bf16.msra.mxu1 %v8068_v27 }
 0x533   : > { %7232 = vmatprep.subr.bf16.mxu1 %v8069_v61 }
 0x535   : > { %7201 = vmatmul.mubr.bf16.gmra.mrb[12].mxu1 %v9246_v44  ;;  %v8074_v44 = vld [vmem:[#allocation7 + $0x1d8] sm:$0xff]  }
 0x536   : > { %7204 = vmatprep.mubr.bf16.mxu1 %v9248_v3  ;;  %7233 = vmatpush3.bf16.msra.mxu1 %v8069_v61  ;;  %v8075_v3 = vld [vmem:[#allocation7 + $0x1e0] sm:$0xff]  }
 0x537   : > { %7234 = vmatprep.subr.bf16.mxu1 %v8070_v58 }
 0x53a   : > { %7235 = vmatpush3.bf16.msra.mxu1 %v8070_v58 }
 0x53b   : > { %7268 = vmatprep.subr.bf16.mxu1 %v8071_v57 }
 0x53d   : > { %7205 = vmatmul.mubr.bf16.gmra.mrb[16].mxu1 %v9250_v10  ;;  %v8076_v10 = vld [vmem:[#allocation7 + $0x1e8] sm:$0xff]  }
 0x53e   : > { %7208 = vmatprep.mubr.bf16.mxu1 %v9252_v29  ;;  %v8077_v29 = vld [vmem:[#allocation7 + $0x1f0] sm:$0xff]  }
 0x545   : > { %7209 = vmatmul.mubr.bf16.gmra.mrb[20].mxu1 %v10169_v4 }
 0x546   : > { %7212 = vmatprep.mubr.bf16.mxu1 %v10170_v9 }
 0x54d   : > { %7213 = vmatmul.mubr.bf16.gmra.mrb[24].mxu1 %v10171_v5 }
 0x54e   : > { %7216 = vmatprep.mubr.bf16.mxu1 %v9258_v11  ;;  %v8078_v11 = vld [vmem:[#allocation7 + $0x1f8] sm:$0xff]  }
 0x555   : > { %7217 = vmatmul.mubr.bf16.gmra.mrb[28].mxu1 %v10171_v5 }
 0x556   : > { %7236 = vmatprep.mubr.bf16.mxu1 %v9422_v7 }
 0x55d   : > { %7237 = vmatmul.mubr.bf16.vlgmr.msra.gmra.mrb[0].mxu1 %v10172_v21 }
 0x55e   : > { %7240 = vmatprep.mubr.bf16.mxu1 %v9422_v7  ;;  %7269 = vmatpush3.bf16.msra.mxu1 %v8071_v57 }
 0x55f   : > { %7270 = vmatprep.subr.bf16.mxu1 %v8072_v35 }
 0x562   : > { %7271 = vmatpush3.bf16.msra.mxu1 %v8072_v35 }
 0x563   : > { %7272 = vmatprep.subr.bf16.mxu1 %v8073_v37 }
 0x565   : > { %7241 = vmatmul.mubr.bf16.gmra.mrb[4].mxu1 %v9432_v56 }
 0x566   : > { %7244 = vmatprep.mubr.bf16.mxu1 %v9440_v16  ;;  %7273 = vmatpush3.bf16.msra.mxu1 %v8073_v37 }
 0x567   : > { %7274 = vmatprep.subr.bf16.mxu1 %v8074_v44 }
 0x56a   : > { %7275 = vmatpush3.bf16.msra.mxu1 %v8074_v44 }
 0x56b   : > { %7276 = vmatprep.subr.bf16.mxu1 %v8075_v3 }
 0x56d   : > { %7245 = vmatmul.mubr.bf16.gmra.mrb[8].mxu1 %v9448_v32 }
 0x56e   : > { %7248 = vmatprep.mubr.bf16.mxu1 %v9453_v54  ;;  %7277 = vmatpush3.bf16.msra.mxu1 %v8075_v3 }
 0x56f   : > { %7278 = vmatprep.subr.bf16.mxu1 %v8076_v10 }
 0x572   : > { %7279 = vmatpush3.bf16.msra.mxu1 %v8076_v10 }
 0x573   : > { %7280 = vmatprep.subr.bf16.mxu1 %v8077_v29 }
 0x575   : > { %7249 = vmatmul.mubr.bf16.gmra.mrb[12].mxu1 %v9460_v2 }
 0x576   : > { %7252 = vmatprep.mubr.bf16.mxu1 %v9472_v25  ;;  %7281 = vmatpush3.bf16.msra.mxu1 %v8077_v29 }
 0x577   : > { %7282 = vmatprep.subr.bf16.mxu1 %v8078_v11 }
 0x57a   : > { %7283 = vmatpush3.bf16.msra.mxu1 %v8078_v11 }
 0x57b   : > { %7316 = vmatprep.subr.bf16.mxu1 %v8079_v63 }
 0x57d   : > { %7253 = vmatmul.mubr.bf16.gmra.mrb[16].mxu1 %v9476_v43 }
 0x57e   : > { %7256 = vmatprep.mubr.bf16.mxu1 %v9483_v13 }
 0x585   : > { %7257 = vmatmul.mubr.bf16.gmra.mrb[20].mxu1 %v9488_v46 }
 0x586   : > { %7260 = vmatprep.mubr.bf16.mxu1 %v9496_v39 }
 0x58d   : > { %7261 = vmatmul.mubr.bf16.gmra.mrb[24].mxu1 %v9510_v40 }
 0x58e   : > { %7264 = vmatprep.mubr.bf16.mxu1 %v9515_v0 }
 0x595   : > { %7265 = vmatmul.mubr.bf16.gmra.mrb[28].mxu1 %v9528_v62 }
 0x596   : > { %7284 = vmatprep.mubr.bf16.mxu1 %v10172_v21 }
 0x59d   : > { %7285 = vmatmul.mubr.bf16.vlgmr.msra.gmra.mrb[0].mxu1 %v9422_v7 }
 0x59e   : > { %7288 = vmatprep.mubr.bf16.mxu1 %v9432_v56  ;;  %7317 = vmatpush3.bf16.msra.mxu1 %v8079_v63 }
 0x59f   : > { %7318 = vmatprep.subr.bf16.mxu1 %v8080_v15 }
 0x5a2   : > { %7319 = vmatpush3.bf16.msra.mxu1 %v8080_v15 }
 0x5a3   : > { %7320 = vmatprep.subr.bf16.mxu1 %v8081_v20 }
 0x5a5   : > { %7289 = vmatmul.mubr.bf16.gmra.mrb[4].mxu1 %v9440_v16 }
 0x5a6   : > { %7292 = vmatprep.mubr.bf16.mxu1 %v9448_v32  ;;  %7321 = vmatpush3.bf16.msra.mxu1 %v8081_v20 }
 0x5a7   : > { %7322 = vmatprep.subr.bf16.mxu1 %v8082_v30 }
 0x5aa   : > { %7323 = vmatpush3.bf16.msra.mxu1 %v8082_v30 }
 0x5ab   : > { %7324 = vmatprep.subr.bf16.mxu1 %v8083_v22 }
 0x5ad   : > { %7293 = vmatmul.mubr.bf16.gmra.mrb[8].mxu1 %v9453_v54 }
 0x5ae   : > { %7296 = vmatprep.mubr.bf16.mxu1 %v9460_v2  ;;  %7325 = vmatpush3.bf16.msra.mxu1 %v8083_v22 }
 0x5af   : > { %7326 = vmatprep.subr.bf16.mxu1 %v8084_v18 }
 0x5b2   : > { %7327 = vmatpush3.bf16.msra.mxu1 %v8084_v18 }
 0x5b3   : > { %7328 = vmatprep.subr.bf16.mxu1 %v8085_v45 }
 0x5b5   : > { %7297 = vmatmul.mubr.bf16.gmra.mrb[12].mxu1 %v9472_v25 }
 0x5b6   : > { %7300 = vmatprep.mubr.bf16.mxu1 %v9476_v43  ;;  %7329 = vmatpush3.bf16.msra.mxu1 %v8085_v45 }
 0x5b7   : > { %7330 = vmatprep.subr.bf16.mxu1 %v8086_v34 }
 0x5ba   : > { %7331 = vmatpush3.bf16.msra.mxu1 %v8086_v34 }
 0x5bd   : > { %7301 = vmatmul.mubr.bf16.gmra.mrb[16].mxu1 %v9483_v13 }
 0x5be   : > { %7304 = vmatprep.mubr.bf16.mxu1 %v9488_v46 }
 0x5c5   : > { %7305 = vmatmul.mubr.bf16.gmra.mrb[20].mxu1 %v9496_v39 }
 0x5c6   : > { %7308 = vmatprep.mubr.bf16.mxu1 %v9510_v40 }
 0x5cd   : > { %7309 = vmatmul.mubr.bf16.gmra.mrb[24].mxu1 %v9515_v0 }
 0x5ce   : > { %7312 = vmatprep.mubr.bf16.mxu1 %v9528_v62 }
 0x5d5   : > { %7313 = vmatmul.mubr.bf16.gmra.mrb[28].mxu1 %v9534_v51 }
 0x5d6   : > { %7332 = vmatprep.mubr.bf16.mxu1 %v9422_v7 }
 0x5dd   : > { %7333 = vmatmul.mubr.bf16.vlgmr.msra.gmra.mrb[0].mxu1 %v9432_v56 }
 0x5de   : > { %7336 = vmatprep.mubr.bf16.mxu1 %v9440_v16 }
 0x5e5   : > { %7337 = vmatmul.mubr.bf16.gmra.mrb[4].mxu1 %v9448_v32 }
 0x5e6   : > { %7340 = vmatprep.mubr.bf16.mxu1 %v9453_v54 }
 0x5ed   : > { %7341 = vmatmul.mubr.bf16.gmra.mrb[8].mxu1 %v9460_v2 }
 0x5ee   : > { %7344 = vmatprep.mubr.bf16.mxu1 %v9472_v25 }
 0x5f5   : > { %7345 = vmatmul.mubr.bf16.gmra.mrb[12].mxu1 %v9476_v43 }
 0x5f6   : > { %7348 = vmatprep.mubr.bf16.mxu1 %v9483_v13 }
 0x5fd   : > { %7349 = vmatmul.mubr.bf16.gmra.mrb[16].mxu1 %v9488_v46 }
 0x5fe   : > { %7352 = vmatprep.mubr.bf16.mxu1 %v9496_v39 }
 0x605   : > { %7353 = vmatmul.mubr.bf16.gmra.mrb[20].mxu1 %v9510_v40 }
 0x606   : > { %7356 = vmatprep.mubr.bf16.mxu1 %v9515_v0 }
 0x60d   : > { %7357 = vmatmul.mubr.bf16.gmra.mrb[24].mxu1 %v9528_v62 }
 0x60e   : > { %7360 = vmatprep.mubr.bf16.mxu1 %v9534_v51 }
 0x615   : > { %7361 = vmatmul.mubr.bf16.gmra.mrb[28].mxu1 %v9528_v62 }
 0x6b0   : > { %v9716_v7 = vpop.f32.mrb[0].mxu1 }
 0x6b1   : > { %v9718_v56 = vpop.f32.mrb[1].mxu1  ;;  %v5621_v43 = vmul.f32 %v9716_v7, %v9716_v7 }
 0x6b2   : > { %v9720_v16 = vpop.f32.mrb[2].mxu1  ;;  %v5619_v54 = vmul.f32 %v9718_v56, %v9718_v56 }
 0x6b3   : > { %v9722_v32 = vpop.f32.mrb[3].mxu1  ;;  %v5622_v39 = vmul.f32 %v9720_v16, %v9720_v16 }
 0x6b4   : > { %v5582_v2 = vadd.f32 %v9722_v32, %v9718_v56  ;;  %v5620_v25 = vmul.f32 %v9722_v32, %v9722_v32 }
 0x6b6   : > { %v5583_v13 = vadd.f32 %v9716_v7, %v5582_v2  ;;  %v5651_v46 = vadd.f32 %v5620_v25, %v5619_v54 }
 0x6b8   : > { %v5652_v40 = vadd.f32 %v5651_v46, %v5621_v43  ;;  %v9735_v0 = vpop.f32.mrb[4].mxu1  ;;  %v5584_v62 = vadd.f32 %v9720_v16, %v5583_v13 }
 0x6b9   : > { %v9738_v51 = vpop.f32.mrb[5].mxu1  ;;  %v5625_v38 = vmul.f32 %v9735_v0, %v9735_v0 }
 0x6ba   : > { %v5585_v31 = vadd.f32 %v5584_v62, %v9738_v51  ;;  %v5623_v52 = vmul.f32 %v9738_v51, %v9738_v51  ;;  %v5653_v12 = vadd.f32 %v5652_v40, %v5622_v39  ;;  %v9743_v24 = vpop.f32.mrb[6].mxu1 }
 0x6bb   : > { %v9745_v19 = vpop.f32.mrb[7].mxu1  ;;  %v5626_v50 = vmul.f32 %v9743_v24, %v9743_v24 }
 0x6bc   : > { %v5654_v33 = vadd.f32 %v5653_v12, %v5623_v52  ;;  %v5586_v8 = vadd.f32 %v5585_v31, %v9745_v19  ;;  %v5624_v6 = vmul.f32 %v9745_v19, %v9745_v19 }
 0x6be   : > { %v5587_v47 = vadd.f32 %v9735_v0, %v5586_v8  ;;  %v5655_v28 = vadd.f32 %v5654_v33, %v5624_v6 }
 0x6c0   : > { %v5656_v49 = vadd.f32 %v5655_v28, %v5625_v38  ;;  %v9755_v42 = vpop.f32.mrb[8].mxu1  ;;  %v5588_v4 = vadd.f32 %v9743_v24, %v5587_v47 }
 0x6c1   : > { %v9758_v9 = vpop.f32.mrb[9].mxu1  ;;  %v5629_v59 = vmul.f32 %v9755_v42, %v9755_v42 }
 0x6c2   : > { %v5589_v5 = vadd.f32 %v5588_v4, %v9758_v9  ;;  %v5627_v14 = vmul.f32 %v9758_v9, %v9758_v9  ;;  %v5657_v55 = vadd.f32 %v5656_v49, %v5626_v50  ;;  %v9763_v1 = vpop.f32.mrb[10].mxu1 }
 0x6c3   : > { %v9765_v48 = vpop.f32.mrb[11].mxu1  ;;  %v5630_v53 = vmul.f32 %v9763_v1, %v9763_v1 }
 0x6c4   : > { %v5658_v26 = vadd.f32 %v5657_v55, %v5627_v14  ;;  %v5590_v17 = vadd.f32 %v5589_v5, %v9765_v48  ;;  %v5628_v41 = vmul.f32 %v9765_v48, %v9765_v48 }
 0x6c6   : > { %v5591_v60 = vadd.f32 %v9755_v42, %v5590_v17  ;;  %v5659_v23 = vadd.f32 %v5658_v26, %v5628_v41 }
 0x6c8   : > { %v5660_v36 = vadd.f32 %v5659_v23, %v5629_v59  ;;  %v9775_v27 = vpop.f32.mrb[12].mxu1  ;;  %v5592_v61 = vadd.f32 %v9763_v1, %v5591_v60 }
 0x6c9   : > { %v9778_v58 = vpop.f32.mrb[13].mxu1  ;;  %v5633_v11 = vmul.f32 %v9775_v27, %v9775_v27 }
 0x6ca   : > { %v5593_v57 = vadd.f32 %v5592_v61, %v9778_v58  ;;  %v5631_v35 = vmul.f32 %v9778_v58, %v9778_v58  ;;  %v5661_v21 = vadd.f32 %v5660_v36, %v5630_v53  ;;  %v9783_v37 = vpop.f32.mrb[14].mxu1 }
 0x6cb   : > { %v9785_v44 = vpop.f32.mrb[15].mxu1  ;;  %v5634_v20 = vmul.f32 %v9783_v37, %v9783_v37 }
 0x6cc   : > { %v5662_v3 = vadd.f32 %v5661_v21, %v5631_v35  ;;  %v5594_v10 = vadd.f32 %v5593_v57, %v9785_v44  ;;  %v5632_v29 = vmul.f32 %v9785_v44, %v9785_v44 }
 0x6ce   : > { %v5595_v63 = vadd.f32 %v9775_v27, %v5594_v10  ;;  %v5663_v15 = vadd.f32 %v5662_v3, %v5632_v29 }
 0x6d0   : > { %v5664_v30 = vadd.f32 %v5663_v15, %v5633_v11  ;;  %v9795_v22 = vpop.f32.mrb[16].mxu1  ;;  %v5596_v18 = vadd.f32 %v9783_v37, %v5595_v63 }
 0x6d1   : > { %v9798_v45 = vpop.f32.mrb[17].mxu1  ;;  %v5637_v40 = vmul.f32 %v9795_v22, %v9795_v22 }
 0x6d2   : > { %v5597_v34 = vadd.f32 %v5596_v18, %v9798_v45  ;;  %v5635_v54 = vmul.f32 %v9798_v45, %v9798_v45  ;;  %v5665_v2 = vadd.f32 %v5664_v30, %v5634_v20  ;;  %v9803_v25 = vpop.f32.mrb[18].mxu1 }
 0x6d3   : > { %v9805_v43 = vpop.f32.mrb[19].mxu1  ;;  %v5638_v52 = vmul.f32 %v9803_v25, %v9803_v25 }
 0x6d4   : > { %v5666_v13 = vadd.f32 %v5665_v2, %v5635_v54  ;;  %v5598_v46 = vadd.f32 %v5597_v34, %v9805_v43  ;;  %v5636_v39 = vmul.f32 %v9805_v43, %v9805_v43 }
 0x6d6   : > { %v5599_v62 = vadd.f32 %v9795_v22, %v5598_v46  ;;  %v5667_v31 = vadd.f32 %v5666_v13, %v5636_v39 }
 0x6d8   : > { %v5668_v12 = vadd.f32 %v5667_v31, %v5637_v40  ;;  %v9815_v33 = vpop.f32.mrb[20].mxu1  ;;  %v5600_v8 = vadd.f32 %v9803_v25, %v5599_v62 }
 0x6d9   : > { %v9818_v6 = vpop.f32.mrb[21].mxu1  ;;  %v5641_v55 = vmul.f32 %v9815_v33, %v9815_v33 }
 0x6da   : > { %v5601_v38 = vadd.f32 %v5600_v8, %v9818_v6  ;;  %v5639_v47 = vmul.f32 %v9818_v6, %v9818_v6  ;;  %v5669_v28 = vadd.f32 %v5668_v12, %v5638_v52  ;;  %v9823_v50 = vpop.f32.mrb[22].mxu1 }
 0x6db   : > { %v9825_v49 = vpop.f32.mrb[23].mxu1  ;;  %v5642_v41 = vmul.f32 %v9823_v50, %v9823_v50 }
 0x6dc   : > { %v5670_v4 = vadd.f32 %v5669_v28, %v5639_v47  ;;  %v5602_v5 = vadd.f32 %v5601_v38, %v9825_v49  ;;  %v5640_v14 = vmul.f32 %v9825_v49, %v9825_v49 }
 0x6de   : > { %v5603_v26 = vadd.f32 %v9815_v33, %v5602_v5  ;;  %v5671_v17 = vadd.f32 %v5670_v4, %v5640_v14 }
 0x6e0   : > { %v5672_v59 = vadd.f32 %v5671_v17, %v5641_v55  ;;  %v9835_v60 = vpop.f32.mrb[24].mxu1  ;;  %v5604_v23 = vadd.f32 %v9823_v50, %v5603_v26 }
 0x6e1   : > { %v9838_v53 = vpop.f32.mrb[25].mxu1  ;;  %v5645_v11 = vmul.f32 %v9835_v60, %v9835_v60 }
 0x6e2   : > { %v5605_v36 = vadd.f32 %v5604_v23, %v9838_v53  ;;  %v5643_v61 = vmul.f32 %v9838_v53, %v9838_v53  ;;  %v5673_v57 = vadd.f32 %v5672_v59, %v5642_v41  ;;  %v9843_v35 = vpop.f32.mrb[26].mxu1 }
 0x6e3   : > { %v9845_v21 = vpop.f32.mrb[27].mxu1  ;;  %v5646_v20 = vmul.f32 %v9843_v35, %v9843_v35 }
 0x6e4   : > { %v5674_v3 = vadd.f32 %v5673_v57, %v5643_v61  ;;  %v5606_v10 = vadd.f32 %v5605_v36, %v9845_v21  ;;  %v5644_v29 = vmul.f32 %v9845_v21, %v9845_v21 }
 0x6e6   : > { %v5607_v63 = vadd.f32 %v9835_v60, %v5606_v10  ;;  %v5675_v15 = vadd.f32 %v5674_v3, %v5644_v29 }
 0x6e8   : > { %v5676_v30 = vadd.f32 %v5675_v15, %v5645_v11  ;;  %v9855_v18 = vpop.f32.mrb[28].mxu1  ;;  %v5608_v34 = vadd.f32 %v9843_v35, %v5607_v63 }
 0x6e9   : > { %v9858_v54 = vpop.f32.mrb[29].mxu1  ;;  %v5649_v12 = vmul.f32 %v9855_v18, %v9855_v18 }
 0x6ea   : > { %v5609_v2 = vadd.f32 %v5608_v34, %v9858_v54  ;;  %v5647_v13 = vmul.f32 %v9858_v54, %v9858_v54  ;;  %v5677_v46 = vadd.f32 %v5676_v30, %v5646_v20  ;;  %v9863_v39 = vpop.f32.mrb[30].mxu1 }
 0x6eb   : > { %v9865_v40 = vpop.f32.mrb[31].mxu1  ;;  %v5650_v47 = vmul.f32 %v9863_v39, %v9863_v39 }
 0x6ec   : > { %v5678_v62 = vadd.f32 %v5677_v46, %v5647_v13  ;;  %v5610_v31 = vadd.f32 %v5609_v2, %v9865_v40  ;;  %v5648_v52 = vmul.f32 %v9865_v40, %v9865_v40 }
 0x6ee   : > { %v5611_v8 = vadd.f32 %v9855_v18, %v5610_v31  ;;  %v5679_v38 = vadd.f32 %v5678_v62, %v5648_v52 }
 0x6f0   : > { %v5612_v28 = vadd.f32 %v9863_v39, %v5611_v8  ;;  %v5680_v4 = vadd.f32 %v5679_v38, %v5649_v12 }
 0x6f2   : > { %v5613_v5 = vrot.slane %v5612_v28, 4  ;;  %v5681_v14 = vadd.f32 %v5680_v4, %v5650_v47 }
 0x6f4   : > { %v5614_v55 = vadd.f32 %v5613_v5, %v5612_v28  ;;  %v5682_v26 = vrot.slane %v5681_v14, 4 }
 0x6f6   : > { %v5615_v17 = vrot.slane %v5614_v55, 2  ;;  %v5683_v41 = vadd.f32 %v5682_v26, %v5681_v14 }
 0x6f8   : > { %v5616_v59 = vadd.f32 %v5615_v17, %v5614_v55  ;;  %v5684_v23 = vrot.slane %v5683_v41, 2 }
 0x6fa   : > { %v5617_v36 = vrot.slane %v5616_v59, 1  ;;  %v5685_v61 = vadd.f32 %v5684_v23, %v5683_v41 }
 0x6fc   : > { %v5618_v57 = vadd.f32 %v5617_v36, %v5616_v59  ;;  %v5686_v3 = vrot.slane %v5685_v61, 1 }
 0x6fe   : > { %v5687_v10 = vadd.f32 %v5686_v3, %v5685_v61  ;;  %v9876_v29 = vmul.f32 0.00390625, %v5618_v57 }
 0x700   : > { %v5689_v11 = vmul.f32 0.00390625, %v5687_v10  ;;  %v5690_v63 = vmul.f32 %v9876_v29, %v9876_v29  ;;  %v5695_v15 = vsub.f32 %v9718_v56, %v9876_v29  ;;  %v5696_v20 = vsub.f32 %v9722_v32, %v9876_v29 }
 0x701   : > { %v5697_v30 = vsub.f32 %v9716_v7, %v9876_v29  ;;  %v5698_v34 = vsub.f32 %v9720_v16, %v9876_v29  ;;  %v5699_v2 = vsub.f32 %v9738_v51, %v9876_v29  ;;  %v5700_v13 = vsub.f32 %v9745_v19, %v9876_v29 }
 0x702   : > { %v5691_v46 = vsub.f32 %v5689_v11, %v5690_v63  ;;  %v5701_v62 = vsub.f32 %v9735_v0, %v9876_v29  ;;  %v5702_v56 = vsub.f32 %v9743_v24, %v9876_v29  ;;  %v5703_v32 = vsub.f32 %v9758_v9, %v9876_v29 }
 0x703   : > { %v5704_v7 = vsub.f32 %v9765_v48, %v9876_v29  ;;  %v5705_v16 = vsub.f32 %v9755_v42, %v9876_v29  ;;  %v5706_v51 = vsub.f32 %v9763_v1, %v9876_v29  ;;  %v5707_v19 = vsub.f32 %v9778_v58, %v9876_v29 }
 0x704   : > { %v5692_v31 = vmax.f32 %v5691_v46, 0.0  ;;  %v5708_v0 = vsub.f32 %v9785_v44, %v9876_v29  ;;  %v5709_v24 = vsub.f32 %v9775_v27, %v9876_v29  ;;  %v5710_v9 = vsub.f32 %v9783_v37, %v9876_v29  ;;  %v8092_v46 = vld [vmem:[%s8425_s9 + $0x18] sm:$0xff] }
 0x705   : > { %v5711_v48 = vsub.f32 %v9798_v45, %v9876_v29  ;;  %v5712_v42 = vsub.f32 %v9805_v43, %v9876_v29  ;;  %v5713_v1 = vsub.f32 %v9795_v22, %v9876_v29  ;;  %v5714_v58 = vsub.f32 %v9803_v25, %v9876_v29 }
 0x706   : > { %v5693_v44 = vadd.f32 1e-05, %v5692_v31  ;;  %v5715_v27 = vsub.f32 %v9818_v6, %v9876_v29  ;;  %v5716_v37 = vsub.f32 %v9825_v49, %v9876_v29  ;;  %v5717_v45 = vsub.f32 %v9815_v33, %v9876_v29  ;;  %v8096_v31 = vld [vmem:[%s8425_s9 + $0x38] sm:$0xff] }
 0x707   : > { %v5718_v43 = vsub.f32 %v9823_v50, %v9876_v29  ;;  %v5719_v22 = vsub.f32 %v9838_v53, %v9876_v29  ;;  %v5720_v25 = vsub.f32 %v9845_v21, %v9876_v29  ;;  %v5721_v52 = vsub.f32 %v9835_v60, %v9876_v29 }
 0x708   : > { %8089 = vrsqrt.f32 %v5693_v44  ;;  %v5722_v6 = vsub.f32 %v9843_v35, %v9876_v29  ;;  %v5723_v49 = vsub.f32 %v9858_v54, %v9876_v29  ;;  %v5724_v33 = vsub.f32 %v9865_v40, %v9876_v29  ;;  %v8100_v44 = vld [vmem:[%s8425_s9 + $0x58] sm:$0xff] }
 0x709   : > { %v5725_v50 = vsub.f32 %v9855_v18, %v9876_v29  ;;  %v5726_v53 = vsub.f32 %v9863_v39, %v9876_v29 }
 0x712   : > { %v8090_v21 = vpop.eup %8089 }
 0x713   : > { %v5727_v60 = vmul.f32 %v8090_v21, %v5695_v15  ;;  %v5728_v35 = vmul.f32 %v8090_v21, %v5696_v20  ;;  %v5729_v12 = vmul.f32 %v8090_v21, %v5697_v30  ;;  %v5730_v8 = vmul.f32 %v8090_v21, %v5698_v34 }
 0x714   : > { %v5731_v54 = vmul.f32 %v8090_v21, %v5699_v2  ;;  %v5732_v38 = vmul.f32 %v8090_v21, %v5700_v13  ;;  %v5733_v47 = vmul.f32 %v8090_v21, %v5701_v62  ;;  %v5734_v40 = vmul.f32 %v8090_v21, %v5702_v56  ;;  %v8091_v2 = vld [vmem:[%s8425_s9 + $0x10] sm:$0xff]  ;;  %v8093_v56 = vld [vmem:[%s8425_s9 + $0x20] sm:$0xff] }
 0x715   : > { %v5735_v28 = vmul.f32 %v8090_v21, %v5703_v32  ;;  %v5736_v4 = vmul.f32 %v8090_v21, %v5704_v7  ;;  %v5737_v18 = vmul.f32 %v8090_v21, %v5705_v16  ;;  %v5738_v5 = vmul.f32 %v8090_v21, %v5706_v51  ;;  %v8094_v7 = vld [vmem:[%s8425_s9 + $0x28] sm:$0xff]  ;;  %v8095_v51 = vld [vmem:[%s8425_s9 + $0x30] sm:$0xff] }
 0x716   : > { %v5739_v14 = vmul.f32 %v8090_v21, %v5707_v19  ;;  %v5740_v39 = vmul.f32 %v8090_v21, %v5708_v0  ;;  %v5741_v55 = vmul.f32 %v8090_v21, %v5709_v24  ;;  %v5742_v26 = vmul.f32 %v8090_v21, %v5710_v9  ;;  %v8097_v24 = vld [vmem:[%s8425_s9 + $0x40] sm:$0xff] }
 0x717   : > { %v5743_v17 = vmul.f32 %v8090_v21, %v5711_v48  ;;  %v5744_v41 = vmul.f32 %v8090_v21, %v5712_v42  ;;  %v5745_v59 = vmul.f32 %v8090_v21, %v5713_v1  ;;  %v5746_v23 = vmul.f32 %v8090_v21, %v5714_v58  ;;  %v8098_v48 = vld [vmem:[%s8425_s9 + $0x48] sm:$0xff]  ;;  %v8099_v1 = vld [vmem:[%s8425_s9 + $0x50] sm:$0xff] }
 0x718   : > { %v9949_v36 = vmul.f32 %v8090_v21, %v5715_v27  ;;  %v9951_v61 = vmul.f32 %v8090_v21, %v5716_v37  ;;  %v9953_v57 = vmul.f32 %v8090_v21, %v5717_v45  ;;  %v9955_v3 = vmul.f32 %v8090_v21, %v5718_v43  ;;  %v8101_v37 = vld [vmem:[%s8425_s9 + $0x60] sm:$0xff]  ;;  %v8102_v43 = vld [vmem:[%s8425_s9 + $0x68] sm:$0xff] }
 0x719   : > { %v9957_v10 = vmul.f32 %v8090_v21, %v5719_v22  ;;  %v9959_v29 = vmul.f32 %v8090_v21, %v5720_v25  ;;  %v9961_v11 = vmul.f32 %v8090_v21, %v5721_v52  ;;  %v9963_v63 = vmul.f32 %v8090_v21, %v5722_v6  ;;  %v8103_v25 = vld [vmem:[%s8425_s9 + $0x70] sm:$0xff]  ;;  %v8104_v6 = vld [vmem:[%s8425_s9 + $0x78] sm:$0xff] }
 0x71a   : > { %v9970_v15 = vmul.f32 %v8090_v21, %v5723_v49  ;;  %v9972_v20 = vmul.f32 %v8090_v21, %v5724_v33  ;;  %v9974_v30 = vmul.f32 %v8090_v21, %v5725_v50  ;;  %v9976_v34 = vmul.f32 %v8090_v21, %v5726_v53  ;;  %v8105_v33 = vld [vmem:[%s8425_s9 + $0x80] sm:$0xff]  ;;  %v8106_v53 = vld [vmem:[%s8425_s9 + $0x88] sm:$0xff] }
 0x71b   : > { %v5759_v13 = vadd.f32 %v8091_v2, %v5727_v60  ;;  %v5760_v62 = vadd.f32 %v8092_v46, %v5728_v35  ;;  %v5761_v32 = vadd.f32 %v8093_v56, %v5729_v12  ;;  %v5762_v16 = vadd.f32 %v8094_v7, %v5730_v8  ;;  %v8107_v60 = vld [vmem:[%s8425_s9 + $0x90] sm:$0xff]  ;;  %v8108_v12 = vld [vmem:[%s8425_s9 + $0x98] sm:$0xff]  ;;  %v8121_v2 = vld [vmem:[%s8425_s9 + $0x100] sm:$0xff] }
 0x71c   : > { %v5763_v19 = vadd.f32 %v8095_v51, %v5731_v54  ;;  %v5764_v0 = vadd.f32 %v8096_v31, %v5732_v38  ;;  %v5765_v9 = vadd.f32 %v8097_v24, %v5733_v47  ;;  %v5766_v42 = vadd.f32 %v8098_v48, %v5734_v40  ;;  %v8109_v54 = vld [vmem:[%s8425_s9 + $0xa0] sm:$0xff]  ;;  %v8110_v47 = vld [vmem:[%s8425_s9 + $0xa8] sm:$0xff] }
 0x71d   : > { %v5767_v58 = vadd.f32 %v8099_v1, %v5735_v28  ;;  %v5768_v27 = vadd.f32 %v8100_v44, %v5736_v4  ;;  %v5769_v45 = vadd.f32 %v8101_v37, %v5737_v18  ;;  %v5770_v22 = vadd.f32 %v8102_v43, %v5738_v5  ;;  %5792 = vst.msk [vmem:[%s9968_s8] sm:$0xff] %vm5791_vm6, %v5759_v13  ;;  %v8111_v28 = vld [vmem:[%s8425_s9 + $0xb0] sm:$0xff]  ;;  %v8112_v18 = vld [vmem:[%s8425_s9 + $0xb8] sm:$0xff]  ;;  %v8122_v46 = vld [vmem:[%s8425_s9 + $0x108] sm:$0xff] }
 0x71e   : > { %5793 = vst.msk [vmem:[%s9968_s8 + $0x8] sm:$0xff] %vm5791_vm6, %v5760_v62  ;;  %5794 = vst.msk [vmem:[%s9968_s8 + $0x10] sm:$0xff] %vm5791_vm6, %v5761_v32  ;;  %v5771_v52 = vadd.f32 %v8103_v25, %v5739_v14  ;;  %v5772_v49 = vadd.f32 %v8104_v6, %v5740_v39  ;;  %v5773_v50 = vadd.f32 %v8105_v33, %v5741_v55  ;;  %v8113_v14 = vld [vmem:[%s8425_s9 + $0xc0] sm:$0xff]  ;;  %v8114_v55 = vld [vmem:[%s8425_s9 + $0xc8] sm:$0xff] }
 0x71f   : > { %5795 = vst.msk [vmem:[%s9968_s8 + $0x18] sm:$0xff] %vm5791_vm6, %v5762_v16  ;;  %v5774_v21 = vadd.f32 %v8106_v53, %v5742_v26  ;;  %5796 = vst.msk [vmem:[%s9968_s8 + $0x20] sm:$0xff] %vm5791_vm6, %v5763_v19  ;;  %v5775_v35 = vadd.f32 %v8107_v60, %v5743_v17  ;;  %v5776_v8 = vadd.f32 %v8108_v12, %v5744_v41  ;;  %v8115_v17 = vld [vmem:[%s8425_s9 + $0xd0] sm:$0xff] }
 0x720   : > { %5797 = vst.msk [vmem:[%s9968_s8 + $0x28] sm:$0xff] %vm5791_vm6, %v5764_v0  ;;  %5798 = vst.msk [vmem:[%s9968_s8 + $0x30] sm:$0xff] %vm5791_vm6, %v5765_v9  ;;  %v5777_v38 = vadd.f32 %v8109_v54, %v5745_v59  ;;  %v5778_v40 = vadd.f32 %v8110_v47, %v5746_v23  ;;  %v5779_v4 = vadd.f32 %v8111_v28, %v9949_v36  ;;  %v8116_v59 = vld [vmem:[%s8425_s9 + $0xd8] sm:$0xff]  ;;  %v8117_v36 = vld [vmem:[%s8425_s9 + $0xe0] sm:$0xff] }
 0x721   : > { %5799 = vst.msk [vmem:[%s9968_s8 + $0x38] sm:$0xff] %vm5791_vm6, %v5766_v42  ;;  %5800 = vst.msk [vmem:[%s9968_s8 + $0x40] sm:$0xff] %vm5791_vm6, %v5767_v58  ;;  %v5780_v5 = vadd.f32 %v8112_v18, %v9951_v61  ;;  %v5781_v39 = vadd.f32 %v8113_v14, %v9953_v57  ;;  %v5782_v26 = vadd.f32 %v8114_v55, %v9955_v3  ;;  %v8118_v57 = vld [vmem:[%s8425_s9 + $0xe8] sm:$0xff] }
 0x722   : > { %5801 = vst.msk [vmem:[%s9968_s8 + $0x48] sm:$0xff] %vm5791_vm6, %v5768_v27  ;;  %5802 = vst.msk [vmem:[%s9968_s8 + $0x50] sm:$0xff] %vm5791_vm6, %v5769_v45  ;;  %v5783_v41 = vadd.f32 %v8115_v17, %v9957_v10  ;;  %v5784_v23 = vadd.f32 %v8116_v59, %v9959_v29  ;;  %v5785_v61 = vadd.f32 %v8117_v36, %v9961_v11  ;;  %v8119_v10 = vld [vmem:[%s8425_s9 + $0xf0] sm:$0xff]  ;;  %v8120_v11 = vld [vmem:[%s8425_s9 + $0xf8] sm:$0xff] }
 0x723   : > { %5803 = vst.msk [vmem:[%s9968_s8 + $0x58] sm:$0xff] %vm5791_vm6, %v5770_v22  ;;  %5804 = vst.msk [vmem:[%s9968_s8 + $0x60] sm:$0xff] %vm5791_vm6, %v5771_v52  ;;  %v5786_v3 = vadd.f32 %v8118_v57, %v9963_v63  ;;  %v5787_v29 = vadd.f32 %v8119_v10, %v9970_v15  ;;  %v5788_v63 = vadd.f32 %v8120_v11, %v9972_v20 }
 0x724   : > { %5805 = vst.msk [vmem:[%s9968_s8 + $0x68] sm:$0xff] %vm5791_vm6, %v5772_v49  ;;  %5806 = vst.msk [vmem:[%s9968_s8 + $0x70] sm:$0xff] %vm5791_vm6, %v5773_v50  ;;  %v5789_v13 = vadd.f32 %v8121_v2, %v9974_v30  ;;  %v5790_v62 = vadd.f32 %v8122_v46, %v9976_v34 }
 0x725   : > { %5807 = vst.msk [vmem:[%s9968_s8 + $0x78] sm:$0xff] %vm5791_vm6, %v5774_v21  ;;  %5808 = vst.msk [vmem:[%s9968_s8 + $0x80] sm:$0xff] %vm5791_vm6, %v5775_v35 }
 0x726   : > { %5809 = vst.msk [vmem:[%s9968_s8 + $0x88] sm:$0xff] %vm5791_vm6, %v5776_v8  ;;  %5810 = vst.msk [vmem:[%s9968_s8 + $0x90] sm:$0xff] %vm5791_vm6, %v5777_v38 }
 0x727   : > { %5811 = vst.msk [vmem:[%s9968_s8 + $0x98] sm:$0xff] %vm5791_vm6, %v5778_v40  ;;  %5812 = vst.msk [vmem:[%s9968_s8 + $0xa0] sm:$0xff] %vm5791_vm6, %v5779_v4 }
 0x728   : > { %5813 = vst.msk [vmem:[%s9968_s8 + $0xa8] sm:$0xff] %vm5791_vm6, %v5780_v5  ;;  %5814 = vst.msk [vmem:[%s9968_s8 + $0xb0] sm:$0xff] %vm5791_vm6, %v5781_v39 }
 0x729   : > { %5815 = vst.msk [vmem:[%s9968_s8 + $0xb8] sm:$0xff] %vm5791_vm6, %v5782_v26  ;;  %5816 = vst.msk [vmem:[%s9968_s8 + $0xc0] sm:$0xff] %vm5791_vm6, %v5783_v41 }
 0x72a   : > { %5817 = vst.msk [vmem:[%s9968_s8 + $0xc8] sm:$0xff] %vm5791_vm6, %v5784_v23  ;;  %5818 = vst.msk [vmem:[%s9968_s8 + $0xd0] sm:$0xff] %vm5791_vm6, %v5785_v61 }
 0x72b   : > { %5819 = vst.msk [vmem:[%s9968_s8 + $0xd8] sm:$0xff] %vm5791_vm6, %v5786_v3  ;;  %5820 = vst.msk [vmem:[%s9968_s8 + $0xe0] sm:$0xff] %vm5791_vm6, %v5787_v29 }
 0x72c   : > { %5821 = vst.msk [vmem:[%s9968_s8 + $0xe8] sm:$0xff] %vm5791_vm6, %v5788_v63  ;;  %5822 = vst.msk [vmem:[%s9968_s8 + $0xf0] sm:$0xff] %vm5791_vm6, %v5789_v13 }
 0x72d   : > { %5823 = vst.msk [vmem:[%s9968_s8 + $0xf8] sm:$0xff] %vm5791_vm6, %v5790_v62 }
 0x72e PF: > { %p14_p9 = scmp.ge.s32.totalorder %s8369_s27, 4   ;;  %s10173_s12 = smov %s8239_s13 }
 0x72f   : > { %s10174_s13 = smov %s8243_s14  ;;  %s10175_s14 = smov %s8380_s30 }
 0x730   : > { %s10176_s15 = smov %s8369_s27  ;;  %16 = sbr.rel (!%p14_p9) target bundleno = 4 (0x4), region = 82 }
 0x737   :  { %5845 = vsyncpa [#allocation4], 1 }
 0x738   :  { %5847 = vsyncpa [#allocation4 + $0x1], 1 }
 0x739   :  { %5848 = vsyncpa [#allocation6], 1 }

</bundles_post_ra>
